<compile_context>
chip_gen: v5e
topology: v5e:2x2
jax: 0.10.0
libtpu: 0.0.40
codegen_flags: <defaults>
</compile_context>

<pallas_src>
import functools

import jax
import jax.numpy as jnp
from jax.experimental import pallas as pl
from jax.experimental.pallas import tpu as pltpu

EMBED_DIM = 384               # WSI patch feature dim
WSI_PROJ_DIM = 256            # projection dim (= attention `dim`)
DIM_HEAD = WSI_PROJ_DIM // 2  # 128, heads = 1
N_CLASSES = 2
FF_MULT = 1                   # TODO(synk): FeedForward hidden width taken as dim*FF_MULT (repo layer not shown).
FF_HIDDEN = DIM_HEAD * FF_MULT
LN_EPS = 1e-5                 # torch nn.LayerNorm default
SNN_HIDDEN = [256, 256]
NEG = -1e30                   # finite "-inf" (avoids inf-inf NaN traps)
NUM_CORES = 2                 # leading "parallel" grid axis (v7x megacore; sequential on 1-TC chips)
HSUM_ROWS = 8                 # sublane-padded rows for the per-core mean-pool partial output


def _round_up(x, m):
    return ((x + m - 1) // m) * m


def _pick_vmem_limit():
    # Generation-aware scoped-VMEM limit: ~3/4 of physical (96 MiB on v5e/v6e, 48 MiB on v7x),
    # conservative fallback if the query is unavailable.
    try:
        cap = int(pltpu.get_tpu_info().vmem_capacity_bytes)
        return int(min(96 * 1024 * 1024, (cap * 3) // 4))
    except Exception:
        return 48 * 1024 * 1024


# --------------------------- in-kernel helpers ---------------------------

def _ln_norm(x, eps=LN_EPS):
    # LayerNorm WITHOUT the affine: gamma/beta are folded into the following matmul weights
    # (or applied to the pooled vector in the wrapper).
    mu = jnp.mean(x, axis=-1, keepdims=True)
    var = jnp.mean((x - mu) ** 2, axis=-1, keepdims=True)
    return (x - mu) * jax.lax.rsqrt(var + eps)


def _gelu_tanh(x):
    # tanh-approx GELU: tanh runs on the EUP slot instead of ~20 f32 VALU ops of an erf poly.
    c = 0.7978845608028654  # sqrt(2/pi)
    return 0.5 * x * (1.0 + jnp.tanh(c * (x + 0.044715 * x * x * x)))


# ------------------------------ the kernel -------------------------------

def _survpath_kernel(num_pathways,
                     nvalid_ref,                        # scalar prefetch (SMEM), (1,) int32
                     wsi_ref, homic_ref,
                     wproj_ref, bproj_ref,
                     wqkv_ref, bqkv_ref,
                     ffw1_ref, ffb1_ref, ffw2_ref, ffb2_ref,
                     spp_ref, attn_phs_ref, attn_hpt_ref,
                     m_part_ref, l_part_ref, accp_part_ref, hsum_part_ref,
                     m_sc, l_sc, accp_sc, hsum_sc, qkvp_sc):
    c = pl.program_id(0)            # core slot ("parallel")
    j = pl.program_id(1)            # tile within this core ("arbitrary")
    ntpc = pl.num_programs(1)
    tile_n = wsi_ref.shape[0]
    p_pad = homic_ref.shape[0]
    n_valid = nvalid_ref[0]
    i_glob = c * ntpc + j

    nt = (((1,), (1,)), ((), ()))    # a @ b.T
    tn = (((0,), (0,)), ((), ()))    # a.T @ b

    # ---- per-core step 0: cache pathway-token QKV; init online-softmax / pool state ----
    @pl.when(j == 0)
    def _init():
        x_p = _ln_norm(homic_ref[...])                                            # [P_pad, 256]
        qkv_p0 = jnp.dot(x_p.astype(jnp.bfloat16), wqkv_ref[...],
                         preferred_element_type=jnp.float32) + bqkv_ref[...]      # [P_pad, 384]
        qkvp_sc[...] = qkv_p0
        hsum_sc[...] = jnp.zeros_like(hsum_sc)

        @pl.when(c == 0)
        def _core0():
            # pathway-pathway keys only live in core 0's online-softmax state
            q_p0 = qkv_p0[:, :DIM_HEAD].astype(jnp.bfloat16)        # scale folded into wqkv
            k_p0 = qkv_p0[:, DIM_HEAD:2 * DIM_HEAD].astype(jnp.bfloat16)
            v_p0 = qkv_p0[:, 2 * DIM_HEAD:]
            pcol = jax.lax.broadcasted_iota(jnp.int32, (1, p_pad), 1) < num_pathways
            s_pp = jax.lax.dot_general(q_p0, k_p0, nt, preferred_element_type=jnp.float32)
            s_pp = jnp.where(pcol, s_pp, NEG)
            spp_ref[...] = s_pp
            m0 = jnp.max(s_pp, axis=-1, keepdims=True)
            e0 = jnp.exp(s_pp - m0)
            m_sc[...] = m0
            l_sc[...] = jnp.sum(e0, axis=-1, keepdims=True)
            accp_sc[...] = jnp.dot(e0, v_p0, preferred_element_type=jnp.float32)

        @pl.when(c != 0)
        def _corex():
            m_sc[...] = jnp.full_like(m_sc, NEG)
            l_sc[...] = jnp.zeros_like(l_sc)
            accp_sc[...] = jnp.zeros_like(accp_sc)

    # cached pathway tokens (tiny per-step casts only)
    qkv_p = qkvp_sc[...]
    q_p = qkv_p[:, :DIM_HEAD].astype(jnp.bfloat16)
    k_p = qkv_p[:, DIM_HEAD:2 * DIM_HEAD].astype(jnp.bfloat16)
    v_pb = qkv_p[:, 2 * DIM_HEAD:].astype(jnp.bfloat16)

    # ---- wsi tile: projection -> affine-free LN -> QKV (affines + scale folded into weights) ----
    wsi_embed = jnp.dot(wsi_ref[...], wproj_ref[...],
                        preferred_element_type=jnp.float32) + bproj_ref[...]       # [T, 256]
    x_h = _ln_norm(wsi_embed)
    qkv_h = jnp.dot(x_h.astype(jnp.bfloat16), wqkv_ref[...],
                    preferred_element_type=jnp.float32) + bqkv_ref[...]            # [T, 384]
    q_h = qkv_h[:, :DIM_HEAD].astype(jnp.bfloat16)
    k_h = qkv_h[:, DIM_HEAD:2 * DIM_HEAD].astype(jnp.bfloat16)
    v_h = qkv_h[:, 2 * DIM_HEAD:].astype(jnp.bfloat16)

    col_valid = (jax.lax.broadcasted_iota(jnp.int32, (1, tile_n), 1)
                 + i_glob * tile_n) < n_valid                                      # [1, T]
    row_valid = (jax.lax.broadcasted_iota(jnp.int32, (tile_n, 1), 0)
                 + i_glob * tile_n) < n_valid                                      # [T, 1]

    # ---- pathway queries vs. this histology tile: online softmax over ALL keys ----
    s_ph = jax.lax.dot_general(q_p, k_h, nt, preferred_element_type=jnp.float32)   # [P_pad, T]
    s_ph = jnp.where(col_valid, s_ph, NEG)
    # raw scores; the wrapper reconstructs the normalised map from the merged (m, l)
    attn_phs_ref[...] = s_ph.astype(attn_phs_ref.dtype)

    m_prev = m_sc[...]
    m_new = jnp.maximum(m_prev, jnp.max(s_ph, axis=-1, keepdims=True))
    alpha = jnp.exp(m_prev - m_new)
    p_ph = jnp.exp(s_ph - m_new)                                                   # [P_pad, T]
    l_sc[...] = alpha * l_sc[...] + jnp.sum(p_ph, axis=-1, keepdims=True)
    accp_sc[...] = alpha * accp_sc[...] + jnp.dot(
        p_ph.astype(jnp.bfloat16), v_h, preferred_element_type=jnp.float32)
    m_sc[...] = m_new

    # ---- histology queries vs. pathway keys (local softmax; stored transposed = lane dense) ----
    prow = jax.lax.broadcasted_iota(jnp.int32, (p_pad, 1), 0) < num_pathways
    s_hpt = jax.lax.dot_general(k_p, q_h, nt, preferred_element_type=jnp.float32)  # [P_pad, T]
    s_hpt = jnp.where(prow, s_hpt, NEG)
    m_h = jnp.max(s_hpt, axis=0, keepdims=True)
    e_h = jnp.exp(s_hpt - m_h)
    a_hpt = e_h * pl.reciprocal(jnp.sum(e_h, axis=0, keepdims=True), approx=True)  # [P_pad, T]
    attn_hpt_ref[...] = a_hpt.astype(attn_hpt_ref.dtype)
    # NOTE: K = P_pad contraction under-fills the MXU; tiny FLOPs, left as-is per review.
    out_h = jax.lax.dot_general(a_hpt.astype(jnp.bfloat16), v_pb, tn,
                                preferred_element_type=jnp.float32)                # [T, 128]

    # ---- FeedForward (pre-norm MLP, dropout = identity), ends at the PRE-affine final LN;
    #      ln2 gamma/beta are applied to the pooled vector in the wrapper (exact). ----
    y = _ln_norm(out_h)
    y = jnp.dot(y.astype(jnp.bfloat16), ffw1_ref[...],
                preferred_element_type=jnp.float32) + ffb1_ref[...]
    y = _gelu_tanh(y)
    y = jnp.dot(y.astype(jnp.bfloat16), ffw2_ref[...],
                preferred_element_type=jnp.float32) + ffb2_ref[...]
    mm_h = _ln_norm(y)                                                             # [T, 128]
    hsum_sc[...] = hsum_sc[...] + jnp.sum(jnp.where(row_valid, mm_h, 0.0),
                                          axis=0, keepdims=True)

    # ---- emit this core's partial online-softmax / pool state on its last tile ----
    @pl.when(j == ntpc - 1)
    def _emit():
        m_part_ref[...] = m_sc[...]
        l_part_ref[...] = l_sc[...]
        accp_part_ref[...] = accp_sc[...]
        hsum_part_ref[...] = jnp.broadcast_to(hsum_sc[...], hsum_part_ref.shape)


# ------------------------------- wrapper ----------------------------------

def survpath_forward(params, wsi, x_omic, *, tile_n=2048, attn_dtype=jnp.bfloat16):
    """Mirrors SurvPath.forward(h) with h = (wsi, x_omic), eval mode."""
    num_pathways = len(x_omic)

    # glue: per-pathway SNN nets (Linear + ELU + AlphaDropout(eval)=identity) x2
    h_omic = []
    for idx, sig_feat in enumerate(x_omic):
        h = sig_feat
        for (w, b) in params["sig_networks"][idx]:
            h = jax.nn.elu(h @ w + b)
        h_omic.append(h)
    h_omic_bag = jnp.stack(h_omic, axis=0).astype(jnp.float32)           # [P, 256]

    p_pad = max(16, _round_up(num_pathways, 16))                          # bf16 sublane packing
    homic_pad = jnp.zeros((p_pad, WSI_PROJ_DIM), jnp.float32).at[:num_pathways].set(h_omic_bag)

    n = wsi.shape[0]
    tile = _round_up(min(int(tile_n), _round_up(n, 128)), 128)
    n_pad = _round_up(n, NUM_CORES * tile)
    ntpc = n_pad // (NUM_CORES * tile)                                    # tiles per core

    wsi_pad = jnp.zeros((n_pad, EMBED_DIM), jnp.bfloat16).at[:n].set(wsi.astype(jnp.bfloat16))
    n_valid = jnp.asarray([n], jnp.int32)

    # ---- fold affine constants into the matmul weights (host-side, exact) ----
    scale = DIM_HEAD ** -0.5
    g1 = params["ln1_g"].reshape(-1)
    b1 = params["ln1_b"].reshape(-1)
    wqkv_eff = params["wqkv"] * g1[:, None]
    bqkv_eff = b1[None, :] @ params["wqkv"]
    qscale = jnp.concatenate([jnp.full((DIM_HEAD,), scale, jnp.float32),
                              jnp.ones((2 * DIM_HEAD,), jnp.float32)])
    wqkv_eff = wqkv_eff * qscale[None, :]
    bqkv_eff = bqkv_eff * qscale[None, :]

    gf = params["ffln_g"].reshape(-1)
    bff = params["ffln_b"].reshape(-1)
    ffw1_eff = params["ffw1"] * gf[:, None]
    ffb1_eff = bff[None, :] @ params["ffw1"] + params["ffb1"]

    bf = lambda a: a.astype(jnp.bfloat16)
    f32 = lambda a: a.astype(jnp.float32)

    inputs = (
        wsi_pad, homic_pad,
        bf(params["wproj"]), f32(params["bproj"]),
        bf(wqkv_eff), f32(bqkv_eff),
        bf(ffw1_eff), f32(ffb1_eff),
        bf(params["ffw2"]), f32(params["ffb2"]),
    )

    const_cj = lambda c, j, nv: (0, 0)
    # TODO(synk): the constant weight inputs could use pipeline_mode=pl.Buffered(1) to trim
    # double-buffer VMEM; left at default for compatibility.
    in_specs = [
        pl.BlockSpec((tile, EMBED_DIM), lambda c, j, nv: (c * ntpc + j, 0)),   # wsi tile
        pl.BlockSpec((p_pad, WSI_PROJ_DIM), const_cj),                         # h_omic (padded)
        pl.BlockSpec((EMBED_DIM, WSI_PROJ_DIM), const_cj),                     # wproj
        pl.BlockSpec((1, WSI_PROJ_DIM), const_cj),                             # bproj
        pl.BlockSpec((WSI_PROJ_DIM, 3 * DIM_HEAD), const_cj),                  # wqkv (folded)
        pl.BlockSpec((1, 3 * DIM_HEAD), const_cj),                             # bqkv (folded)
        pl.BlockSpec((DIM_HEAD, FF_HIDDEN), const_cj),                         # ffw1 (folded)
        pl.BlockSpec((1, FF_HIDDEN), const_cj),                                # ffb1 (folded)
        pl.BlockSpec((FF_HIDDEN, DIM_HEAD), const_cj),                         # ffw2
        pl.BlockSpec((1, DIM_HEAD), const_cj),                                 # ffb2
    ]
    out_specs = (
        pl.BlockSpec((p_pad, p_pad), lambda c, j, nv: (c, 0)),                 # raw s_pp (core-0 slot)
        pl.BlockSpec((p_pad, tile), lambda c, j, nv: (0, c * ntpc + j)),       # raw pathway->hist scores
        pl.BlockSpec((p_pad, tile), lambda c, j, nv: (0, c * ntpc + j)),       # hist->pathway attn (T)
        pl.BlockSpec((p_pad, 1), lambda c, j, nv: (c, 0)),                     # per-core m
        pl.BlockSpec((p_pad, 1), lambda c, j, nv: (c, 0)),                     # per-core l
        pl.BlockSpec((p_pad, DIM_HEAD), lambda c, j, nv: (c, 0)),              # per-core acc numerator
        pl.BlockSpec((HSUM_ROWS, DIM_HEAD), lambda c, j, nv: (c, 0)),          # per-core hist pool sum
    )
    out_shape = (
        jax.ShapeDtypeStruct((NUM_CORES * p_pad, p_pad), jnp.float32),
        jax.ShapeDtypeStruct((p_pad, n_pad), attn_dtype),
        jax.ShapeDtypeStruct((p_pad, n_pad), attn_dtype),
        jax.ShapeDtypeStruct((NUM_CORES * p_pad, 1), jnp.float32),
        jax.ShapeDtypeStruct((NUM_CORES * p_pad, 1), jnp.float32),
        jax.ShapeDtypeStruct((NUM_CORES * p_pad, DIM_HEAD), jnp.float32),
        jax.ShapeDtypeStruct((NUM_CORES * HSUM_ROWS, DIM_HEAD), jnp.float32),
    )
    scratch_shapes = [
        pltpu.VMEM((p_pad, 1), jnp.float32),              # running max
        pltpu.VMEM((p_pad, 1), jnp.float32),              # running denom
        pltpu.VMEM((p_pad, DIM_HEAD), jnp.float32),       # out_p numerator
        pltpu.VMEM((1, DIM_HEAD), jnp.float32),           # sum of mm_h rows (mean pool)
        pltpu.VMEM((p_pad, 3 * DIM_HEAD), jnp.float32),   # cached pathway-token QKV
    ]

    grid_spec = pltpu.PrefetchScalarGridSpec(
        num_scalar_prefetch=1,
        grid=(NUM_CORES, ntpc),
        in_specs=in_specs,
        out_specs=out_specs,
        scratch_shapes=scratch_shapes,
    )

    # advisory cost estimate for the XLA scheduler
    param_bytes = sum(int(a.size) * a.dtype.itemsize for a in inputs[2:])
    flops = 2 * n_pad * (EMBED_DIM * WSI_PROJ_DIM + WSI_PROJ_DIM * 3 * DIM_HEAD
                         + 4 * p_pad * DIM_HEAD + 2 * FF_HIDDEN * DIM_HEAD)
    transc = n_pad * (FF_HIDDEN + 3 * p_pad + 16)
    bytes_accessed = (int(wsi_pad.size) * 2 + int(homic_pad.size) * 4 + param_bytes
                      + 2 * p_pad * n_pad * jnp.dtype(attn_dtype).itemsize)

    compiler_params = pltpu.CompilerParams(
        dimension_semantics=("parallel", "arbitrary"),
        vmem_limit_bytes=_pick_vmem_limit(),
    )

    (spp_all, attn_phs, attn_hpt,
     m_part, l_part, accp_part, hsum_part) = pl.pallas_call(
        functools.partial(_survpath_kernel, num_pathways),
        grid_spec=grid_spec,
        out_shape=out_shape,
        compiler_params=compiler_params,
        cost_estimate=pl.CostEstimate(flops=int(flops), transcendentals=int(transc),
                                      bytes_accessed=int(bytes_accessed)),
    )(n_valid, *inputs)

    # ---- merge the two per-core online-softmax states / pool sums (tiny, plain JAX) ----
    m0, m1 = m_part[:p_pad], m_part[p_pad:]
    l0, l1 = l_part[:p_pad], l_part[p_pad:]
    a0, a1 = accp_part[:p_pad], accp_part[p_pad:]
    m_fin = jnp.maximum(m0, m1)
    w0 = jnp.exp(m0 - m_fin)
    w1 = jnp.exp(m1 - m_fin)
    l_fin = l0 * w0 + l1 * w1
    accp = a0 * w0 + a1 * w1
    out_p = accp / l_fin                                                   # [P_pad, 128]
    hsum = hsum_part[0:1] + hsum_part[HSUM_ROWS:HSUM_ROWS + 1]             # [1, 128]

    # ---- finalize: pathway-token FF + LN (tiny, exact f32), pools, classification head ----
    def _ln(x, g, b):
        mu = x.mean(-1, keepdims=True)
        var = ((x - mu) ** 2).mean(-1, keepdims=True)
        return (x - mu) / jnp.sqrt(var + LN_EPS) * g + b

    yp = _ln(out_p, params["ffln_g"], params["ffln_b"])
    yp = jax.nn.gelu(yp @ params["ffw1"] + params["ffb1"], approximate=False)
    yp = yp @ params["ffw2"] + params["ffb2"]
    mm_p = _ln(yp, params["ln2_g"], params["ln2_b"])
    paths_embed = jnp.mean(mm_p[:num_pathways], axis=0, keepdims=True)      # [1, 128]
    # kernel accumulated the PRE-affine LN2 output; apply gamma/beta to the pooled vector (exact)
    wsi_post = (hsum / float(n)) * params["ln2_g"] + params["ln2_b"]         # [1, 128]

    embedding = jnp.concatenate([paths_embed, wsi_post], axis=1)             # [1, 256]
    h1 = jax.nn.relu(embedding @ params["lw1"] + params["lb1"])
    logits = h1 @ params["lw2"] + params["lb2"]

    # ---- attention maps (exact reconstruction from raw scores + merged (m, l)) ----
    spp = spp_all[:num_pathways, :num_pathways]
    attn_pp = jnp.exp(spp - m_fin[:num_pathways]) / l_fin[:num_pathways]
    scores = attn_phs[:num_pathways, :n].astype(jnp.float32)
    attn_ph = jnp.exp(scores - m_fin[:num_pathways]) / l_fin[:num_pathways]
    attn_hp = attn_hpt[:num_pathways, :n].astype(jnp.float32).T              # [N, P]

    y_prob = jax.nn.softmax(logits, axis=1)
    y_hat = jnp.argmax(logits, axis=1, keepdims=True)                        # torch.topk(logits, 1)[1]
    results_dict = [attn_pp, attn_ph, attn_hp]
    return logits, y_prob, y_hat, None, results_dict


# --------------------------- plain-JAX reference ---------------------------

def _survpath_reference(params, wsi, x_omic):
    num_pathways = len(x_omic)
    h_omic = []
    for idx, sig_feat in enumerate(x_omic):
        h = sig_feat
        for (w, b) in params["sig_networks"][idx]:
            h = jax.nn.elu(h @ w + b)
        h_omic.append(h)
    hp = jnp.stack(h_omic, axis=0)
    wsi_embed = wsi @ params["wproj"] + params["bproj"]

    def ln(x, g, b):
        mu = x.mean(-1, keepdims=True)
        var = ((x - mu) ** 2).mean(-1, keepdims=True)
        return (x - mu) / jnp.sqrt(var + LN_EPS) * g + b

    xp = ln(hp, params["ln1_g"], params["ln1_b"])
    xh = ln(wsi_embed, params["ln1_g"], params["ln1_b"])
    qkv_p = xp @ params["wqkv"]
    qkv_h = xh @ params["wqkv"]
    scale = DIM_HEAD ** -0.5
    q_p, k_p, v_p = qkv_p[:, :DIM_HEAD] * scale, qkv_p[:, DIM_HEAD:2 * DIM_HEAD], qkv_p[:, 2 * DIM_HEAD:]
    q_h, k_h, v_h = qkv_h[:, :DIM_HEAD] * scale, qkv_h[:, DIM_HEAD:2 * DIM_HEAD], qkv_h[:, 2 * DIM_HEAD:]

    s_cat = jnp.concatenate([q_p @ k_p.T, q_p @ k_h.T], axis=1)
    a_cat = jax.nn.softmax(s_cat, axis=-1)
    a_pp, a_ph = a_cat[:, :num_pathways], a_cat[:, num_pathways:]
    out_p = a_pp @ v_p + a_ph @ v_h
    a_hp = jax.nn.softmax(q_h @ k_p.T, axis=-1)
    out_h = a_hp @ v_p

    def ff(z):
        y = ln(z, params["ffln_g"], params["ffln_b"])
        y = jax.nn.gelu(y @ params["ffw1"] + params["ffb1"], approximate=False)
        y = y @ params["ffw2"] + params["ffb2"]
        return ln(y, params["ln2_g"], params["ln2_b"])

    mm_p, mm_h = ff(out_p), ff(out_h)
    emb = jnp.concatenate([mm_p.mean(0, keepdims=True), mm_h.mean(0, keepdims=True)], axis=1)
    h1 = jax.nn.relu(emb @ params["lw1"] + params["lb1"])
    logits = h1 @ params["lw2"] + params["lb2"]
    return logits, a_pp, a_ph, a_hp


# --------------------------- deterministic init ---------------------------

def init_params(key, omic_sizes):
    keys = iter(jax.random.split(key, 64))

    def lin(din, dout, scale=0.05):
        return scale * jax.random.normal(next(keys), (din, dout), jnp.float32)

    params = {}
    sig = []
    for d in omic_sizes:
        dims = [d] + SNN_HIDDEN
        layers = []
        for a, b in zip(dims[:-1], dims[1:]):
            layers.append((lin(a, b), 0.01 * jax.random.normal(next(keys), (b,), jnp.float32)))
        sig.append(layers)
    params["sig_networks"] = sig

    params["wproj"] = lin(EMBED_DIM, WSI_PROJ_DIM)
    params["bproj"] = jnp.zeros((1, WSI_PROJ_DIM), jnp.float32)
    params["ln1_g"] = jnp.ones((1, WSI_PROJ_DIM), jnp.float32)
    params["ln1_b"] = jnp.zeros((1, WSI_PROJ_DIM), jnp.float32)
    params["wqkv"] = lin(WSI_PROJ_DIM, 3 * DIM_HEAD)
    params["ffln_g"] = jnp.ones((1, DIM_HEAD), jnp.float32)
    params["ffln_b"] = jnp.zeros((1, DIM_HEAD), jnp.float32)
    params["ffw1"] = lin(DIM_HEAD, FF_HIDDEN)
    params["ffb1"] = jnp.zeros((1, FF_HIDDEN), jnp.float32)
    params["ffw2"] = lin(FF_HIDDEN, DIM_HEAD)
    params["ffb2"] = jnp.zeros((1, DIM_HEAD), jnp.float32)
    params["ln2_g"] = jnp.ones((1, DIM_HEAD), jnp.float32)
    params["ln2_b"] = jnp.zeros((1, DIM_HEAD), jnp.float32)
    params["lw1"] = lin(WSI_PROJ_DIM, WSI_PROJ_DIM // 4)
    params["lb1"] = jnp.zeros((1, WSI_PROJ_DIM // 4), jnp.float32)
    params["lw2"] = lin(WSI_PROJ_DIM // 4, N_CLASSES)
    params["lb2"] = jnp.zeros((1, N_CLASSES), jnp.float32)
    return params


if __name__ == "__main__":
    omic_sizes = [1, 2, 3, 4]
    params = init_params(jax.random.PRNGKey(0), omic_sizes)

    # (n_patches, tile_n):
    #  - (16, 1024): one tile per core, core 1 is all padding (exercises the degenerate merge)
    #  - (300, 128): multiple tiles per core, both cores hold valid data
    for n_patches, tile in ((16, 1024), (300, 128)):
        k_wsi, *k_omics = jax.random.split(jax.random.PRNGKey(n_patches), 1 + len(omic_sizes))
        wsi = jax.random.normal(k_wsi, (n_patches, EMBED_DIM), jnp.float32)
        x_omic = [jax.random.normal(k, (d,), jnp.float32)
                  for k, d in zip(k_omics, omic_sizes)]

        logits, y_prob, y_hat, _, attns = survpath_forward(params, wsi, x_omic, tile_n=tile)
        jax.block_until_ready((logits, y_prob, y_hat, attns))

        assert logits.shape == (1, N_CLASSES)
        assert attns[0].shape == (len(omic_sizes), len(omic_sizes))
        assert attns[1].shape == (len(omic_sizes), n_patches)
        assert attns[2].shape == (n_patches, len(omic_sizes))

        ref_logits, ref_pp, ref_ph, ref_hp = _survpath_reference(params, wsi, x_omic)
        assert jnp.allclose(logits, ref_logits, atol=1e-1, rtol=1e-1)
        assert float(jnp.max(jnp.abs(attns[0] - ref_pp))) < 2e-2
        assert float(jnp.max(jnp.abs(attns[1] - ref_ph))) < 2e-2
        assert float(jnp.max(jnp.abs(attns[2] - ref_hp))) < 2e-2

    print("KERNEL_OK")
</pallas_src>

<mosaic_0001>
module attributes {stable_mosaic.version = 11 : i64} {
  func.func @_survpath_kernel(%arg0: i32, %arg1: i32, %arg2: memref<1xi32, #tpu.memory_space<smem>>, %arg3: memref<128x384xbf16, #tpu.memory_space<vmem>>, %arg4: memref<16x256xf32, #tpu.memory_space<vmem>>, %arg5: memref<384x256xbf16, #tpu.memory_space<vmem>>, %arg6: memref<1x256xf32, #tpu.memory_space<vmem>>, %arg7: memref<256x384xbf16, #tpu.memory_space<vmem>>, %arg8: memref<1x384xf32, #tpu.memory_space<vmem>>, %arg9: memref<128x128xbf16, #tpu.memory_space<vmem>>, %arg10: memref<1x128xf32, #tpu.memory_space<vmem>>, %arg11: memref<128x128xbf16, #tpu.memory_space<vmem>>, %arg12: memref<1x128xf32, #tpu.memory_space<vmem>>, %arg13: memref<16x16xf32, #tpu.memory_space<vmem>>, %arg14: memref<16x128xbf16, #tpu.memory_space<vmem>>, %arg15: memref<16x128xbf16, #tpu.memory_space<vmem>>, %arg16: memref<16x1xf32, #tpu.memory_space<vmem>>, %arg17: memref<16x1xf32, #tpu.memory_space<vmem>>, %arg18: memref<16x128xf32, #tpu.memory_space<vmem>>, %arg19: memref<8x128xf32, #tpu.memory_space<vmem>>, %arg20: memref<16x1xf32, #tpu.memory_space<vmem>>, %arg21: memref<16x1xf32, #tpu.memory_space<vmem>>, %arg22: memref<16x128xf32, #tpu.memory_space<vmem>>, %arg23: memref<1x128xf32, #tpu.memory_space<vmem>>, %arg24: memref<16x384xf32, #tpu.memory_space<vmem>>) attributes {dimension_semantics = [#tpu.dimension_semantics<parallel>, #tpu.dimension_semantics<arbitrary>], iteration_bounds = array<i64: 2, 1>, scalar_prefetch = 1 : i64, scratch_operands = 5 : i64, tpu.core_type = #tpu.core_type<tc>, window_params = [{transform_indices = @transform_0, window_bounds = array<i64: 128, 384>}, {pipeline_mode = #tpu.pipeline_mode<synchronous>, transform_indices = @transform_1, window_bounds = array<i64: 16, 256>}, {pipeline_mode = #tpu.pipeline_mode<synchronous>, transform_indices = @transform_2, window_bounds = array<i64: 384, 256>}, {pipeline_mode = #tpu.pipeline_mode<synchronous>, transform_indices = @transform_3, window_bounds = array<i64: 1, 256>}, {pipeline_mode = #tpu.pipeline_mode<synchronous>, transform_indices = @transform_4, window_bounds = array<i64: 256, 384>}, {pipeline_mode = #tpu.pipeline_mode<synchronous>, transform_indices = @transform_5, window_bounds = array<i64: 1, 384>}, {pipeline_mode = #tpu.pipeline_mode<synchronous>, transform_indices = @transform_6, window_bounds = array<i64: 128, 128>}, {pipeline_mode = #tpu.pipeline_mode<synchronous>, transform_indices = @transform_7, window_bounds = array<i64: 1, 128>}, {pipeline_mode = #tpu.pipeline_mode<synchronous>, transform_indices = @transform_8, window_bounds = array<i64: 128, 128>}, {pipeline_mode = #tpu.pipeline_mode<synchronous>, transform_indices = @transform_9, window_bounds = array<i64: 1, 128>}, {transform_indices = @transform_10, window_bounds = array<i64: 16, 16>}, {transform_indices = @transform_11, window_bounds = array<i64: 16, 128>}, {transform_indices = @transform_12, window_bounds = array<i64: 16, 128>}, {transform_indices = @transform_13, window_bounds = array<i64: 16, 1>}, {transform_indices = @transform_14, window_bounds = array<i64: 16, 1>}, {transform_indices = @transform_15, window_bounds = array<i64: 16, 128>}, {transform_indices = @transform_16, window_bounds = array<i64: 8, 128>}]} {
    %c0 = arith.constant 0 : index
    %0 = memref.load %arg2[%c0] : memref<1xi32, #tpu.memory_space<smem>>
    %c1_i32 = arith.constant 1 : i32
    %1 = arith.muli %arg0, %c1_i32 : i32
    %2 = arith.addi %1, %arg1 : i32
    %c0_i32 = arith.constant 0 : i32
    %3 = arith.cmpi eq, %arg1, %c0_i32 : i32
    %4 = arith.extui %3 : i1 to i32
    %c0_i32_0 = arith.constant 0 : i32
    %5 = arith.cmpi ne, %4, %c0_i32_0 : i32
    scf.if %5 {
      %c0_78 = arith.constant 0 : index
      %c0_79 = arith.constant 0 : index
      %186 = vector.load %arg4[%c0_78, %c0_79] : memref<16x256xf32, #tpu.memory_space<vmem>>, vector<16x256xf32>
      %cst_80 = arith.constant dense<0.000000e+00> : vector<16xf32>
      %187 = vector.multi_reduction <add>, %186, %cst_80 [1] : vector<16x256xf32> to vector<16xf32>
      %188 = vector.shape_cast %187 : vector<16xf32> to vector<16x1xf32>
      %cst_81 = arith.constant 2.560000e+02 : f32
      %189 = vector.broadcast %cst_81 : f32 to vector<16x1xf32>
      %190 = arith.divf %188, %189 : vector<16x1xf32>
      %191 = vector.broadcast %190 : vector<16x1xf32> to vector<16x256xf32>
      %192 = arith.subf %186, %191 : vector<16x256xf32>
      %193 = arith.mulf %192, %192 : vector<16x256xf32>
      %cst_82 = arith.constant dense<0.000000e+00> : vector<16xf32>
      %194 = vector.multi_reduction <add>, %193, %cst_82 [1] : vector<16x256xf32> to vector<16xf32>
      %195 = vector.shape_cast %194 : vector<16xf32> to vector<16x1xf32>
      %cst_83 = arith.constant 2.560000e+02 : f32
      %196 = vector.broadcast %cst_83 : f32 to vector<16x1xf32>
      %197 = arith.divf %195, %196 : vector<16x1xf32>
      %198 = vector.broadcast %190 : vector<16x1xf32> to vector<16x256xf32>
      %199 = arith.subf %186, %198 : vector<16x256xf32>
      %cst_84 = arith.constant 9.99999974E-6 : f32
      %200 = vector.broadcast %cst_84 : f32 to vector<16x1xf32>
      %201 = arith.addf %197, %200 : vector<16x1xf32>
      %202 = math.rsqrt %201 : vector<16x1xf32>
      %203 = vector.broadcast %202 : vector<16x1xf32> to vector<16x256xf32>
      %204 = arith.mulf %199, %203 : vector<16x256xf32>
      %205 = arith.truncf %204 : vector<16x256xf32> to vector<16x256xbf16>
      %c0_85 = arith.constant 0 : index
      %c0_86 = arith.constant 0 : index
      %206 = vector.load %arg7[%c0_85, %c0_86] : memref<256x384xbf16, #tpu.memory_space<vmem>>, vector<256x384xbf16>
      %cst_87 = arith.constant dense<0.000000e+00> : vector<16x384xf32>
      %207 = tpu.matmul %205, %206, %cst_87 {dimension_numbers = #tpu.dot_dimension_numbers<[1], [0], [0], [1], [0, 0, 1, 1], [], []>} : vector<16x256xbf16>, vector<256x384xbf16>, vector<16x384xf32> -> vector<16x384xf32>
      %c0_88 = arith.constant 0 : index
      %c0_89 = arith.constant 0 : index
      %208 = vector.load %arg8[%c0_88, %c0_89] : memref<1x384xf32, #tpu.memory_space<vmem>>, vector<1x384xf32>
      %209 = vector.broadcast %208 : vector<1x384xf32> to vector<16x384xf32>
      %210 = arith.addf %207, %209 : vector<16x384xf32>
      %c0_90 = arith.constant 0 : index
      %c0_91 = arith.constant 0 : index
      %211 = vector.load %arg24[%c0_90, %c0_91] : memref<16x384xf32, #tpu.memory_space<vmem>>, vector<16x384xf32>
      tpu.vector_store %arg24[%c0_90, %c0_91], %210 {strides = array<i32>} : memref<16x384xf32, #tpu.memory_space<vmem>>, vector<16x384xf32>,
      %cst_92 = arith.constant 0.000000e+00 : f32
      %212 = vector.broadcast %cst_92 : f32 to vector<1x128xf32>
      %c0_93 = arith.constant 0 : index
      %c0_94 = arith.constant 0 : index
      %213 = vector.load %arg23[%c0_93, %c0_94] : memref<1x128xf32, #tpu.memory_space<vmem>>, vector<1x128xf32>
      tpu.vector_store %arg23[%c0_93, %c0_94], %212 {strides = array<i32>} : memref<1x128xf32, #tpu.memory_space<vmem>>, vector<1x128xf32>,
      %c0_i32_95 = arith.constant 0 : i32
      %214 = arith.cmpi eq, %arg0, %c0_i32_95 : i32
      %215 = arith.extui %214 : i1 to i32
      %c0_i32_96 = arith.constant 0 : i32
      %216 = arith.cmpi ne, %215, %c0_i32_96 : i32
      scf.if %216 {
        %220 = vector.extract_strided_slice %210 {offsets = [0, 0], sizes = [16, 128], strides = [1, 1]} : vector<16x384xf32> to vector<16x128xf32>
        %221 = arith.truncf %220 : vector<16x128xf32> to vector<16x128xbf16>
        %222 = vector.extract_strided_slice %210 {offsets = [0, 128], sizes = [16, 128], strides = [1, 1]} : vector<16x384xf32> to vector<16x128xf32>
        %223 = arith.truncf %222 : vector<16x128xf32> to vector<16x128xbf16>
        %224 = vector.extract_strided_slice %210 {offsets = [0, 256], sizes = [16, 128], strides = [1, 1]} : vector<16x384xf32> to vector<16x128xf32>
        %225 = tpu.iota {dimensions = array<i32: 1>} : vector<1x16xi32>
        %c4_i32_99 = arith.constant 4 : i32
        %226 = vector.broadcast %c4_i32_99 : i32 to vector<1x16xi32>
        %227 = arith.cmpi slt, %225, %226 : vector<1x16xi32>
        %cst_100 = arith.constant dense<0.000000e+00> : vector<16x16xf32>
        %228 = tpu.matmul %221, %223, %cst_100 {dimension_numbers = #tpu.dot_dimension_numbers<[1], [1], [0], [0], [0, 0, 1, 0], [], []>} : vector<16x128xbf16>, vector<16x128xbf16>, vector<16x16xf32> -> vector<16x16xf32>
        %cst_101 = arith.constant -1.000000e+30 : f32
        %229 = vector.shape_cast %227 : vector<1x16xi1> to vector<1x16xi1>
        %230 = vector.broadcast %229 : vector<1x16xi1> to vector<16x16xi1>
        %231 = vector.broadcast %cst_101 : f32 to vector<16x16xf32>
        %232 = arith.select %230, %228, %231 : vector<16x16xi1>, vector<16x16xf32>
        %c0_102 = arith.constant 0 : index
        %c0_103 = arith.constant 0 : index
        %233 = vector.load %arg13[%c0_102, %c0_103] : memref<16x16xf32, #tpu.memory_space<vmem>>, vector<16x16xf32>
        tpu.vector_store %arg13[%c0_102, %c0_103], %232 {strides = array<i32>} : memref<16x16xf32, #tpu.memory_space<vmem>>, vector<16x16xf32>,
        %cst_104 = arith.constant dense<0xFF800000> : vector<16xf32>
        %234 = vector.multi_reduction <maximumf>, %232, %cst_104 [1] : vector<16x16xf32> to vector<16xf32>
        %235 = vector.shape_cast %234 : vector<16xf32> to vector<16x1xf32>
        %236 = vector.broadcast %235 : vector<16x1xf32> to vector<16x16xf32>
        %237 = arith.subf %232, %236 : vector<16x16xf32>
        %238 = math.exp %237 : vector<16x16xf32>
        %c0_105 = arith.constant 0 : index
        %c0_106 = arith.constant 0 : index
        %239 = vector.load %arg20[%c0_105, %c0_106] : memref<16x1xf32, #tpu.memory_space<vmem>>, vector<16x1xf32>
        tpu.vector_store %arg20[%c0_105, %c0_106], %235 {strides = array<i32>} : memref<16x1xf32, #tpu.memory_space<vmem>>, vector<16x1xf32>,
        %cst_107 = arith.constant dense<0.000000e+00> : vector<16xf32>
        %240 = vector.multi_reduction <add>, %238, %cst_107 [1] : vector<16x16xf32> to vector<16xf32>
        %241 = vector.shape_cast %240 : vector<16xf32> to vector<16x1xf32>
        %c0_108 = arith.constant 0 : index
        %c0_109 = arith.constant 0 : index
        %242 = vector.load %arg21[%c0_108, %c0_109] : memref<16x1xf32, #tpu.memory_space<vmem>>, vector<16x1xf32>
        tpu.vector_store %arg21[%c0_108, %c0_109], %241 {strides = array<i32>} : memref<16x1xf32, #tpu.memory_space<vmem>>, vector<16x1xf32>,
        %cst_110 = arith.constant dense<0.000000e+00> : vector<16x128xf32>
        %243 = tpu.matmul %238, %224, %cst_110 {dimension_numbers = #tpu.dot_dimension_numbers<[1], [0], [0], [1], [0, 0, 1, 1], [], []>} : vector<16x16xf32>, vector<16x128xf32>, vector<16x128xf32> -> vector<16x128xf32>
        %c0_111 = arith.constant 0 : index
        %c0_112 = arith.constant 0 : index
        %244 = vector.load %arg22[%c0_111, %c0_112] : memref<16x128xf32, #tpu.memory_space<vmem>>, vector<16x128xf32>
        tpu.vector_store %arg22[%c0_111, %c0_112], %243 {strides = array<i32>} : memref<16x128xf32, #tpu.memory_space<vmem>>, vector<16x128xf32>,
      } else {
      }
      %c0_i32_97 = arith.constant 0 : i32
      %217 = arith.cmpi ne, %arg0, %c0_i32_97 : i32
      %218 = arith.extui %217 : i1 to i32
      %c0_i32_98 = arith.constant 0 : i32
      %219 = arith.cmpi ne, %218, %c0_i32_98 : i32
      scf.if %219 {
        %cst_99 = arith.constant -1.000000e+30 : f32
        %220 = vector.broadcast %cst_99 : f32 to vector<16x1xf32>
        %c0_100 = arith.constant 0 : index
        %c0_101 = arith.constant 0 : index
        %221 = vector.load %arg20[%c0_100, %c0_101] : memref<16x1xf32, #tpu.memory_space<vmem>>, vector<16x1xf32>
        tpu.vector_store %arg20[%c0_100, %c0_101], %220 {strides = array<i32>} : memref<16x1xf32, #tpu.memory_space<vmem>>, vector<16x1xf32>,
        %cst_102 = arith.constant 0.000000e+00 : f32
        %222 = vector.broadcast %cst_102 : f32 to vector<16x1xf32>
        %c0_103 = arith.constant 0 : index
        %c0_104 = arith.constant 0 : index
        %223 = vector.load %arg21[%c0_103, %c0_104] : memref<16x1xf32, #tpu.memory_space<vmem>>, vector<16x1xf32>
        tpu.vector_store %arg21[%c0_103, %c0_104], %222 {strides = array<i32>} : memref<16x1xf32, #tpu.memory_space<vmem>>, vector<16x1xf32>,
        %cst_105 = arith.constant 0.000000e+00 : f32
        %224 = vector.broadcast %cst_105 : f32 to vector<16x128xf32>
        %c0_106 = arith.constant 0 : index
        %c0_107 = arith.constant 0 : index
        %225 = vector.load %arg22[%c0_106, %c0_107] : memref<16x128xf32, #tpu.memory_space<vmem>>, vector<16x128xf32>
        tpu.vector_store %arg22[%c0_106, %c0_107], %224 {strides = array<i32>} : memref<16x128xf32, #tpu.memory_space<vmem>>, vector<16x128xf32>,
      } else {
      }
    } else {
    }
    %c0_1 = arith.constant 0 : index
    %c0_2 = arith.constant 0 : index
    %6 = vector.load %arg24[%c0_1, %c0_2] : memref<16x384xf32, #tpu.memory_space<vmem>>, vector<16x384xf32>
    %7 = vector.extract_strided_slice %6 {offsets = [0, 0], sizes = [16, 128], strides = [1, 1]} : vector<16x384xf32> to vector<16x128xf32>
    %8 = arith.truncf %7 : vector<16x128xf32> to vector<16x128xbf16>
    %9 = vector.extract_strided_slice %6 {offsets = [0, 128], sizes = [16, 128], strides = [1, 1]} : vector<16x384xf32> to vector<16x128xf32>
    %10 = arith.truncf %9 : vector<16x128xf32> to vector<16x128xbf16>
    %11 = vector.extract_strided_slice %6 {offsets = [0, 256], sizes = [16, 128], strides = [1, 1]} : vector<16x384xf32> to vector<16x128xf32>
    %12 = arith.truncf %11 : vector<16x128xf32> to vector<16x128xbf16>
    %c0_3 = arith.constant 0 : index
    %c0_4 = arith.constant 0 : index
    %13 = vector.load %arg3[%c0_3, %c0_4] : memref<128x384xbf16, #tpu.memory_space<vmem>>, vector<128x384xbf16>
    %c0_5 = arith.constant 0 : index
    %c0_6 = arith.constant 0 : index
    %14 = vector.load %arg5[%c0_5, %c0_6] : memref<384x256xbf16, #tpu.memory_space<vmem>>, vector<384x256xbf16>
    %cst = arith.constant dense<0.000000e+00> : vector<128x256xf32>
    %15 = tpu.matmul %13, %14, %cst {dimension_numbers = #tpu.dot_dimension_numbers<[1], [0], [0], [1], [0, 0, 1, 1], [], []>} : vector<128x384xbf16>, vector<384x256xbf16>, vector<128x256xf32> -> vector<128x256xf32>
    %c0_7 = arith.constant 0 : index
    %c0_8 = arith.constant 0 : index
    %16 = vector.load %arg6[%c0_7, %c0_8] : memref<1x256xf32, #tpu.memory_space<vmem>>, vector<1x256xf32>
    %17 = vector.broadcast %16 : vector<1x256xf32> to vector<128x256xf32>
    %18 = arith.addf %15, %17 : vector<128x256xf32>
    %cst_9 = arith.constant dense<0.000000e+00> : vector<128xf32>
    %19 = vector.multi_reduction <add>, %18, %cst_9 [1] : vector<128x256xf32> to vector<128xf32>
    %20 = vector.shape_cast %19 : vector<128xf32> to vector<128x1xf32>
    %cst_10 = arith.constant 2.560000e+02 : f32
    %21 = vector.broadcast %cst_10 : f32 to vector<128x1xf32>
    %22 = arith.divf %20, %21 : vector<128x1xf32>
    %23 = vector.broadcast %22 : vector<128x1xf32> to vector<128x256xf32>
    %24 = arith.subf %18, %23 : vector<128x256xf32>
    %25 = arith.mulf %24, %24 : vector<128x256xf32>
    %cst_11 = arith.constant dense<0.000000e+00> : vector<128xf32>
    %26 = vector.multi_reduction <add>, %25, %cst_11 [1] : vector<128x256xf32> to vector<128xf32>
    %27 = vector.shape_cast %26 : vector<128xf32> to vector<128x1xf32>
    %cst_12 = arith.constant 2.560000e+02 : f32
    %28 = vector.broadcast %cst_12 : f32 to vector<128x1xf32>
    %29 = arith.divf %27, %28 : vector<128x1xf32>
    %30 = vector.broadcast %22 : vector<128x1xf32> to vector<128x256xf32>
    %31 = arith.subf %18, %30 : vector<128x256xf32>
    %cst_13 = arith.constant 9.99999974E-6 : f32
    %32 = vector.broadcast %cst_13 : f32 to vector<128x1xf32>
    %33 = arith.addf %29, %32 : vector<128x1xf32>
    %34 = math.rsqrt %33 : vector<128x1xf32>
    %35 = vector.broadcast %34 : vector<128x1xf32> to vector<128x256xf32>
    %36 = arith.mulf %31, %35 : vector<128x256xf32>
    %37 = arith.truncf %36 : vector<128x256xf32> to vector<128x256xbf16>
    %c0_14 = arith.constant 0 : index
    %c0_15 = arith.constant 0 : index
    %38 = vector.load %arg7[%c0_14, %c0_15] : memref<256x384xbf16, #tpu.memory_space<vmem>>, vector<256x384xbf16>
    %cst_16 = arith.constant dense<0.000000e+00> : vector<128x384xf32>
    %39 = tpu.matmul %37, %38, %cst_16 {dimension_numbers = #tpu.dot_dimension_numbers<[1], [0], [0], [1], [0, 0, 1, 1], [], []>} : vector<128x256xbf16>, vector<256x384xbf16>, vector<128x384xf32> -> vector<128x384xf32>
    %c0_17 = arith.constant 0 : index
    %c0_18 = arith.constant 0 : index
    %40 = vector.load %arg8[%c0_17, %c0_18] : memref<1x384xf32, #tpu.memory_space<vmem>>, vector<1x384xf32>
    %41 = vector.broadcast %40 : vector<1x384xf32> to vector<128x384xf32>
    %42 = arith.addf %39, %41 : vector<128x384xf32>
    %43 = vector.extract_strided_slice %42 {offsets = [0, 0], sizes = [128, 128], strides = [1, 1]} : vector<128x384xf32> to vector<128x128xf32>
    %44 = arith.truncf %43 : vector<128x128xf32> to vector<128x128xbf16>
    %45 = vector.extract_strided_slice %42 {offsets = [0, 128], sizes = [128, 128], strides = [1, 1]} : vector<128x384xf32> to vector<128x128xf32>
    %46 = arith.truncf %45 : vector<128x128xf32> to vector<128x128xbf16>
    %47 = vector.extract_strided_slice %42 {offsets = [0, 256], sizes = [128, 128], strides = [1, 1]} : vector<128x384xf32> to vector<128x128xf32>
    %48 = arith.truncf %47 : vector<128x128xf32> to vector<128x128xbf16>
    %49 = tpu.iota {dimensions = array<i32: 1>} : vector<1x128xi32>
    %c128_i32 = arith.constant 128 : i32
    %50 = arith.muli %2, %c128_i32 : i32
    %51 = vector.broadcast %50 : i32 to vector<1x128xi32>
    %52 = arith.addi %49, %51 : vector<1x128xi32>
    %53 = vector.broadcast %0 : i32 to vector<1x128xi32>
    %54 = arith.cmpi slt, %52, %53 : vector<1x128xi32>
    %55 = tpu.iota {dimensions = array<i32: 0>} : vector<128x1xi32>
    %c128_i32_19 = arith.constant 128 : i32
    %56 = arith.muli %2, %c128_i32_19 : i32
    %57 = vector.broadcast %56 : i32 to vector<128x1xi32>
    %58 = arith.addi %55, %57 : vector<128x1xi32>
    %59 = vector.broadcast %0 : i32 to vector<128x1xi32>
    %60 = arith.cmpi slt, %58, %59 : vector<128x1xi32>
    %cst_20 = arith.constant dense<0.000000e+00> : vector<16x128xf32>
    %61 = tpu.matmul %8, %46, %cst_20 {dimension_numbers = #tpu.dot_dimension_numbers<[1], [1], [0], [0], [0, 0, 1, 0], [], []>} : vector<16x128xbf16>, vector<128x128xbf16>, vector<16x128xf32> -> vector<16x128xf32>
    %cst_21 = arith.constant -1.000000e+30 : f32
    %62 = vector.shape_cast %54 : vector<1x128xi1> to vector<1x128xi1>
    %63 = vector.broadcast %62 : vector<1x128xi1> to vector<16x128xi1>
    %64 = vector.broadcast %cst_21 : f32 to vector<16x128xf32>
    %65 = arith.select %63, %61, %64 : vector<16x128xi1>, vector<16x128xf32>
    %66 = arith.truncf %65 : vector<16x128xf32> to vector<16x128xbf16>
    %c0_22 = arith.constant 0 : index
    %c0_23 = arith.constant 0 : index
    %67 = vector.load %arg14[%c0_22, %c0_23] : memref<16x128xbf16, #tpu.memory_space<vmem>>, vector<16x128xbf16>
    tpu.vector_store %arg14[%c0_22, %c0_23], %66 {strides = array<i32>} : memref<16x128xbf16, #tpu.memory_space<vmem>>, vector<16x128xbf16>,
    %c0_24 = arith.constant 0 : index
    %c0_25 = arith.constant 0 : index
    %68 = vector.load %arg20[%c0_24, %c0_25] : memref<16x1xf32, #tpu.memory_space<vmem>>, vector<16x1xf32>
    %cst_26 = arith.constant dense<0xFF800000> : vector<16xf32>
    %69 = vector.multi_reduction <maximumf>, %65, %cst_26 [1] : vector<16x128xf32> to vector<16xf32>
    %70 = vector.shape_cast %69 : vector<16xf32> to vector<16x1xf32>
    %71 = arith.maximumf %68, %70 : vector<16x1xf32>
    %72 = arith.subf %68, %71 : vector<16x1xf32>
    %73 = math.exp %72 : vector<16x1xf32>
    %74 = vector.broadcast %71 : vector<16x1xf32> to vector<16x128xf32>
    %75 = arith.subf %65, %74 : vector<16x128xf32>
    %76 = math.exp %75 : vector<16x128xf32>
    %c0_27 = arith.constant 0 : index
    %c0_28 = arith.constant 0 : index
    %77 = vector.load %arg21[%c0_27, %c0_28] : memref<16x1xf32, #tpu.memory_space<vmem>>, vector<16x1xf32>
    %78 = arith.mulf %73, %77 : vector<16x1xf32>
    %cst_29 = arith.constant dense<0.000000e+00> : vector<16xf32>
    %79 = vector.multi_reduction <add>, %76, %cst_29 [1] : vector<16x128xf32> to vector<16xf32>
    %80 = vector.shape_cast %79 : vector<16xf32> to vector<16x1xf32>
    %81 = arith.addf %78, %80 : vector<16x1xf32>
    %c0_30 = arith.constant 0 : index
    %c0_31 = arith.constant 0 : index
    %82 = vector.load %arg21[%c0_30, %c0_31] : memref<16x1xf32, #tpu.memory_space<vmem>>, vector<16x1xf32>
    tpu.vector_store %arg21[%c0_30, %c0_31], %81 {strides = array<i32>} : memref<16x1xf32, #tpu.memory_space<vmem>>, vector<16x1xf32>,
    %c0_32 = arith.constant 0 : index
    %c0_33 = arith.constant 0 : index
    %83 = vector.load %arg22[%c0_32, %c0_33] : memref<16x128xf32, #tpu.memory_space<vmem>>, vector<16x128xf32>
    %84 = vector.broadcast %73 : vector<16x1xf32> to vector<16x128xf32>
    %85 = arith.mulf %84, %83 : vector<16x128xf32>
    %86 = arith.truncf %76 : vector<16x128xf32> to vector<16x128xbf16>
    %cst_34 = arith.constant dense<0.000000e+00> : vector<16x128xf32>
    %87 = tpu.matmul %86, %48, %cst_34 {dimension_numbers = #tpu.dot_dimension_numbers<[1], [0], [0], [1], [0, 0, 1, 1], [], []>} : vector<16x128xbf16>, vector<128x128xbf16>, vector<16x128xf32> -> vector<16x128xf32>
    %88 = arith.addf %85, %87 : vector<16x128xf32>
    %c0_35 = arith.constant 0 : index
    %c0_36 = arith.constant 0 : index
    %89 = vector.load %arg22[%c0_35, %c0_36] : memref<16x128xf32, #tpu.memory_space<vmem>>, vector<16x128xf32>
    tpu.vector_store %arg22[%c0_35, %c0_36], %88 {strides = array<i32>} : memref<16x128xf32, #tpu.memory_space<vmem>>, vector<16x128xf32>,
    %c0_37 = arith.constant 0 : index
    %c0_38 = arith.constant 0 : index
    %90 = vector.load %arg20[%c0_37, %c0_38] : memref<16x1xf32, #tpu.memory_space<vmem>>, vector<16x1xf32>
    tpu.vector_store %arg20[%c0_37, %c0_38], %71 {strides = array<i32>} : memref<16x1xf32, #tpu.memory_space<vmem>>, vector<16x1xf32>,
    %91 = tpu.iota {dimensions = array<i32: 0>} : vector<16x1xi32>
    %c4_i32 = arith.constant 4 : i32
    %92 = vector.broadcast %c4_i32 : i32 to vector<16x1xi32>
    %93 = arith.cmpi slt, %91, %92 : vector<16x1xi32>
    %cst_39 = arith.constant dense<0.000000e+00> : vector<16x128xf32>
    %94 = tpu.matmul %10, %44, %cst_39 {dimension_numbers = #tpu.dot_dimension_numbers<[1], [1], [0], [0], [0, 0, 1, 0], [], []>} : vector<16x128xbf16>, vector<128x128xbf16>, vector<16x128xf32> -> vector<16x128xf32>
    %cst_40 = arith.constant -1.000000e+30 : f32
    %95 = vector.shape_cast %93 : vector<16x1xi1> to vector<16x1xi1>
    %96 = vector.broadcast %95 : vector<16x1xi1> to vector<16x128xi1>
    %97 = vector.broadcast %cst_40 : f32 to vector<16x128xf32>
    %98 = arith.select %96, %94, %97 : vector<16x128xi1>, vector<16x128xf32>
    %cst_41 = arith.constant dense<0xFF800000> : vector<128xf32>
    %99 = vector.multi_reduction <maximumf>, %98, %cst_41 [0] : vector<16x128xf32> to vector<128xf32>
    %100 = vector.shape_cast %99 : vector<128xf32> to vector<1x128xf32>
    %101 = vector.broadcast %100 : vector<1x128xf32> to vector<16x128xf32>
    %102 = arith.subf %98, %101 : vector<16x128xf32>
    %103 = math.exp %102 : vector<16x128xf32>
    %cst_42 = arith.constant dense<0.000000e+00> : vector<128xf32>
    %104 = vector.multi_reduction <add>, %103, %cst_42 [0] : vector<16x128xf32> to vector<128xf32>
    %105 = vector.shape_cast %104 : vector<128xf32> to vector<1x128xf32>
    %106 = tpu.reciprocal %105 {approx = true} : vector<1x128xf32> -> vector<1x128xf32>
    %107 = vector.broadcast %106 : vector<1x128xf32> to vector<16x128xf32>
    %108 = arith.mulf %103, %107 : vector<16x128xf32>
    %109 = arith.truncf %108 : vector<16x128xf32> to vector<16x128xbf16>
    %c0_43 = arith.constant 0 : index
    %c0_44 = arith.constant 0 : index
    %110 = vector.load %arg15[%c0_43, %c0_44] : memref<16x128xbf16, #tpu.memory_space<vmem>>, vector<16x128xbf16>
    tpu.vector_store %arg15[%c0_43, %c0_44], %109 {strides = array<i32>} : memref<16x128xbf16, #tpu.memory_space<vmem>>, vector<16x128xbf16>,
    %111 = arith.truncf %108 : vector<16x128xf32> to vector<16x128xbf16>
    %cst_45 = arith.constant dense<0.000000e+00> : vector<128x128xf32>
    %112 = tpu.matmul %111, %12, %cst_45 {dimension_numbers = #tpu.dot_dimension_numbers<[0], [0], [1], [1], [0, 1, 1, 1], [], []>} : vector<16x128xbf16>, vector<16x128xbf16>, vector<128x128xf32> -> vector<128x128xf32>
    %cst_46 = arith.constant dense<0.000000e+00> : vector<128xf32>
    %113 = vector.multi_reduction <add>, %112, %cst_46 [1] : vector<128x128xf32> to vector<128xf32>
    %114 = vector.shape_cast %113 : vector<128xf32> to vector<128x1xf32>
    %cst_47 = arith.constant 1.280000e+02 : f32
    %115 = vector.broadcast %cst_47 : f32 to vector<128x1xf32>
    %116 = arith.divf %114, %115 : vector<128x1xf32>
    %117 = vector.broadcast %116 : vector<128x1xf32> to vector<128x128xf32>
    %118 = arith.subf %112, %117 : vector<128x128xf32>
    %119 = arith.mulf %118, %118 : vector<128x128xf32>
    %cst_48 = arith.constant dense<0.000000e+00> : vector<128xf32>
    %120 = vector.multi_reduction <add>, %119, %cst_48 [1] : vector<128x128xf32> to vector<128xf32>
    %121 = vector.shape_cast %120 : vector<128xf32> to vector<128x1xf32>
    %cst_49 = arith.constant 1.280000e+02 : f32
    %122 = vector.broadcast %cst_49 : f32 to vector<128x1xf32>
    %123 = arith.divf %121, %122 : vector<128x1xf32>
    %124 = vector.broadcast %116 : vector<128x1xf32> to vector<128x128xf32>
    %125 = arith.subf %112, %124 : vector<128x128xf32>
    %cst_50 = arith.constant 9.99999974E-6 : f32
    %126 = vector.broadcast %cst_50 : f32 to vector<128x1xf32>
    %127 = arith.addf %123, %126 : vector<128x1xf32>
    %128 = math.rsqrt %127 : vector<128x1xf32>
    %129 = vector.broadcast %128 : vector<128x1xf32> to vector<128x128xf32>
    %130 = arith.mulf %125, %129 : vector<128x128xf32>
    %131 = arith.truncf %130 : vector<128x128xf32> to vector<128x128xbf16>
    %c0_51 = arith.constant 0 : index
    %c0_52 = arith.constant 0 : index
    %132 = vector.load %arg9[%c0_51, %c0_52] : memref<128x128xbf16, #tpu.memory_space<vmem>>, vector<128x128xbf16>
    %cst_53 = arith.constant dense<0.000000e+00> : vector<128x128xf32>
    %133 = tpu.matmul %131, %132, %cst_53 {dimension_numbers = #tpu.dot_dimension_numbers<[1], [0], [0], [1], [0, 0, 1, 1], [], []>} : vector<128x128xbf16>, vector<128x128xbf16>, vector<128x128xf32> -> vector<128x128xf32>
    %c0_54 = arith.constant 0 : index
    %c0_55 = arith.constant 0 : index
    %134 = vector.load %arg10[%c0_54, %c0_55] : memref<1x128xf32, #tpu.memory_space<vmem>>, vector<1x128xf32>
    %135 = vector.broadcast %134 : vector<1x128xf32> to vector<128x128xf32>
    %136 = arith.addf %133, %135 : vector<128x128xf32>
    %cst_56 = arith.constant 5.000000e-01 : f32
    %137 = vector.broadcast %cst_56 : f32 to vector<128x128xf32>
    %138 = arith.mulf %137, %136 : vector<128x128xf32>
    %cst_57 = arith.constant 4.471500e-02 : f32
    %139 = vector.broadcast %cst_57 : f32 to vector<128x128xf32>
    %140 = arith.mulf %139, %136 : vector<128x128xf32>
    %141 = arith.mulf %140, %136 : vector<128x128xf32>
    %142 = arith.mulf %141, %136 : vector<128x128xf32>
    %143 = arith.addf %136, %142 : vector<128x128xf32>
    %cst_58 = arith.constant 0.797884583 : f32
    %144 = vector.broadcast %cst_58 : f32 to vector<128x128xf32>
    %145 = arith.mulf %144, %143 : vector<128x128xf32>
    %146 = math.tanh %145 : vector<128x128xf32>
    %cst_59 = arith.constant 1.000000e+00 : f32
    %147 = vector.broadcast %cst_59 : f32 to vector<128x128xf32>
    %148 = arith.addf %147, %146 : vector<128x128xf32>
    %149 = arith.mulf %138, %148 : vector<128x128xf32>
    %150 = arith.truncf %149 : vector<128x128xf32> to vector<128x128xbf16>
    %c0_60 = arith.constant 0 : index
    %c0_61 = arith.constant 0 : index
    %151 = vector.load %arg11[%c0_60, %c0_61] : memref<128x128xbf16, #tpu.memory_space<vmem>>, vector<128x128xbf16>
    %cst_62 = arith.constant dense<0.000000e+00> : vector<128x128xf32>
    %152 = tpu.matmul %150, %151, %cst_62 {dimension_numbers = #tpu.dot_dimension_numbers<[1], [0], [0], [1], [0, 0, 1, 1], [], []>} : vector<128x128xbf16>, vector<128x128xbf16>, vector<128x128xf32> -> vector<128x128xf32>
    %c0_63 = arith.constant 0 : index
    %c0_64 = arith.constant 0 : index
    %153 = vector.load %arg12[%c0_63, %c0_64] : memref<1x128xf32, #tpu.memory_space<vmem>>, vector<1x128xf32>
    %154 = vector.broadcast %153 : vector<1x128xf32> to vector<128x128xf32>
    %155 = arith.addf %152, %154 : vector<128x128xf32>
    %cst_65 = arith.constant dense<0.000000e+00> : vector<128xf32>
    %156 = vector.multi_reduction <add>, %155, %cst_65 [1] : vector<128x128xf32> to vector<128xf32>
    %157 = vector.shape_cast %156 : vector<128xf32> to vector<128x1xf32>
    %cst_66 = arith.constant 1.280000e+02 : f32
    %158 = vector.broadcast %cst_66 : f32 to vector<128x1xf32>
    %159 = arith.divf %157, %158 : vector<128x1xf32>
    %160 = vector.broadcast %159 : vector<128x1xf32> to vector<128x128xf32>
    %161 = arith.subf %155, %160 : vector<128x128xf32>
    %162 = arith.mulf %161, %161 : vector<128x128xf32>
    %cst_67 = arith.constant dense<0.000000e+00> : vector<128xf32>
    %163 = vector.multi_reduction <add>, %162, %cst_67 [1] : vector<128x128xf32> to vector<128xf32>
    %164 = vector.shape_cast %163 : vector<128xf32> to vector<128x1xf32>
    %cst_68 = arith.constant 1.280000e+02 : f32
    %165 = vector.broadcast %cst_68 : f32 to vector<128x1xf32>
    %166 = arith.divf %164, %165 : vector<128x1xf32>
    %167 = vector.broadcast %159 : vector<128x1xf32> to vector<128x128xf32>
    %168 = arith.subf %155, %167 : vector<128x128xf32>
    %cst_69 = arith.constant 9.99999974E-6 : f32
    %169 = vector.broadcast %cst_69 : f32 to vector<128x1xf32>
    %170 = arith.addf %166, %169 : vector<128x1xf32>
    %171 = math.rsqrt %170 : vector<128x1xf32>
    %172 = vector.broadcast %171 : vector<128x1xf32> to vector<128x128xf32>
    %173 = arith.mulf %168, %172 : vector<128x128xf32>
    %c0_70 = arith.constant 0 : index
    %c0_71 = arith.constant 0 : index
    %174 = vector.load %arg23[%c0_70, %c0_71] : memref<1x128xf32, #tpu.memory_space<vmem>>, vector<1x128xf32>
    %cst_72 = arith.constant 0.000000e+00 : f32
    %175 = vector.shape_cast %60 : vector<128x1xi1> to vector<128x1xi1>
    %176 = vector.broadcast %175 : vector<128x1xi1> to vector<128x128xi1>
    %177 = vector.broadcast %cst_72 : f32 to vector<128x128xf32>
    %178 = arith.select %176, %173, %177 : vector<128x128xi1>, vector<128x128xf32>
    %cst_73 = arith.constant dense<0.000000e+00> : vector<128xf32>
    %179 = vector.multi_reduction <add>, %178, %cst_73 [0] : vector<128x128xf32> to vector<128xf32>
    %180 = vector.shape_cast %179 : vector<128xf32> to vector<1x128xf32>
    %181 = arith.addf %174, %180 : vector<1x128xf32>
    %c0_74 = arith.constant 0 : index
    %c0_75 = arith.constant 0 : index
    %182 = vector.load %arg23[%c0_74, %c0_75] : memref<1x128xf32, #tpu.memory_space<vmem>>, vector<1x128xf32>
    tpu.vector_store %arg23[%c0_74, %c0_75], %181 {strides = array<i32>} : memref<1x128xf32, #tpu.memory_space<vmem>>, vector<1x128xf32>,
    %c0_i32_76 = arith.constant 0 : i32
    %183 = arith.cmpi eq, %arg1, %c0_i32_76 : i32
    %184 = arith.extui %183 : i1 to i32
    %c0_i32_77 = arith.constant 0 : i32
    %185 = arith.cmpi ne, %184, %c0_i32_77 : i32
    scf.if %185 {
      %c0_78 = arith.constant 0 : index
      %c0_79 = arith.constant 0 : index
      %186 = vector.load %arg20[%c0_78, %c0_79] : memref<16x1xf32, #tpu.memory_space<vmem>>, vector<16x1xf32>
      %c0_80 = arith.constant 0 : index
      %c0_81 = arith.constant 0 : index
      %187 = vector.load %arg16[%c0_80, %c0_81] : memref<16x1xf32, #tpu.memory_space<vmem>>, vector<16x1xf32>
      tpu.vector_store %arg16[%c0_80, %c0_81], %186 {strides = array<i32>} : memref<16x1xf32, #tpu.memory_space<vmem>>, vector<16x1xf32>,
      %c0_82 = arith.constant 0 : index
      %c0_83 = arith.constant 0 : index
      %188 = vector.load %arg21[%c0_82, %c0_83] : memref<16x1xf32, #tpu.memory_space<vmem>>, vector<16x1xf32>
      %c0_84 = arith.constant 0 : index
      %c0_85 = arith.constant 0 : index
      %189 = vector.load %arg17[%c0_84, %c0_85] : memref<16x1xf32, #tpu.memory_space<vmem>>, vector<16x1xf32>
      tpu.vector_store %arg17[%c0_84, %c0_85], %188 {strides = array<i32>} : memref<16x1xf32, #tpu.memory_space<vmem>>, vector<16x1xf32>,
      %c0_86 = arith.constant 0 : index
      %c0_87 = arith.constant 0 : index
      %190 = vector.load %arg22[%c0_86, %c0_87] : memref<16x128xf32, #tpu.memory_space<vmem>>, vector<16x128xf32>
      %c0_88 = arith.constant 0 : index
      %c0_89 = arith.constant 0 : index
      %191 = vector.load %arg18[%c0_88, %c0_89] : memref<16x128xf32, #tpu.memory_space<vmem>>, vector<16x128xf32>
      tpu.vector_store %arg18[%c0_88, %c0_89], %190 {strides = array<i32>} : memref<16x128xf32, #tpu.memory_space<vmem>>, vector<16x128xf32>,
      %c0_90 = arith.constant 0 : index
      %c0_91 = arith.constant 0 : index
      %192 = vector.load %arg23[%c0_90, %c0_91] : memref<1x128xf32, #tpu.memory_space<vmem>>, vector<1x128xf32>
      %193 = vector.shape_cast %192 : vector<1x128xf32> to vector<1x128xf32>
      %194 = vector.broadcast %193 : vector<1x128xf32> to vector<8x128xf32>
      %c0_92 = arith.constant 0 : index
      %c0_93 = arith.constant 0 : index
      %195 = vector.load %arg19[%c0_92, %c0_93] : memref<8x128xf32, #tpu.memory_space<vmem>>, vector<8x128xf32>
      tpu.vector_store %arg19[%c0_92, %c0_93], %194 {strides = array<i32>} : memref<8x128xf32, #tpu.memory_space<vmem>>, vector<8x128xf32>,
    } else {
    }
    return
  }
  func.func @transform_0(%arg0: i32, %arg1: i32, %arg2: memref<1xi32, #tpu.memory_space<smem>>) -> (i32, i32) {
    %c1_i32 = arith.constant 1 : i32
    %0 = arith.muli %arg0, %c1_i32 : i32
    %1 = arith.addi %0, %arg1 : i32
    %c0_i32 = arith.constant 0 : i32
    %c0_i32_0 = arith.constant 0 : i32
    return %1, %c0_i32 : i32, i32
  }
  func.func @transform_1(%arg0: i32, %arg1: i32, %arg2: memref<1xi32, #tpu.memory_space<smem>>) -> (i32, i32) {
    %c0_i32 = arith.constant 0 : i32
    %c0_i32_0 = arith.constant 0 : i32
    %c0_i32_1 = arith.constant 0 : i32
    return %c0_i32, %c0_i32_0 : i32, i32
  }
  func.func @transform_2(%arg0: i32, %arg1: i32, %arg2: memref<1xi32, #tpu.memory_space<smem>>) -> (i32, i32) {
    %c0_i32 = arith.constant 0 : i32
    %c0_i32_0 = arith.constant 0 : i32
    %c0_i32_1 = arith.constant 0 : i32
    return %c0_i32, %c0_i32_0 : i32, i32
  }
  func.func @transform_3(%arg0: i32, %arg1: i32, %arg2: memref<1xi32, #tpu.memory_space<smem>>) -> (i32, i32) {
    %c0_i32 = arith.constant 0 : i32
    %c0_i32_0 = arith.constant 0 : i32
    %c0_i32_1 = arith.constant 0 : i32
    return %c0_i32, %c0_i32_0 : i32, i32
  }
  func.func @transform_4(%arg0: i32, %arg1: i32, %arg2: memref<1xi32, #tpu.memory_space<smem>>) -> (i32, i32) {
    %c0_i32 = arith.constant 0 : i32
    %c0_i32_0 = arith.constant 0 : i32
    %c0_i32_1 = arith.constant 0 : i32
    return %c0_i32, %c0_i32_0 : i32, i32
  }
  func.func @transform_5(%arg0: i32, %arg1: i32, %arg2: memref<1xi32, #tpu.memory_space<smem>>) -> (i32, i32) {
    %c0_i32 = arith.constant 0 : i32
    %c0_i32_0 = arith.constant 0 : i32
    %c0_i32_1 = arith.constant 0 : i32
    return %c0_i32, %c0_i32_0 : i32, i32
  }
  func.func @transform_6(%arg0: i32, %arg1: i32, %arg2: memref<1xi32, #tpu.memory_space<smem>>) -> (i32, i32) {
    %c0_i32 = arith.constant 0 : i32
    %c0_i32_0 = arith.constant 0 : i32
    %c0_i32_1 = arith.constant 0 : i32
    return %c0_i32, %c0_i32_0 : i32, i32
  }
  func.func @transform_7(%arg0: i32, %arg1: i32, %arg2: memref<1xi32, #tpu.memory_space<smem>>) -> (i32, i32) {
    %c0_i32 = arith.constant 0 : i32
    %c0_i32_0 = arith.constant 0 : i32
    %c0_i32_1 = arith.constant 0 : i32
    return %c0_i32, %c0_i32_0 : i32, i32
  }
  func.func @transform_8(%arg0: i32, %arg1: i32, %arg2: memref<1xi32, #tpu.memory_space<smem>>) -> (i32, i32) {
    %c0_i32 = arith.constant 0 : i32
    %c0_i32_0 = arith.constant 0 : i32
    %c0_i32_1 = arith.constant 0 : i32
    return %c0_i32, %c0_i32_0 : i32, i32
  }
  func.func @transform_9(%arg0: i32, %arg1: i32, %arg2: memref<1xi32, #tpu.memory_space<smem>>) -> (i32, i32) {
    %c0_i32 = arith.constant 0 : i32
    %c0_i32_0 = arith.constant 0 : i32
    %c0_i32_1 = arith.constant 0 : i32
    return %c0_i32, %c0_i32_0 : i32, i32
  }
  func.func @transform_10(%arg0: i32, %arg1: i32, %arg2: memref<1xi32, #tpu.memory_space<smem>>) -> (i32, i32) {
    %c0_i32 = arith.constant 0 : i32
    %c0_i32_0 = arith.constant 0 : i32
    return %arg0, %c0_i32 : i32, i32
  }
  func.func @transform_11(%arg0: i32, %arg1: i32, %arg2: memref<1xi32, #tpu.memory_space<smem>>) -> (i32, i32) {
    %c1_i32 = arith.constant 1 : i32
    %0 = arith.muli %arg0, %c1_i32 : i32
    %1 = arith.addi %0, %arg1 : i32
    %c0_i32 = arith.constant 0 : i32
    %c0_i32_0 = arith.constant 0 : i32
    return %c0_i32, %1 : i32, i32
  }
  func.func @transform_12(%arg0: i32, %arg1: i32, %arg2: memref<1xi32, #tpu.memory_space<smem>>) -> (i32, i32) {
    %c1_i32 = arith.constant 1 : i32
    %0 = arith.muli %arg0, %c1_i32 : i32
    %1 = arith.addi %0, %arg1 : i32
    %c0_i32 = arith.constant 0 : i32
    %c0_i32_0 = arith.constant 0 : i32
    return %c0_i32, %1 : i32, i32
  }
  func.func @transform_13(%arg0: i32, %arg1: i32, %arg2: memref<1xi32, #tpu.memory_space<smem>>) -> (i32, i32) {
    %c0_i32 = arith.constant 0 : i32
    %c0_i32_0 = arith.constant 0 : i32
    return %arg0, %c0_i32 : i32, i32
  }
  func.func @transform_14(%arg0: i32, %arg1: i32, %arg2: memref<1xi32, #tpu.memory_space<smem>>) -> (i32, i32) {
    %c0_i32 = arith.constant 0 : i32
    %c0_i32_0 = arith.constant 0 : i32
    return %arg0, %c0_i32 : i32, i32
  }
  func.func @transform_15(%arg0: i32, %arg1: i32, %arg2: memref<1xi32, #tpu.memory_space<smem>>) -> (i32, i32) {
    %c0_i32 = arith.constant 0 : i32
    %c0_i32_0 = arith.constant 0 : i32
    return %arg0, %c0_i32 : i32, i32
  }
  func.func @transform_16(%arg0: i32, %arg1: i32, %arg2: memref<1xi32, #tpu.memory_space<smem>>) -> (i32, i32) {
    %c0_i32 = arith.constant 0 : i32
    %c0_i32_0 = arith.constant 0 : i32
    return %arg0, %c0_i32 : i32, i32
  }
}

</mosaic_0001>

<bundles_post_ra>
// kernel: tpu_custom_call.1
= control target key start
LH: loop header
LB: loop body
LE: loop exit
PB: predicated region body
PF: predicated region fallthrough
CT: control target
= control target key end

     0   :  { %s8835_s0 = inlined_call_operand.<no memory space> [shape: s32[1], index: 0, kind: input, shape index: {}]   ;;  %s8836_s1 = inlined_call_operand.hbm [shape: bf16[256,384], index: 1, kind: input, shape index: {}]   ;;  %s8837_s2 = inlined_call_operand.hbm [shape: f32[16,256], index: 2, kind: input, shape index: {}]   ;;  %s8838_s3 = inlined_call_operand.hbm [shape: bf16[384,256], index: 3, kind: input, shape index: {}]   ;;  %s8839_s4 = inlined_call_operand.vmem [shape: f32[1,256], index: 4, kind: input, shape index: {}]   ;;  %s8840_s5 = inlined_call_operand.hbm [shape: bf16[256,384], index: 5, kind: input, shape index: {}]   ;;  %s8841_s6 = inlined_call_operand.vmem [shape: f32[1,384], index: 6, kind: input, shape index: {}]   ;;  %s8842_s7 = inlined_call_operand.hbm [shape: bf16[128,128], index: 7, kind: input, shape index: {}]   ;;  %s8843_s8 = inlined_call_operand.vmem [shape: f32[1,128], index: 8, kind: input, shape index: {}]   ;;  %s8844_s9 = inlined_call_operand.hbm [shape: bf16[128,128], index: 9, kind: input, shape index: {}]   ;;  %s8845_s10 = inlined_call_operand.vmem [shape: f32[1,128], index: 10, kind: input, shape index: {}]   ;;  %s8846_s11 = inlined_call_operand.vmem [shape: f32[32,16], index: 11, kind: output, shape index: {0}]   ;;  %s8847_s12 = inlined_call_operand.hbm [shape: bf16[16,256], index: 12, kind: output, shape index: {1}]   ;;  %s8848_s13 = inlined_call_operand.hbm [shape: bf16[16,256], index: 13, kind: output, shape index: {2}]   ;;  %s8849_s14 = inlined_call_operand.vmem [shape: f32[32,1], index: 14, kind: output, shape index: {3}]   ;;  %s8850_s15 = inlined_call_operand.vmem [shape: f32[32,1], index: 15, kind: output, shape index: {4}]   ;;  %s8851_s16 = inlined_call_operand.hbm [shape: f32[32,128], index: 16, kind: output, shape index: {5}]   ;;  %s8852_s17 = inlined_call_operand.hbm [shape: f32[16,128], index: 17, kind: output, shape index: {6}]  }
   0x1   :  { %8864 = sst [smem:[#allocation35_spill]] %s8835_s0 }
   0x2   :  { %8865 = sst [smem:[#allocation36_spill]] %s8836_s1 }
   0x3   :  { %8866 = sst [smem:[#allocation37_spill]] %s8837_s2 }
   0x4   :  { %8867 = sst [smem:[#allocation38_spill]] %s8838_s3 }
   0x5   :  { %8868 = sst [smem:[#allocation39_spill]] %s8839_s4 }
   0x6   :  { %8869 = sst [smem:[#allocation40_spill]] %s8840_s5 }
   0x7   :  { %8870 = sst [smem:[#allocation41_spill]] %s8841_s6 }
   0x8   :  { %8871 = sst [smem:[#allocation42_spill]] %s8842_s7 }
   0x9   :  { %8872 = sst [smem:[#allocation43_spill]] %s8843_s8 }
   0xa   :  { %8873 = sst [smem:[#allocation44_spill]] %s8844_s9 }
   0xb   :  { %8874 = sst [smem:[#allocation45_spill]] %s8845_s10 }
   0xc   :  { %8875 = sst [smem:[#allocation46_spill]] %s8846_s11 }
   0xd   :  { %8876 = sst [smem:[#allocation47_spill]] %s8847_s12 }
   0xe   :  { %8877 = sst [smem:[#allocation48_spill]] %s8848_s13 }
   0xf   :  { %8878 = sst [smem:[#allocation49_spill]] %s8849_s14 }
  0x10   :  { %8879 = sst [smem:[#allocation50_spill]] %s8850_s15 }
  0x11   :  { %8880 = sst [smem:[#allocation51_spill]] %s8851_s16 }
  0x12   :  { %8881 = sst [smem:[#allocation52_spill]] %s8852_s17 }
  0x13   :  { %s8882_s26 = sld [smem:[#allocation35_spill]] }
  0x19   :  { %23 = sst [smem:[#allocation8]] %s8882_s26 }
  0x1a   :  { %24 = vsyncpa [#allocation10], 0 }
  0x1b   :  { %26 = vsyncpa [#allocation10 + $0x1], 0 }
  0x1c   :  { %27 = vsyncpa [#allocation13], 0 }
  0x1d   :  { %28 = vsyncpa [#allocation16], 0 }
  0x1e   :  { %29 = vsyncpa [#allocation19], 0 }
  0x1f   :  { %30 = vsyncpa [#allocation11], 0 }
  0x20   :  { %32 = vsyncpa [#allocation11 + $0x1], 0 }
  0x21   :  { %33 = vsyncpa [#allocation22], 0 }
  0x22   :  { %35 = vsyncpa [#allocation22 + $0x1], 0 }
  0x23   :  { %36 = vsyncpa [#allocation25], 0 }
  0x24   :  { %38 = vsyncpa [#allocation25 + $0x1], 0  ;;  %s6763_s27 = smov 0   ;;  %s6765_s28 = smov 0  }
  0x25   :  { %s6767_s29 = smov 0   ;;  %s6769_s0 = smov 0  }
  0x26   :  { %s6771_s30 = smov 0   ;;  %s6773_s18 = smov 0  }
  0x27 LB: > { %8883 = sst [smem:[#allocation33_spill]] %s6641_s30  ;;  %s6794_s19 = sadd.s32 4294967295, %s6645_s18   ;;  %s6645_s18 = sphi %s6773_s18, %s44_s18   ;;  %s6641_s30 = sphi %s6771_s30, %s8946_s30   ;;  %s6637_s0 = sphi %s6769_s0, %s8945_s0   ;;  %s6633_s29 = sphi %s6767_s29, %s8949_s29   ;;  %s6629_s28 = sphi %s6765_s28, %s8948_s28   ;;  %s6625_s27 = sphi %s6763_s27, %s8947_s27  }
  0x28   : > { %p4974_p0 = scmp.ge.s32.totalorder %s6645_s18, 1  ;;  %p79_p1 = scmp.eq.s32.totalorder %s6794_s19, 0 }
  0x29   : > { %p464_p2 = scmp.lt.s32.totalorder %s6645_s18, 3  ;;  %s8884_s2 = sld [smem:[#allocation37_spill]] }
  0x2a   : > { %s6647_s23 = smov [#allocation12]   ;;  %p4980_p6 = scmp.ge.s32.totalorder %s6645_s18, 2 }
  0x2b   : > { %p6802_p3 = pnand %p4974_p0, %p464_p2  ;;  %s477_s24 = sshll.u32 %s6647_s23, 4  ;;  %s478_s24 = int_to_ptr.vmem [resolvable:$true] %s477_s24 }
  0x2c   : > { %s8887_s5 = sld [smem:[#allocation40_spill]]  ;;  %s6649_s17 = smov 16  }
  0x2d   : > { %p6004_p4 = pneg %p6802_p3  ;;  %s6650_s23 = smov [#allocation15]  }
  0x2e   : > { %s508_s16 = sshll.u32 %s6650_s23, 4  ;;  %s8857_s12 = smov 192   ;;  %s509_s16 = int_to_ptr.vmem [resolvable:$true] %s508_s16 }
  0x2f   : > { %s475_s21 = sshll.u32 %s8884_s2, 4  ;;  %p6810_p5 = pnand %p6004_p4, %p79_p1  ;;  %s476_s21 = int_to_ptr.hbm [resolvable:$true] %s475_s21 }
  0x30   : > { %s6648_s2 = smov 256   ;;  %s8859_s13 = smov 12  }
  0x31   : > { %6007 = dma.hbm_to_vmem [thread:$0]  (!%p6810_p5), %s476_s21, 512, %s478_s24, [#allocation13], %s6648_s2, %s6648_s2, %s6649_s17  }
  0x32   : > { %s506_s20 = sshll.u32 %s8887_s5, 4  ;;  %s8888_s3 = sld [smem:[#allocation38_spill]]  ;;  %s507_s20 = int_to_ptr.hbm [resolvable:$true] %s506_s20 }
  0x33   : > { %6013 = dma.hbm_to_vmem [thread:$0]  (!%p6810_p5), %s507_s20, 6144, %s509_s16, [#allocation16], %s8857_s12, %s8857_s12, %s8859_s13  }
  0x34   : > { %s6653_s1 = smov [#allocation14]   ;;  %s8889_s7 = sld [smem:[#allocation42_spill]] }
  0x35   : > { %s491_s5 = sshll.u32 %s6653_s1, 4  ;;  %s6654_s24 = smov 128   ;;  %s492_s5 = int_to_ptr.vmem [resolvable:$true] %s491_s5 }
  0x36   : > { %s6655_s23 = smov 8   ;;  %s6656_s8 = smov [#allocation17]  }
  0x37   : > { %s525_s10 = sshll.u32 %s6656_s8, 4  ;;  %s6657_s16 = smov 64   ;;  %s526_s10 = int_to_ptr.vmem [resolvable:$true] %s525_s10 }
  0x38   : > { %s489_s26 = sshll.u32 %s8888_s3, 4  ;;  %s6658_s20 = smov 4   ;;  %s490_s26 = int_to_ptr.hbm [resolvable:$true] %s489_s26 }
  0x39   : > { %6010 = dma.hbm_to_vmem [thread:$0]  (!%p6810_p5), %s490_s26, 6144, %s492_s5, [#allocation13], %s6654_s24, %s6654_s24, %s6655_s23  }
  0x3a   : > { %s523_s21 = sshll.u32 %s8889_s7, 4  ;;  %s8890_s9 = sld [smem:[#allocation44_spill]]  ;;  %s524_s21 = int_to_ptr.hbm [resolvable:$true] %s523_s21 }
  0x3b   : > { %6016 = dma.hbm_to_vmem [thread:$0]  (!%p6810_p5), %s524_s21, 1024, %s526_s10, [#allocation16], %s6657_s16, %s6657_s16, %s6658_s20  }
  0x3c   : > { %s6659_s5 = smov [#allocation18]   ;;  %s8858_s24 = sadd.s32 4294967294, %s6645_s18  }
  0x3d   : > { %s542_s26 = sshll.u32 %s6659_s5, 4  ;;  %s56_s23 = sadd.s32 1, %s6641_s30  ;;  %s543_s26 = int_to_ptr.vmem [resolvable:$true] %s542_s26 }
  0x3e   : > { %s65_s8 = sadd.s32 1, %s6633_s29  ;;  %p58_p7 = scmp.ge.s32.totalorder %s56_s23, 2 }
  0x3f   : > { %p72_p8 = scmp.ne.s32.totalorder %s6633_s29, %s6629_s28  ;;  %p73_p9 = scmp.eq.s32.totalorder %s6645_s18, 0 }
  0x40   : > { %s540_s17 = sshll.u32 %s8890_s9, 4  ;;  %p78_p10 = scmp.ne.s32.totalorder %s6629_s28, %s6625_s27  ;;  %s541_s17 = int_to_ptr.hbm [resolvable:$true] %s540_s17 }
  0x41   : > { %6019 = dma.hbm_to_vmem [thread:$0]  (!%p6810_p5), %s541_s17, 1024, %s543_s26, [#allocation19], %s6657_s16, %s6657_s16, %s6658_s20  }
  0x42   : > { %s8951_s23 = smov (%p58_p7, %s56_s23), 0  ;;  %p6850_p11 = por %p73_p9, %p72_p8 }
  0x43   : > { %8891 = sst [smem:[#allocation34_spill]] %s8951_s23  ;;  %p6856_p12 = por %p79_p1, %p78_p10 }
  0x44   : > { %s62_s10 = ssub.s32 %s6641_s30, %s8951_s23  ;;  %p319_p13 = scmp.eq.s32.totalorder %s6794_s19, 1 }
  0x45   : > { %p63_p0 = scmp.eq.s32.totalorder %s62_s10, 0  ;;  %p325_p2 = scmp.eq.s32.totalorder %s8858_s24, 1 }
  0x46   : > { %p6865_p4 = por %p319_p13, %p72_p8  ;;  %p6042_p5 = scmp.lt.s32.totalorder %s6645_s18, 2 }
  0x47   : > { %s6871_s20 = scalar_select %p63_p0, %s6633_s29, %s65_s8  }
  0x48   : > { %p6873_p7 = por %p325_p2, %p78_p10  ;;  %s559_s2 = sand.u32 1, %s6633_s29  }
  0x49   : > { %s5971_s17 = smul.u32 192, %s559_s2  ;;  %p6021_p9 = pnand %p6042_p5, %p6850_p11 }
  0x4a   : > { %s5972_s5 = smul.u32 192, %s6641_s30  ;;  %s8896_s12 = sld [smem:[#allocation36_spill]] }
  0x4b   : > { %s563_s13 = scalar_lea.vmem [#allocation9], %s5971_s17  ;;  %s560_s8 = scalar_lea.sflag [#allocation10], %s559_s2 }
  0x4c   : > { %s573_s3 = sshll.u32 %s563_s13, 4  ;;  %s8897_s9 = smov 12   ;;  %s574_s3 = int_to_ptr.vmem [resolvable:$true] %s573_s3 }
  0x4d   : > { %s8898_s23 = smov 192   ;;  %s6890_s21 = sand.u32 (!%p6802_p3), 1, %s6629_s28  }
  0x4e   : > { %585 = sbr.rel (%p6802_p3) target bundleno = 3581 (0xdfd), region = 60  ;;  %s588_s17 = scalar_lea.sflag (!%p6802_p3), [#allocation10], %s6890_s21 }
  0x50   : > { %s570_s24 = scalar_lea.hbm %s8896_s12, %s5972_s5  ;;  %s5973_s12 = smul.u32 (!%p6802_p3), 192, %s6890_s21 }
  0x51   : > { %s571_s7 = sshll.u32 %s570_s24, 4  ;;  %s572_s7 = int_to_ptr.hbm [resolvable:$true] %s571_s7 }
  0x52   : > { %6023 = dma.hbm_to_vmem [thread:$0]  (!%p6021_p9), %s572_s7, 3072, %s574_s3, %s560_s8, %s8898_s23, %s8898_s23, %s8897_s9  }
  0x53   : > { %s6894_s13 = scalar_lea.vmem [#allocation9], %s5973_s12 }
  0x54   : > { %6596 = dma.done.wait (%p6856_p12), %s588_s17, 3072  }
  0x55   : > { %6598 = vsyncadd (%p6856_p12), %s588_s17, 4294964224 }
  0x56   : > { %6600 = dma.done.wait (%p79_p1), [#allocation13], 6656  }
  0x57   : > { %6602 = vsyncadd (%p79_p1), [#allocation13], 4294960640 }
  0x58   : > { %6604 = dma.done.wait (%p79_p1), [#allocation16], 7168  }
  0x59   : > { %6606 = vsyncadd (%p79_p1), [#allocation16], 4294960128 }
  0x5a   : > { %6608 = dma.done.wait (%p79_p1), [#allocation19], 1024  }
  0x5b   : > { %6610 = vsyncadd (%p79_p1), [#allocation19], 4294966272  ;;  %s6912_s3 = sld [smem:[#allocation8]]  ;;  %v6660_v0 = vmov 0.0   ;;  %v726_v1 = vld [vmem:[#allocation12] sm:$0xff]  ;;  %v727_v2 = vld [vmem:[#allocation12 + $0x8] sm:$0xff] }
  0x5c   : > { %1207 = vst [vmem:[#allocation5] sm:$0x1] %v6660_v0  ;;  %v730_v3 = vadd.f32 %v727_v2, %v726_v1  ;;  %v728_v4 = vld [vmem:[#allocation12 + $0x10] sm:$0xff]  ;;  %v729_v5 = vld [vmem:[#allocation12 + $0x18] sm:$0xff]  ;;  %s6915_s7 = sshll.u32 %s6890_s21, 3  ;;  %s4992_s9 = sshll.u32 %s6890_s21, 4 }
  0x5d   : > { %v733_v6 = vadd.f32 %v729_v5, %v728_v4  ;;  %s4994_s22 = sshll.u32 %s6637_s0, 1  ;;  %s8899_s11 = sld [smem:[#allocation46_spill]]  ;;  %v6661_v7 = vmov 256.0   ;;  %v5086_v11 = vld [vmem:[#allocation15 + $0xa8] sm:$0xf] }
  0x5e   : > { %731 = vadd.xlane.f32.xlu0 %v730_v3  ;;  %p699_p1 = scmp.lt.s32.totalorder %s4994_s22, 3  ;;  %s8900_s14 = sld [smem:[#allocation49_spill]]  ;;  %6120 = vrcp.f32 %v6661_v7  ;;  %v5782_v12 = vld [vmem:[#allocation15 + $0xb0] sm:$0xf0]  ;;  %v5182_v13 = vld [vmem:[#allocation15 + $0x168] sm:$0xf] }
  0x5f   : > { %s8901_s15 = sld [smem:[#allocation50_spill]]  ;;  %v5087_v14 = vor.u32 %v5782_v12, %v5086_v11  ;;  %v5806_v15 = vld [vmem:[#allocation15 + $0x170] sm:$0xf0]  ;;  %v5074_v16 = vld [vmem:[#allocation15 + $0x90] sm:$0xf]  ;;  %s8861_s23 = scalar_lea.vmem [#allocation20], %s6915_s7 }
  0x60   : > { %s8953_s22 = smov (!%p699_p1, %s4994_s22), 3  ;;  %v5779_v17 = vld [vmem:[#allocation15 + $0x98] sm:$0xf0]  ;;  %v5183_v18 = vor.u32 %v5806_v15, %v5182_v13  ;;  %v5170_v19 = vld [vmem:[#allocation15 + $0x150] sm:$0xf]  ;;  %s8902_s6 = sld [smem:[#allocation41_spill]] }
  0x61   : > { %s4995_s24 = sshll.u32 %s8953_s22, 3  ;;  %v5803_v20 = vld [vmem:[#allocation15 + $0x158] sm:$0xf0]  ;;  %1117 = vmatpush.bf16.msra.mxu0 %v5087_v14  ;;  %v5075_v21 = vor.u32 %v5779_v17, %v5074_v16  ;;  %v5062_v23 = vld [vmem:[#allocation15 + $0x78] sm:$0xf]  ;;  %s667_s25 = scalar_lea.vmem [#allocation21], %s6915_s7 }
  0x62   : > { %1131 = vmatpush.bf16.msra.mxu1 %v5183_v18  ;;  %v5171_v22 = vor.u32 %v5803_v20, %v5170_v19  ;;  %v5776_v24 = vld [vmem:[#allocation15 + $0x80] sm:$0xf0]  ;;  %v5158_v26 = vld [vmem:[#allocation15 + $0x138] sm:$0xf]  ;;  %v5050_v46 = vld [vmem:[#allocation15 + $0x60] sm:$0xf] }
  0x63   : > { %s6922_s2 = scalar_lea.vmem %s8899_s11, %s4995_s24  ;;  %v5800_v27 = vld [vmem:[#allocation15 + $0x140] sm:$0xf0]  ;;  %v5063_v28 = vor.u32 %v5776_v24, %v5062_v23  ;;  %v5773_v47 = vld [vmem:[#allocation15 + $0x68] sm:$0xf0]  ;;  %v5146_v48 = vld [vmem:[#allocation15 + $0x120] sm:$0xf] }
  0x64   : > { %s6927_s10 = scalar_lea.vmem %s8900_s14, %s4995_s24  ;;  %v6121_v8 = vpop.eup %6120  ;;  %v5159_v29 = vor.u32 %v5800_v27, %v5158_v26  ;;  %v5051_v49 = vor.u32 %v5773_v47, %v5050_v46  ;;  %v5797_v50 = vld [vmem:[#allocation15 + $0x128] sm:$0xf0]  ;;  %v5088_v52 = vld [vmem:[#allocation15 + $0xb4] sm:$0xf0]  ;;  %v5038_v58 = vld [vmem:[#allocation15 + $0x48] sm:$0xf] }
  0x65   : > { %s6932_s17 = scalar_lea.vmem %s8901_s15, %s4995_s24  ;;  %v737_v9 = vmul.f32 256.0, %v6121_v8  ;;  %1118 = vmatpush.bf16.msra.mxu0 %v5075_v21  ;;  %vm741_vm0 = vweird.f32 %v6121_v8  ;;  %v5781_v51 = vld [vmem:[#allocation15 + $0xac] sm:$0xf]  ;;  %v5147_v53 = vor.u32 %v5797_v50, %v5146_v48  ;;  %v5184_v56 = vld [vmem:[#allocation15 + $0x174] sm:$0xf0]  ;;  %s6967_s5 = scalar_lea.vmem [#allocation23], %s4992_s9 }
  0x66   : > { %734 = vadd.xlane.f32.xlu0 %v733_v6  ;;  %1132 = vmatpush.bf16.msra.mxu1 %v5171_v22  ;;  %v5091_v54 = vor.u32 %v5781_v51, %v5088_v52  ;;  %v5805_v55 = vld [vmem:[#allocation15 + $0x16c] sm:$0xf]  ;;  %v5770_v59 = vld [vmem:[#allocation15 + $0x50] sm:$0xf0]  ;;  %v5134_v60 = vld [vmem:[#allocation15 + $0x108] sm:$0xf] }
  0x67   : > { %v738_v10 = vsub.f32 1.0, %v737_v9  ;;  %v5187_v57 = vor.u32 %v5805_v55, %v5184_v56  ;;  %v5039_v61 = vor.u32 %v5770_v59, %v5038_v58  ;;  %v5794_v62 = vld [vmem:[#allocation15 + $0x110] sm:$0xf0]  ;;  %v5076_v0 = vld [vmem:[#allocation15 + $0x9c] sm:$0xf0]  ;;  %p5192_p3 = scmp.ne.s32.totalorder %s6637_s0, 0 }
  0x68   : > { %1145 = vmatpush.bf16.msra.mxu2 %v5091_v54  ;;  %v5778_v63 = vld [vmem:[#allocation15 + $0x94] sm:$0xf]  ;;  %v5026_v6 = vld [vmem:[#allocation15 + $0x30] sm:$0xf]  ;;  %v5767_v7 = vld [vmem:[#allocation15 + $0x38] sm:$0xf0] }
  0x69   : > { %v739_v25 = vmul.f32 %v6121_v8, %v738_v10  ;;  %1119 = vmatpush.bf16.msra.mxu0 %v5063_v28  ;;  %1159 = vmatpush.bf16.msra.mxu3 %v5187_v57  ;;  %v5802_v3 = vld [vmem:[#allocation15 + $0x154] sm:$0xf]  ;;  %v5027_v9 = vor.u32 %v5767_v7, %v5026_v6  ;;  %v5791_v10 = vld [vmem:[#allocation15 + $0xf8] sm:$0xf0]  ;;  %v5064_v12 = vld [vmem:[#allocation15 + $0x84] sm:$0xf0] }
  0x6a   : > { %1133 = vmatpush.bf16.msra.mxu1 %v5159_v29  ;;  %v5775_v11 = vld [vmem:[#allocation15 + $0x7c] sm:$0xf]  ;;  %v5160_v16 = vld [vmem:[#allocation15 + $0x144] sm:$0xf0]  ;;  %v5014_v18 = vld [vmem:[#allocation15 + $0x18] sm:$0xf] }
  0x6b   : > { %v740_v30 = vadd.f32 %v6121_v8, %v739_v25  ;;  %v5067_v14 = vor.u32 %v5775_v11, %v5064_v12  ;;  %v5799_v15 = vld [vmem:[#allocation15 + $0x13c] sm:$0xf]  ;;  %v5764_v19 = vld [vmem:[#allocation15 + $0x20] sm:$0xf0]  ;;  %v5110_v20 = vld [vmem:[#allocation15 + $0xd8] sm:$0xf] }
  0x6c   : > { %v5163_v17 = vor.u32 %v5799_v15, %v5160_v16  ;;  %v5015_v21 = vor.u32 %v5764_v19, %v5014_v18  ;;  %v5788_v22 = vld [vmem:[#allocation15 + $0xe0] sm:$0xf0]  ;;  %v5052_v24 = vld [vmem:[#allocation15 + $0x6c] sm:$0xf0]  ;;  %v5783_v48 = vld [vmem:[#allocation15 + $0xb8] sm:$0xf0] }
  0x6d   : > { %v6934_v31 = vsel %vm741_vm0, %v6121_v8, %v740_v30  ;;  %1120 = vmatpush.bf16.msra.mxu0 %v5051_v49  ;;  %v5122_v8 = vld [vmem:[#allocation15 + $0xf0] sm:$0xf]  ;;  %v5772_v23 = vld [vmem:[#allocation15 + $0x64] sm:$0xf]  ;;  %v5111_v25 = vor.u32 %v5788_v22, %v5110_v20  ;;  %v5002_v30 = vld [vmem:[#allocation15] sm:$0xf] }
  0x6e   : > { %1134 = vmatpush.bf16.msra.mxu1 %v5147_v53  ;;  %v5123_v13 = vor.u32 %v5791_v10, %v5122_v8  ;;  %v5055_v26 = vor.u32 %v5772_v23, %v5052_v24  ;;  %v5796_v27 = vld [vmem:[#allocation15 + $0x124] sm:$0xf]  ;;  %v5148_v28 = vld [vmem:[#allocation15 + $0x12c] sm:$0xf0]  ;;  %v5807_v50 = vld [vmem:[#allocation15 + $0x178] sm:$0xf0] }
  0x6f   : > { %v5151_v29 = vor.u32 %v5796_v27, %v5148_v28  ;;  %v5094_v46 = vld [vmem:[#allocation15 + $0xb0] sm:$0xf]  ;;  %v5766_v53 = vld [vmem:[#allocation15 + $0x34] sm:$0xf]  ;;  %v5028_v54 = vld [vmem:[#allocation15 + $0x3c] sm:$0xf0] }
  0x70   : > { %v5190_v49 = vld [vmem:[#allocation15 + $0x170] sm:$0xf]  ;;  %v5095_v51 = vor.u32 %v5783_v48, %v5094_v46  ;;  %v5790_v55 = vld [vmem:[#allocation15 + $0xf4] sm:$0xf]  ;;  %v5031_v56 = vor.u32 %v5766_v53, %v5028_v54  ;;  %v5124_v57 = vld [vmem:[#allocation15 + $0xfc] sm:$0xf0] }
  0x71   : > { %1121 = vmatpush.bf16.msra.mxu0 %v5039_v61  ;;  %v5191_v52 = vor.u32 %v5807_v50, %v5190_v49  ;;  %v5082_v58 = vld [vmem:[#allocation15 + $0x98] sm:$0xf]  ;;  %v5780_v59 = vld [vmem:[#allocation15 + $0xa0] sm:$0xf0]  ;;  %v5070_v6 = vld [vmem:[#allocation15 + $0x80] sm:$0xf] }
  0x72   : > { %v5083_v61 = vor.u32 %v5780_v59, %v5082_v58  ;;  %v5777_v7 = vld [vmem:[#allocation15 + $0x88] sm:$0xf0]  ;;  %v5166_v10 = vld [vmem:[#allocation15 + $0x140] sm:$0xf]  ;;  %v5784_v15 = vld [vmem:[#allocation15 + $0xc4] sm:$0xf] }
  0x73   : > { %v5801_v11 = vld [vmem:[#allocation15 + $0x148] sm:$0xf0]  ;;  %v5058_v18 = vld [vmem:[#allocation15 + $0x68] sm:$0xf]  ;;  %v5774_v19 = vld [vmem:[#allocation15 + $0x70] sm:$0xf0] }
  0x74   : > { %v5167_v12 = vor.u32 %v5801_v11, %v5166_v10  ;;  %v5154_v22 = vld [vmem:[#allocation15 + $0x128] sm:$0xf]  ;;  %v5798_v23 = vld [vmem:[#allocation15 + $0x130] sm:$0xf0]  ;;  %v5046_v27 = vld [vmem:[#allocation15 + $0x50] sm:$0xf] }
  0x75   : > { %1122 = vmatpush.bf16.msra.mxu0 %v5027_v9  ;;  %v5071_v9 = vor.u32 %v5777_v7, %v5070_v6  ;;  %v5155_v24 = vor.u32 %v5798_v23, %v5154_v22  ;;  %v5771_v28 = vld [vmem:[#allocation15 + $0x58] sm:$0xf0]  ;;  %v5765_v46 = vld [vmem:[#allocation15 + $0x28] sm:$0xf0]  ;;  %v5010_v53 = vld [vmem:[#allocation15 + $0x8] sm:$0xf] }
  0x76   : > { %v5789_v48 = vld [vmem:[#allocation15 + $0xe8] sm:$0xf0]  ;;  %v5762_v54 = vld [vmem:[#allocation15 + $0x10] sm:$0xf0] }
  0x77   : > { %v5786_v58 = vld [vmem:[#allocation15 + $0xd0] sm:$0xf0] }
  0x79   : > { %1123 = vmatpush.bf16.msra.mxu0 %v5015_v21  ;;  %v5059_v21 = vor.u32 %v5774_v19, %v5058_v18 }
  0xd1   : > { %v732_v32 = vpop.xlane.xlu0 %731 }
  0xd2   : > { %v743_v33 = vmul.f32 %v6934_v31, %v732_v32  ;;  %v5761_v32 = vld [vmem:[#allocation15 + $0x8] sm:$0xf0] }
  0xd4   : > { %v6937_v34 = vsub.f32 %v726_v1, %v743_v33  ;;  %v6939_v35 = vsub.f32 %v727_v2, %v743_v33  ;;  %v5135_v1 = vor.u32 %v5794_v62, %v5134_v60  ;;  %v5079_v2 = vor.u32 %v5778_v63, %v5076_v0  ;;  %v5098_v33 = vld [vmem:[#allocation15 + $0xc0] sm:$0xf]  ;;  %v5178_v62 = vld [vmem:[#allocation15 + $0x158] sm:$0xf]  ;;  %v5804_v63 = vld [vmem:[#allocation15 + $0x160] sm:$0xf0] }
  0xd5   : > { %v5127_v60 = vor.u32 %v5790_v55, %v5124_v57  ;;  %v5179_v0 = vor.u32 %v5804_v63, %v5178_v62  ;;  %v5106_v57 = vld [vmem:[#allocation15 + $0xc8] sm:$0xf] }
  0xd6   : > { %v749_v36 = vmul.f32 %v6937_v34, %v6937_v34  ;;  %v750_v37 = vmul.f32 %v6939_v35, %v6939_v35  ;;  %1135 = vmatpush.bf16.msra.mxu1 %v5135_v1  ;;  %1146 = vmatpush.bf16.msra.mxu2 %v5079_v2  ;;  %v5763_v1 = vld [vmem:[#allocation15 + $0x1c] sm:$0xf]  ;;  %v5016_v2 = vld [vmem:[#allocation15 + $0x24] sm:$0xf0]  ;;  %v5107_v62 = vor.u32 %v5786_v58, %v5106_v57 }
  0xd8   : > { %v753_v38 = vadd.f32 %v750_v37, %v749_v36  ;;  %v5003_v36 = vor.u32 %v5761_v32, %v5002_v30  ;;  %v5785_v37 = vld [vmem:[#allocation15 + $0xc8] sm:$0xf0]  ;;  %v5047_v32 = vor.u32 %v5771_v28, %v5046_v27 }
  0xd9   : > { %v735_v39 = vpop.xlane.xlu0 %734 }
  0xda   : > { %v744_v40 = vmul.f32 %v6934_v31, %v735_v39  ;;  %754 = vadd.xlane.f32.xlu1 %v753_v38  ;;  %1136 = vmatpush.bf16.msra.mxu1 %v5123_v13  ;;  %v5769_v38 = vld [vmem:[#allocation15 + $0x4c] sm:$0xf]  ;;  %v5040_v39 = vld [vmem:[#allocation15 + $0x54] sm:$0xf0]  ;;  %v5760_v13 = vld [vmem:[#allocation15 + $0x4] sm:$0xf] }
  0xdb   : > { %1147 = vmatpush.bf16.msra.mxu2 %v5067_v14  ;;  %1124 = vmatpush.bf16.msra.mxu0 %v5003_v36  ;;  %v5004_v14 = vld [vmem:[#allocation15 + $0xc] sm:$0xf0] }
  0xdc   : > { %v6946_v41 = vsub.f32 %v728_v4, %v744_v40  ;;  %v6948_v42 = vsub.f32 %v729_v5, %v744_v40  ;;  %v5172_v4 = vld [vmem:[#allocation15 + $0x15c] sm:$0xf0]  ;;  %v5099_v40 = vor.u32 %v5785_v37, %v5098_v33  ;;  %v5007_v16 = vor.u32 %v5760_v13, %v5004_v14  ;;  %v5795_v33 = vld [vmem:[#allocation15 + $0x118] sm:$0xf0]  ;;  %v5034_v37 = vld [vmem:[#allocation15 + $0x38] sm:$0xf] }
  0xdd   : > { %v5175_v5 = vor.u32 %v5802_v3, %v5172_v4  ;;  %v5787_v3 = vld [vmem:[#allocation15 + $0xdc] sm:$0xf]  ;;  %v5019_v4 = vor.u32 %v5763_v1, %v5016_v2 }
  0xde   : > { %v751_v43 = vmul.f32 %v6946_v41, %v6946_v41  ;;  %v752_v44 = vmul.f32 %v6948_v42, %v6948_v42  ;;  %1137 = vmatpush.bf16.msra.mxu1 %v5111_v25 }
  0xdf   : > { %1160 = vmatpush.bf16.msra.mxu3 %v5175_v5  ;;  %1148 = vmatpush.bf16.msra.mxu2 %v5055_v26  ;;  %v5112_v5 = vld [vmem:[#allocation15 + $0xe4] sm:$0xf0] }
  0xe0   : > { %v756_v45 = vadd.f32 %v752_v44, %v751_v43  ;;  %v5043_v43 = vor.u32 %v5769_v38, %v5040_v39  ;;  %v5793_v44 = vld [vmem:[#allocation15 + $0x10c] sm:$0xf]  ;;  %1173 = vmatpush.bf16.msrb.mxu0 %v5095_v51  ;;  %v5115_v8 = vor.u32 %v5787_v3, %v5112_v5  ;;  %v5768_v38 = vld [vmem:[#allocation15 + $0x40] sm:$0xf0]  ;;  %v5130_v39 = vld [vmem:[#allocation15 + $0xf8] sm:$0xf] }
  0xe2   : > { %757 = vadd.xlane.f32.xlu1 %v756_v45  ;;  %v5136_v45 = vld [vmem:[#allocation15 + $0x114] sm:$0xf0]  ;;  %1138 = vmatpush.bf16.msra.mxu1 %v5099_v40  ;;  %v5792_v40 = vld [vmem:[#allocation15 + $0x100] sm:$0xf0] }
  0xe3   : > { %1161 = vmatpush.bf16.msra.mxu3 %v5163_v17  ;;  %v5139_v47 = vor.u32 %v5793_v44, %v5136_v45  ;;  %1149 = vmatpush.bf16.msra.mxu2 %v5043_v43  ;;  %v5100_v17 = vld [vmem:[#allocation15 + $0xcc] sm:$0xf0]  ;;  %v5035_v43 = vor.u32 %v5768_v38, %v5034_v37  ;;  %v5131_v44 = vor.u32 %v5792_v40, %v5130_v39  ;;  %v5022_v45 = vld [vmem:[#allocation15 + $0x20] sm:$0xf] }
  0xe4   : > { %1174 = vmatpush.bf16.msrb.mxu0 %v5083_v61  ;;  %v5103_v20 = vor.u32 %v5784_v15, %v5100_v17  ;;  %v5023_v51 = vor.u32 %v5765_v46, %v5022_v45  ;;  %v5011_v61 = vor.u32 %v5762_v54, %v5010_v53 }
  0xe6   : > { %1187 = vmatpush.bf16.msrb.mxu1 %v5191_v52 }
  0xe7   : > { %1162 = vmatpush.bf16.msra.mxu3 %v5151_v29  ;;  %1150 = vmatpush.bf16.msra.mxu2 %v5031_v56  ;;  %v5142_v29 = vld [vmem:[#allocation15 + $0x110] sm:$0xf] }
  0xe8   : > { %1175 = vmatpush.bf16.msrb.mxu0 %v5071_v9  ;;  %v5143_v36 = vor.u32 %v5795_v33, %v5142_v29 }
  0xea   : > { %1188 = vmatpush.bf16.msrb.mxu1 %v5179_v0 }
  0xeb   : > { %1163 = vmatpush.bf16.msra.mxu3 %v5139_v47  ;;  %1151 = vmatpush.bf16.msra.mxu2 %v5019_v4  ;;  %v5118_v47 = vld [vmem:[#allocation15 + $0xe0] sm:$0xf] }
  0xec   : > { %1176 = vmatpush.bf16.msrb.mxu0 %v5059_v21  ;;  %v5119_v52 = vor.u32 %v5789_v48, %v5118_v47 }
  0xee   : > { %1189 = vmatpush.bf16.msrb.mxu1 %v5167_v12 }
  0xef   : > { %1164 = vmatpush.bf16.msra.mxu3 %v5127_v60  ;;  %1152 = vmatpush.bf16.msra.mxu2 %v5007_v16  ;;  %v853_v16 = vld [vmem:[%s8902_s6] sm:$0x7] }
  0xf0   : > { %1177 = vmatpush.bf16.msrb.mxu0 %v5047_v32  ;;  %v855_v17 = vperm.slane %v853_v16, 0  ;;  %v857_v27 = vperm.slane %v853_v16, 2 }
  0xf2   : > { %1190 = vmatpush.bf16.msrb.mxu1 %v5155_v24 }
  0xf3   : > { %1165 = vmatpush.bf16.msra.mxu3 %v5115_v8 }
  0xf4   : > { %1178 = vmatpush.bf16.msrb.mxu0 %v5035_v43 }
  0xf6   : > { %1191 = vmatpush.bf16.msrb.mxu1 %v5143_v36 }
  0xf7   : > { %1166 = vmatpush.bf16.msra.mxu3 %v5103_v20 }
  0xf8   : > { %1179 = vmatpush.bf16.msrb.mxu0 %v5023_v51 }
  0xfa   : > { %1192 = vmatpush.bf16.msrb.mxu1 %v5131_v44 }
  0xfc   : > { %1180 = vmatpush.bf16.msrb.mxu0 %v5011_v61 }
  0xfe   : > { %1193 = vmatpush.bf16.msrb.mxu1 %v5119_v52 }
 0x102   : > { %1194 = vmatpush.bf16.msrb.mxu1 %v5107_v62 }
 0x14d   : > { %v755_v25 = vpop.xlane.xlu1 %754 }
 0x14e   : > { %v759_v26 = vmul.f32 %v755_v25, %v6934_v31 }
 0x150   : > { %v761_v30 = vadd.f32 1e-05, %v759_v26 }
 0x152   : > { %6122 = vrsqrt.f32 %v761_v30  ;;  %vm769_vm2 = vweird.f32 %v761_v30 }
 0x155   : > { %v758_v49 = vpop.xlane.xlu1 %757 }
 0x156   : > { %v760_v50 = vmul.f32 %v758_v49, %v6934_v31 }
 0x158   : > { %v6123_v55 = vpop.eup %6122  ;;  %v762_v56 = vadd.f32 1e-05, %v760_v50 }
 0x159   : > { %v764_v59 = vmul.f32 %v6123_v55, %v761_v30  ;;  %vm770_vm1 = vweird.f32 %v6123_v55 }
 0x15a   : > { %6124 = vrsqrt.f32 %v762_v56  ;;  %vm771_vm4 = vmor %vm769_vm2, %vm770_vm1  ;;  %vm779_vm5 = vweird.f32 %v762_v56 }
 0x15b   : > { %v765_v60 = vmul.f32 %v6123_v55, %v764_v59 }
 0x15d   : > { %v766_v63 = vmul.f32 0.5, %v765_v60 }
 0x15f   : > { %v767_v1 = vsub.f32 1.5, %v766_v63 }
 0x160   : > { %v6125_v0 = vpop.eup %6124 }
 0x161   : > { %v774_v2 = vmul.f32 %v6125_v0, %v762_v56  ;;  %v768_v4 = vmul.f32 %v6123_v55, %v767_v1  ;;  %vm780_vm3 = vweird.f32 %v6125_v0 }
 0x162   : > { %vm781_vm6 = vmor %vm779_vm5, %vm780_vm3 }
 0x163   : > { %v775_v3 = vmul.f32 %v6125_v0, %v774_v2  ;;  %v772_v8 = vsel %vm771_vm4, %v6123_v55, %v768_v4 }
 0x164   : > { %v783_v10 = vmul.f32 %v772_v8, %v6937_v34  ;;  %v784_v12 = vmul.f32 %v772_v8, %v6939_v35  ;;  %v856_v35 = vperm.slane %v853_v16, 1 }
 0x165   : > { %v776_v5 = vmul.f32 0.5, %v775_v3 }
 0x167   : > { %v777_v6 = vsub.f32 1.5, %v776_v5 }
 0x169   : > { %v778_v7 = vmul.f32 %v6125_v0, %v777_v6 }
 0x16b   : > { %v782_v9 = vsel %vm781_vm6, %v6125_v0, %v778_v7 }
 0x16c   : > { %v785_v11 = vmul.f32 %v782_v9, %v6946_v41  ;;  %v786_v13 = vmul.f32 %v782_v9, %v6948_v42 }
 0x16e   : > { %v787_v14 = vpack.c.bf16 %v785_v11, %v783_v10  ;;  %v788_v15 = vpack.c.bf16 %v786_v13, %v784_v12 }
 0x170   : > { %1125 = vmatmul.bf16.vlgmr.msra.gmra.mxu0 %v787_v14  ;;  %1139 = vmatmul.bf16.vlgmr.msra.gmra.mxu1 %v788_v15 }
 0x171   : > { %1153 = vmatmul.bf16.vlgmr.msra.gmra.mxu2 %v787_v14  ;;  %1167 = vmatmul.bf16.vlgmr.msra.gmra.mxu3 %v788_v15 }
 0x180   : > { %1181 = vmatmul.bf16.vlgmr.msrb.gmra.mxu0 %v787_v14  ;;  %1195 = vmatmul.bf16.vlgmr.msrb.gmra.mxu1 %v788_v15 }
 0x1ed   : > { %v1126_v34 = vpop.f32.mrf.mxu0  ;;  %v1140_v18 = vpop.f32.mrf.mxu1 }
 0x1ee   : > { %v1127_v41 = vadd.f32 %v1126_v34, %v855_v17 }
 0x1f0   : > { %v1141_v19 = vadd.f32 %v1140_v18, %v1127_v41 }
 0x1f2   : > { %1201 = vst [vmem:[#allocation6 + $0x28] sm:$0xff] %v1141_v19 }
 0x1f4   : > { %v1154_v42 = vpop.f32.mrf.mxu2  ;;  %v1168_v20 = vpop.f32.mrf.mxu3 }
 0x1f5   : > { %v1155_v21 = vadd.f32 %v1154_v42, %v856_v35  ;;  %v1128_v22 = vpop.f32.mrf.mxu0  ;;  %v1142_v23 = vpop.f32.mrf.mxu1 }
 0x1f6   : > { %v1129_v24 = vadd.f32 %v1128_v22, %v855_v17 }
 0x1f7   : > { %v1169_v25 = vadd.f32 %v1168_v20, %v1155_v21 }
 0x1f8   : > { %v1143_v26 = vadd.f32 %v1142_v23, %v1129_v24 }
 0x1f9   : > { %1202 = vst [vmem:[#allocation6 + $0x10] sm:$0xff] %v1169_v25 }
 0x1fa   : > { %1204 = vst [vmem:[#allocation6] sm:$0xff] %v1143_v26 }
 0x1fc   : > { %v1156_v28 = vpop.f32.mrf.mxu2  ;;  %v1170_v33 = vpop.f32.mrf.mxu3 }
 0x1fd   : > { %v1157_v29 = vadd.f32 %v1156_v28, %v856_v35  ;;  %v1182_v30 = vpop.f32.mrf.mxu0  ;;  %v1196_v32 = vpop.f32.mrf.mxu1 }
 0x1fe   : > { %v1183_v36 = vadd.f32 %v1182_v30, %v857_v27 }
 0x1ff   : > { %v1171_v37 = vadd.f32 %v1170_v33, %v1157_v29 }
 0x200   : > { %v1197_v38 = vadd.f32 %v1196_v32, %v1183_v36 }
 0x201   : > { %1205 = vst [vmem:[#allocation6 + $0x18] sm:$0xff] %v1171_v37 }
 0x202   : > { %1203 = vst [vmem:[#allocation6 + $0x8] sm:$0xff] %v1197_v38 }
 0x205   : > { %v1184_v39 = vpop.f32.mrf.mxu0  ;;  %v1198_v43 = vpop.f32.mrf.mxu1 }
 0x206   : > { %v1185_v40 = vadd.f32 %v1184_v39, %v857_v27  ;;  %1211 = sbr.rel (%p5192_p3) target bundleno = 922 (0x39a), region = 92 }
 0x208   : > { %v1199_v44 = vadd.f32 %v1198_v43, %v1185_v40 }
 0x20a   : > { %1206 = vst [vmem:[#allocation6 + $0x20] sm:$0xff] %v1199_v44 }
 0x20b   : > { %v1213_v45 = vpack.c.bf16 %v1171_v37, %v1169_v25  ;;  %1281 = vmatpush.msra.mxu1 %v1199_v44  ;;  %v1212_v46 = vpack.c.bf16 %v1143_v26, %v1141_v19  ;;  %v1214_v47 = vlaneseq  ;;  %vm1235_vm8 = vcmask 130048  }
 0x20c   : > { %vm1250_vm9 = vcmask 7168  }
 0x20d   : > { %1224 = vmatpush.bf16.xpose.msra.mxu0 %v1213_v45  ;;  %1282 = vmatpush.msra.mxu1 %v1197_v38  ;;  %v1215_v48 = vand.u32 127, %v1214_v47 }
 0x20f   : > { %vm1216_vm7 = vcmp.lt.s32.totalorder %v1215_v48, 4 }
 0x214   : > { %1225 = vmatmul.bf16.vlgmr.msra.gmra.mxu0 %v1212_v46 }
 0x291   : > { %v1226_v49 = vpop.f32.mrf.mxu0 }
 0x292   : > { %v1233_v50 = vsel %vm1216_vm7, %v1226_v49, -1e+30 }
 0x293   : > { %1236 = vst.msk [vmem:[%s6922_s2] sm:$0xff] %vm1235_vm8, %v1233_v50  ;;  %v1238_v51 = vsel %vm1235_vm8, %v1233_v50, -inf }
 0x294   : > { %1239 = vmax.xlane.f32.xlu0 %v1238_v51 }
 0x299   : > { %v1228_v52 = vpop.f32.mrf.mxu0 }
 0x29a   : > { %v1234_v53 = vsel %vm1216_vm7, %v1228_v52, -1e+30 }
 0x29b   : > { %1237 = vst.msk [vmem:[%s6922_s2 + $0x8] sm:$0xff] %vm1235_vm8, %v1234_v53  ;;  %v1241_v54 = vsel %vm1235_vm8, %v1234_v53, -inf }
 0x29c   : > { %1242 = vmax.xlane.f32.xlu0 %v1241_v54 }
 0x307   : > { %v1240_v55 = vpop.xlane.xlu0 %1239 }
 0x308   : > { %v1244_v56 = vsub.f32 %v1233_v50, %v1240_v55  ;;  %1251 = vst.msk [vmem:[#allocation2] sm:$0xff] %vm1250_vm9, %v1240_v55 }
 0x30a   : > { %v1246_v57 = vmul.f32 1.442695, %v1244_v56 }
 0x30c   : > { %6126 = vpow2.f32 %v1246_v57 }
 0x30f   : > { %v1243_v58 = vpop.xlane.xlu0 %1242 }
 0x310   : > { %v1245_v59 = vsub.f32 %v1234_v53, %v1243_v58  ;;  %1252 = vst.msk [vmem:[#allocation2 + $0x8] sm:$0xff] %vm1250_vm9, %v1243_v58 }
 0x312   : > { %v6127_v60 = vpop.eup %6126  ;;  %v1248_v61 = vmul.f32 1.442695, %v1245_v59 }
 0x313   : > { %5193 = vmatmul.msk.f32.vlgmr.msra.gmra.mxu1 %vm1235_vm8, %v6127_v60  ;;  %v1253_v62 = vsel %vm1235_vm8, %v6127_v60, 0.0 }
 0x314   : > { %6128 = vpow2.f32 %v1248_v61  ;;  %1254 = vadd.xlane.f32.xlu1 %v1253_v62 }
 0x31a   : > { %v6129_v63 = vpop.eup %6128 }
 0x31b   : > { %5194 = vmatmul.msk.f32.gmra.mxu1 %vm1235_vm8, %v6129_v63  ;;  %v1256_v0 = vsel %vm1235_vm8, %v6129_v63, 0.0 }
 0x31c   : > { %1257 = vadd.xlane.f32.xlu1 %v1256_v0 }
 0x387   : > { %v1255_v1 = vpop.xlane.xlu1 %1254 }
 0x388   : > { %1259 = vst.msk [vmem:[#allocation3] sm:$0xff] %vm1250_vm9, %v1255_v1 }
 0x38f   : > { %v1258_v2 = vpop.xlane.xlu1 %1257 }
 0x390   : > { %1260 = vst.msk [vmem:[#allocation3 + $0x8] sm:$0xff] %vm1250_vm9, %v1258_v2  ;;  %v1284_v3 = vpop.f32.mrf.mxu1 }
 0x391   : > { %1290 = vst [vmem:[#allocation4] sm:$0xff] %v1284_v3 }
 0x398   : > { %v1287_v4 = vpop.f32.mrf.mxu1 }
 0x399   : > { %1291 = vst [vmem:[#allocation4 + $0x8] sm:$0xff] %v1287_v4 }
 0x39a PF: > { %p5195_p8 = scmp.eq.s32.totalorder %s6637_s0, 0 }
 0x39c   : > { %1295 = sbr.rel (%p5195_p8) target bundleno = 936 (0x3a8), region = 96 }
 0x3a1   : > { %vm1296_vm10 = vcmask 7168   ;;  %v6662_v5 = vmov -1e+30   ;;  %v6663_v6 = vmov 0.0  }
 0x3a2   : > { %1297 = vst.msk [vmem:[#allocation2] sm:$0xff] %vm1296_vm10, %v6662_v5 }
 0x3a3   : > { %1298 = vst.msk [vmem:[#allocation2 + $0x8] sm:$0xff] %vm1296_vm10, %v6662_v5 }
 0x3a4   : > { %1299 = vst.msk [vmem:[#allocation3] sm:$0xff] %vm1296_vm10, %v6663_v6 }
 0x3a5   : > { %1300 = vst.msk [vmem:[#allocation3 + $0x8] sm:$0xff] %vm1296_vm10, %v6663_v6 }
 0x3a6   : > { %1301 = vst [vmem:[#allocation4] sm:$0xff] %v6663_v6 }
 0x3a7   : > { %1302 = vst [vmem:[#allocation4 + $0x8] sm:$0xff] %v6663_v6 }
 0x3a8 PF: > { %v5350_v7 = vld [vmem:[#allocation14 + $0x70] sm:$0xf]  ;;  %v5847_v8 = vld [vmem:[#allocation14 + $0x74] sm:$0xf0]  ;;  %v5342_v12 = vld [vmem:[#allocation14 + $0x60] sm:$0xf] }
 0x3a9   : > { %v5414_v9 = vld [vmem:[#allocation14 + $0xf0] sm:$0xf]  ;;  %v5351_v10 = vor.u32 %v5847_v8, %v5350_v7  ;;  %v5863_v11 = vld [vmem:[#allocation14 + $0xf4] sm:$0xf0]  ;;  %v5845_v13 = vld [vmem:[#allocation14 + $0x64] sm:$0xf0] }
 0x3aa   : > { %v5415_v14 = vor.u32 %v5863_v11, %v5414_v9  ;;  %v5406_v15 = vld [vmem:[#allocation14 + $0xe0] sm:$0xf]  ;;  %v5861_v16 = vld [vmem:[#allocation14 + $0xe4] sm:$0xf0]  ;;  %v5343_v17 = vor.u32 %v5845_v13, %v5342_v12  ;;  %v5334_v18 = vld [vmem:[#allocation14 + $0x50] sm:$0xf] }
 0x3ab   : > { %1766 = vmatpush.bf16.msra.mxu0 %v5351_v10  ;;  %v5407_v34 = vor.u32 %v5861_v16, %v5406_v15  ;;  %v5843_v41 = vld [vmem:[#allocation14 + $0x54] sm:$0xf0]  ;;  %v5398_v19 = vld [vmem:[#allocation14 + $0xd0] sm:$0xf]  ;;  %v5326_v21 = vld [vmem:[#allocation14 + $0x40] sm:$0xf] }
 0x3ac   : > { %5955 = vmatpush.bf16.msra.mxu2 %v5415_v14  ;;  %1815 = vmatpush.bf16.msra.mxu1 %v5415_v14  ;;  %v5859_v35 = vld [vmem:[#allocation14 + $0xd4] sm:$0xf0]  ;;  %v5335_v42 = vor.u32 %v5843_v41, %v5334_v18  ;;  %v5841_v22 = vld [vmem:[#allocation14 + $0x44] sm:$0xf0]  ;;  %v5390_v23 = vld [vmem:[#allocation14 + $0xc0] sm:$0xf] }
 0x3ad   : > { %v5399_v20 = vor.u32 %v5859_v35, %v5398_v19  ;;  %v5857_v24 = vld [vmem:[#allocation14 + $0xc4] sm:$0xf0]  ;;  %v5327_v25 = vor.u32 %v5841_v22, %v5326_v21  ;;  %v5318_v27 = vld [vmem:[#allocation14 + $0x30] sm:$0xf]  ;;  %v5839_v28 = vld [vmem:[#allocation14 + $0x34] sm:$0xf0] }
 0x3ae   : > { %v5391_v26 = vor.u32 %v5857_v24, %v5390_v23  ;;  %v5382_v29 = vld [vmem:[#allocation14 + $0xb0] sm:$0xf]  ;;  %v5855_v30 = vld [vmem:[#allocation14 + $0xb4] sm:$0xf0]  ;;  %v5319_v32 = vor.u32 %v5839_v28, %v5318_v27  ;;  %v5310_v36 = vld [vmem:[#allocation14 + $0x20] sm:$0xf] }
 0x3af   : > { %1767 = vmatpush.bf16.msra.mxu0 %v5343_v17  ;;  %v5383_v33 = vor.u32 %v5855_v30, %v5382_v29  ;;  %v5837_v37 = vld [vmem:[#allocation14 + $0x24] sm:$0xf0]  ;;  %v5374_v38 = vld [vmem:[#allocation14 + $0xa0] sm:$0xf]  ;;  %v5302_v44 = vld [vmem:[#allocation14 + $0x10] sm:$0xf] }
 0x3b0   : > { %5956 = vmatpush.bf16.msra.mxu2 %v5407_v34  ;;  %1816 = vmatpush.bf16.msra.mxu1 %v5407_v34  ;;  %v5853_v39 = vld [vmem:[#allocation14 + $0xa4] sm:$0xf0]  ;;  %v5311_v40 = vor.u32 %v5837_v37, %v5310_v36  ;;  %v5835_v45 = vld [vmem:[#allocation14 + $0x14] sm:$0xf0]  ;;  %v5366_v46 = vld [vmem:[#allocation14 + $0x90] sm:$0xf] }
 0x3b1   : > { %v5375_v43 = vor.u32 %v5853_v39, %v5374_v38  ;;  %v5851_v47 = vld [vmem:[#allocation14 + $0x94] sm:$0xf0]  ;;  %v5303_v48 = vor.u32 %v5835_v45, %v5302_v44  ;;  %v5294_v50 = vld [vmem:[#allocation14] sm:$0xf]  ;;  %v5833_v51 = vld [vmem:[#allocation14 + $0x4] sm:$0xf0] }
 0x3b2   : > { %v5367_v49 = vor.u32 %v5851_v47, %v5366_v46  ;;  %v5358_v52 = vld [vmem:[#allocation14 + $0x80] sm:$0xf]  ;;  %v5849_v53 = vld [vmem:[#allocation14 + $0x84] sm:$0xf0]  ;;  %v5478_v54 = vld [vmem:[#allocation14 + $0x170] sm:$0xf]  ;;  %v5295_v56 = vor.u32 %v5833_v51, %v5294_v50 }
 0x3b3   : > { %1768 = vmatpush.bf16.msra.mxu0 %v5335_v42  ;;  %v5879_v55 = vld [vmem:[#allocation14 + $0x174] sm:$0xf0]  ;;  %v5198_v57 = vld [vmem:[%s6894_s13] sm:$0xf]  ;;  %v5809_v58 = vld [vmem:[%s6894_s13 + $0x8] sm:$0xf0]  ;;  %v5359_v60 = vor.u32 %v5849_v53, %v5358_v52 }
 0x3b4   : > { %5957 = vmatpush.bf16.msra.mxu2 %v5399_v20  ;;  %1817 = vmatpush.bf16.msra.mxu1 %v5399_v20  ;;  %v5826_v59 = vld [vmem:[%s6894_s13 + $0x94] sm:$0xf]  ;;  %v5272_v61 = vld [vmem:[%s6894_s13 + $0x9c] sm:$0xf0]  ;;  %v5808_v62 = vld [vmem:[%s6894_s13 + $0x4] sm:$0xf]  ;;  %v5479_v0 = vor.u32 %v5879_v55, %v5478_v54  ;;  %v6992_v1 = vor.u32 %v5809_v58, %v5198_v57 }
 0x3b5   : > { %v5200_v63 = vld [vmem:[%s6894_s13 + $0xc] sm:$0xf0]  ;;  %v5470_v2 = vld [vmem:[#allocation14 + $0x160] sm:$0xf]  ;;  %v5877_v3 = vld [vmem:[#allocation14 + $0x164] sm:$0xf0]  ;;  %v6994_v4 = vor.u32 %v5826_v59, %v5272_v61 }
 0x3b6   : > { %v6996_v5 = vor.u32 %v5808_v62, %v5200_v63  ;;  %v5471_v6 = vor.u32 %v5877_v3, %v5470_v2  ;;  %v5462_v7 = vld [vmem:[#allocation14 + $0x150] sm:$0xf]  ;;  %v5875_v8 = vld [vmem:[#allocation14 + $0x154] sm:$0xf0]  ;;  %v5454_v10 = vld [vmem:[#allocation14 + $0x140] sm:$0xf] }
 0x3b7   : > { %1769 = vmatpush.bf16.msra.mxu0 %v5327_v25  ;;  %v5463_v9 = vor.u32 %v5875_v8, %v5462_v7  ;;  %v5873_v11 = vld [vmem:[#allocation14 + $0x144] sm:$0xf0]  ;;  %v5446_v13 = vld [vmem:[#allocation14 + $0x130] sm:$0xf]  ;;  %v5871_v14 = vld [vmem:[#allocation14 + $0x134] sm:$0xf0] }
 0x3b8   : > { %5958 = vmatpush.bf16.msra.mxu2 %v5391_v26  ;;  %1818 = vmatpush.bf16.msra.mxu1 %v5391_v26  ;;  %v5455_v12 = vor.u32 %v5873_v11, %v5454_v10  ;;  %v5210_v15 = vld [vmem:[%s6894_s13 + $0x18] sm:$0xf]  ;;  %v5812_v16 = vld [vmem:[%s6894_s13 + $0x20] sm:$0xf0]  ;;  %v5829_v17 = vld [vmem:[%s6894_s13 + $0xac] sm:$0xf]  ;;  %v5447_v19 = vor.u32 %v5871_v14, %v5446_v13 }
 0x3b9   : > { %v5284_v34 = vld [vmem:[%s6894_s13 + $0xb4] sm:$0xf0]  ;;  %v5811_v18 = vld [vmem:[%s6894_s13 + $0x1c] sm:$0xf]  ;;  %v5212_v41 = vld [vmem:[%s6894_s13 + $0x24] sm:$0xf0]  ;;  %v7007_v35 = vor.u32 %v5812_v16, %v5210_v15 }
 0x3ba   : > { %v5438_v42 = vld [vmem:[#allocation14 + $0x120] sm:$0xf]  ;;  %v5869_v20 = vld [vmem:[#allocation14 + $0x124] sm:$0xf0]  ;;  %v7009_v21 = vor.u32 %v5829_v17, %v5284_v34  ;;  %v7011_v22 = vor.u32 %v5811_v18, %v5212_v41  ;;  %v5430_v24 = vld [vmem:[#allocation14 + $0x110] sm:$0xf] }
 0x3bb   : > { %1770 = vmatpush.bf16.msra.mxu0 %v5319_v32  ;;  %v5439_v23 = vor.u32 %v5869_v20, %v5438_v42  ;;  %v5867_v25 = vld [vmem:[#allocation14 + $0x114] sm:$0xf0]  ;;  %v5422_v27 = vld [vmem:[#allocation14 + $0x100] sm:$0xf]  ;;  %v5865_v28 = vld [vmem:[#allocation14 + $0x104] sm:$0xf0] }
 0x3bc   : > { %5959 = vmatpush.bf16.msra.mxu2 %v5383_v33  ;;  %1819 = vmatpush.bf16.msra.mxu1 %v5383_v33  ;;  %v5431_v26 = vor.u32 %v5867_v25, %v5430_v24  ;;  %v5423_v29 = vor.u32 %v5865_v28, %v5422_v27  ;;  %v5222_v30 = vld [vmem:[%s6894_s13 + $0x30] sm:$0xf]  ;;  %v5815_v32 = vld [vmem:[%s6894_s13 + $0x38] sm:$0xf0]  ;;  %v5206_v33 = vld [vmem:[%s6894_s13 + $0x8] sm:$0xf] }
 0x3bd   : > { %v5810_v36 = vld [vmem:[%s6894_s13 + $0x10] sm:$0xf0]  ;;  %v5224_v38 = vld [vmem:[%s6894_s13 + $0x3c] sm:$0xf0]  ;;  %v7022_v39 = vor.u32 %v5815_v32, %v5222_v30  ;;  %v5416_v45 = vld [vmem:[#allocation14 + $0xf8] sm:$0xf0] }
 0x3be   : > { %v5814_v37 = vld [vmem:[%s6894_s13 + $0x34] sm:$0xf]  ;;  %v5234_v47 = vld [vmem:[%s6894_s13 + $0x48] sm:$0xf]  ;;  %v5813_v50 = vld [vmem:[%s6894_s13 + $0x28] sm:$0xf0] }
 0x3bf   : > { %1771 = vmatpush.bf16.msra.mxu0 %v5311_v40  ;;  %v7024_v40 = vor.u32 %v5810_v36, %v5206_v33  ;;  %v5862_v44 = vld [vmem:[#allocation14 + $0xf4] sm:$0xf]  ;;  %v5817_v51 = vld [vmem:[%s6894_s13 + $0x4c] sm:$0xf]  ;;  %v5236_v52 = vld [vmem:[%s6894_s13 + $0x54] sm:$0xf0] }
 0x3c0   : > { %5960 = vmatpush.bf16.msra.mxu2 %v5375_v43  ;;  %1820 = vmatpush.bf16.msra.mxu1 %v5375_v43  ;;  %v7026_v43 = vor.u32 %v5814_v37, %v5224_v38  ;;  %v5419_v46 = vor.u32 %v5862_v44, %v5416_v45  ;;  %v7041_v55 = vor.u32 %v5817_v51, %v5236_v52  ;;  %v5352_v57 = vld [vmem:[#allocation14 + $0x78] sm:$0xf0]  ;;  %v5860_v59 = vld [vmem:[#allocation14 + $0xe4] sm:$0xf]  ;;  %v5344_v63 = vld [vmem:[#allocation14 + $0x68] sm:$0xf0] }
 0x3c1   : > { %v5844_v61 = vld [vmem:[#allocation14 + $0x64] sm:$0xf]  ;;  %v5336_v3 = vld [vmem:[#allocation14 + $0x58] sm:$0xf0]  ;;  %v5472_v10 = vld [vmem:[#allocation14 + $0x168] sm:$0xf0] }
 0x3c2   : > { %v5347_v2 = vor.u32 %v5844_v61, %v5344_v63  ;;  %v5480_v7 = vld [vmem:[#allocation14 + $0x178] sm:$0xf0]  ;;  %v5840_v13 = vld [vmem:[#allocation14 + $0x44] sm:$0xf]  ;;  %v5328_v14 = vld [vmem:[#allocation14 + $0x48] sm:$0xf0] }
 0x3c3   : > { %1772 = vmatpush.bf16.msra.mxu0 %v5303_v48  ;;  %v5818_v48 = vld [vmem:[%s6894_s13 + $0x50] sm:$0xf0]  ;;  %v5246_v15 = vld [vmem:[%s6894_s13 + $0x60] sm:$0xf]  ;;  %v5821_v16 = vld [vmem:[%s6894_s13 + $0x68] sm:$0xf0] }
 0x3c4   : > { %5961 = vmatpush.bf16.msra.mxu2 %v5367_v49  ;;  %1821 = vmatpush.bf16.msra.mxu1 %v5367_v49  ;;  %v5218_v49 = vld [vmem:[%s6894_s13 + $0x20] sm:$0xf]  ;;  %v7037_v53 = vor.u32 %v5818_v48, %v5234_v47  ;;  %v5230_v17 = vld [vmem:[%s6894_s13 + $0x38] sm:$0xf]  ;;  %v5816_v34 = vld [vmem:[%s6894_s13 + $0x40] sm:$0xf0]  ;;  %v7052_v42 = vor.u32 %v5821_v16, %v5246_v15 }
 0x3c5   : > { %v7039_v54 = vor.u32 %v5813_v50, %v5218_v49  ;;  %v5820_v18 = vld [vmem:[%s6894_s13 + $0x64] sm:$0xf]  ;;  %v5248_v41 = vld [vmem:[%s6894_s13 + $0x6c] sm:$0xf0]  ;;  %v7054_v20 = vor.u32 %v5816_v34, %v5230_v17  ;;  %v5838_v24 = vld [vmem:[#allocation14 + $0x34] sm:$0xf] }
 0x3c6   : > { %v5320_v25 = vld [vmem:[#allocation14 + $0x38] sm:$0xf0]  ;;  %v5858_v27 = vld [vmem:[#allocation14 + $0xd4] sm:$0xf]  ;;  %v5836_v33 = vld [vmem:[#allocation14 + $0x24] sm:$0xf] }
 0x3c7   : > { %1773 = vmatpush.bf16.msra.mxu0 %v5295_v56  ;;  %v5846_v56 = vld [vmem:[#allocation14 + $0x74] sm:$0xf]  ;;  %v5400_v28 = vld [vmem:[#allocation14 + $0xd8] sm:$0xf0]  ;;  %v5312_v36 = vld [vmem:[#allocation14 + $0x28] sm:$0xf0] }
 0x3c8   : > { %5962 = vmatpush.bf16.msra.mxu2 %v5359_v60  ;;  %1822 = vmatpush.bf16.msra.mxu1 %v5359_v60  ;;  %v5355_v58 = vor.u32 %v5846_v56, %v5352_v57  ;;  %v5408_v60 = vld [vmem:[#allocation14 + $0xe8] sm:$0xf0]  ;;  %v5403_v30 = vor.u32 %v5858_v27, %v5400_v28  ;;  %v5464_v32 = vld [vmem:[#allocation14 + $0x158] sm:$0xf0]  ;;  %v5315_v38 = vor.u32 %v5836_v33, %v5312_v36  ;;  %v5872_v44 = vld [vmem:[#allocation14 + $0x144] sm:$0xf] }
 0x3c9   : > { %v5411_v62 = vor.u32 %v5860_v59, %v5408_v60  ;;  %v5456_v45 = vld [vmem:[#allocation14 + $0x148] sm:$0xf0]  ;;  %v5304_v47 = vld [vmem:[#allocation14 + $0x18] sm:$0xf0]  ;;  %v5856_v49 = vld [vmem:[#allocation14 + $0xc4] sm:$0xf] }
 0x3ca   : > { %1774 = vmatmul.bf16.vlgmr.msra.gmra.mxu0 %v6992_v1  ;;  %1913 = vmatpush.bf16.msra.mxu3 %v5355_v58  ;;  %v5459_v48 = vor.u32 %v5872_v44, %v5456_v45  ;;  %v5870_v51 = vld [vmem:[#allocation14 + $0x134] sm:$0xf]  ;;  %v5448_v52 = vld [vmem:[#allocation14 + $0x138] sm:$0xf0]  ;;  %v5392_v56 = vld [vmem:[#allocation14 + $0xc8] sm:$0xf0] }
 0x3cb   : > { %1853 = vmatmul.bf16.vlgmr.msra.gmra.mxu2 %v6994_v4  ;;  %1823 = vmatmul.bf16.vlgmr.msra.gmra.mxu1 %v6996_v5  ;;  %v5832_v57 = vld [vmem:[#allocation14 + $0x4] sm:$0xf]  ;;  %v5296_v58 = vld [vmem:[#allocation14 + $0x8] sm:$0xf0]  ;;  %v5395_v59 = vor.u32 %v5856_v49, %v5392_v56  ;;  %v5258_v60 = vld [vmem:[%s6894_s13 + $0x78] sm:$0xf]  ;;  %v5451_v63 = vor.u32 %v5870_v51, %v5448_v52 }
 0x3cc   : > { %1864 = vmatpush.bf16.msrb.mxu2 %v5479_v0  ;;  %1962 = vmatpush.bf16.msrb.mxu0 %v5419_v46  ;;  %v5842_v0 = vld [vmem:[#allocation14 + $0x54] sm:$0xf]  ;;  %v5824_v61 = vld [vmem:[%s6894_s13 + $0x80] sm:$0xf0]  ;;  %v5432_v17 = vld [vmem:[#allocation14 + $0x118] sm:$0xf0] }
 0x3cd   : > { %v5339_v11 = vor.u32 %v5842_v0, %v5336_v3  ;;  %v5834_v46 = vld [vmem:[#allocation14 + $0x14] sm:$0xf]  ;;  %v5819_v0 = vld [vmem:[%s6894_s13 + $0x58] sm:$0xf0]  ;;  %v5260_v3 = vld [vmem:[%s6894_s13 + $0x84] sm:$0xf0] }
 0x3ce   : > { %1914 = vmatpush.bf16.msra.mxu3 %v5347_v2  ;;  %v5307_v50 = vor.u32 %v5834_v46, %v5304_v47  ;;  %v5823_v2 = vld [vmem:[%s6894_s13 + $0x7c] sm:$0xf]  ;;  %v5866_v16 = vld [vmem:[#allocation14 + $0x114] sm:$0xf]  ;;  %v5852_v34 = vld [vmem:[#allocation14 + $0xa4] sm:$0xf] }
 0x3cf   : > { %v5368_v27 = vld [vmem:[#allocation14 + $0x98] sm:$0xf0]  ;;  %v5254_v33 = vld [vmem:[%s6894_s13 + $0x68] sm:$0xf]  ;;  %v5848_v36 = vld [vmem:[#allocation14 + $0x84] sm:$0xf] }
 0x3d0   : > { %1865 = vmatpush.bf16.msrb.mxu2 %v5471_v6  ;;  %v5878_v6 = vld [vmem:[#allocation14 + $0x174] sm:$0xf]  ;;  %1963 = vmatpush.bf16.msrb.mxu0 %v5411_v62  ;;  %v5242_v62 = vld [vmem:[%s6894_s13 + $0x50] sm:$0xf]  ;;  %v5282_v46 = vld [vmem:[%s6894_s13 + $0xa8] sm:$0xf] }
 0x3d1   : > { %v5483_v8 = vor.u32 %v5878_v6, %v5480_v7  ;;  %v5299_v6 = vor.u32 %v5832_v57, %v5296_v58  ;;  %v5868_v7 = vld [vmem:[#allocation14 + $0x124] sm:$0xf]  ;;  %v5830_v47 = vld [vmem:[%s6894_s13 + $0xb0] sm:$0xf0]  ;;  %v5825_v49 = vld [vmem:[%s6894_s13 + $0x88] sm:$0xf0] }
 0x3d2   : > { %1915 = vmatpush.bf16.msra.mxu3 %v5339_v11  ;;  %v7071_v11 = vor.u32 %v5823_v2, %v5260_v3  ;;  %s8903_s4 = sld [smem:[#allocation39_spill]]  ;;  %v5828_v56 = vld [vmem:[%s6894_s13 + $0xa0] sm:$0xf0]  ;;  %v5831_v2 = vld [vmem:[%s6894_s13 + $0xb8] sm:$0xf0]  ;;  %s5676_s12 = sshll.u32 %s6637_s0, 7 }
 0x3d3   : > { %2011 = vmatpush.bf16.msrb.mxu1 %v5483_v8  ;;  %v5440_v8 = vld [vmem:[#allocation14 + $0x128] sm:$0xf0]  ;;  %s8904_s6 = sld [smem:[#allocation41_spill]]  ;;  %s5753_s8 = sshll.u32 %s6637_s0, 2 }
 0x3d4   : > { %1866 = vmatpush.bf16.msrb.mxu2 %v5463_v9  ;;  %v5876_v9 = vld [vmem:[#allocation14 + $0x164] sm:$0xf]  ;;  %1964 = vmatpush.bf16.msrb.mxu0 %v5403_v30  ;;  %v5270_v30 = vld [vmem:[%s6894_s13 + $0x90] sm:$0xf]  ;;  %s8905_s22 = sld [smem:[#allocation43_spill]]  ;;  %s4627_s24 = sshll.u32 %s667_s25, 4  ;;  %s4628_s24 = int_to_ptr.vmem [resolvable:$true] %s4627_s24 }
 0x3d5   : > { %s8906_s2 = sld [smem:[#allocation45_spill]] }
 0x3d8   : > { %1867 = vmatpush.bf16.msrb.mxu2 %v5455_v12  ;;  %v5475_v12 = vor.u32 %v5876_v9, %v5472_v10  ;;  %1965 = vmatpush.bf16.msrb.mxu0 %v5395_v59  ;;  %v7067_v9 = vor.u32 %v5824_v61, %v5258_v60  ;;  %v7069_v10 = vor.u32 %v5819_v0, %v5242_v62  ;;  %v7095_v52 = vld [vmem:[%s8903_s4] sm:$0x3]  ;;  %v5290_v0 = vld [vmem:[%s6894_s13 + $0xb0] sm:$0xf] }
 0x3da   : > { %1779 = vmatmul.bf16.gmra.mxu0 %v7007_v35  ;;  %2012 = vmatpush.bf16.msrb.mxu1 %v5475_v12  ;;  %v5443_v12 = vor.u32 %v5868_v7, %v5440_v8 }
 0x3db   : > { %1858 = vmatmul.bf16.gmra.mxu2 %v7009_v21  ;;  %1828 = vmatmul.bf16.gmra.mxu1 %v7011_v22 }
 0x3dc   : > { %1868 = vmatpush.bf16.msrb.mxu2 %v5447_v19  ;;  %v5331_v19 = vor.u32 %v5840_v13, %v5328_v14  ;;  %v5854_v13 = vld [vmem:[#allocation14 + $0xb4] sm:$0xf]  ;;  %v5384_v14 = vld [vmem:[#allocation14 + $0xb8] sm:$0xf0] }
 0x3dd   : > { %v5387_v15 = vor.u32 %v5854_v13, %v5384_v14 }
 0x3de   : > { %1916 = vmatpush.bf16.msra.mxu3 %v5331_v19 }
 0x3df   : > { %1966 = vmatpush.bf16.msrb.mxu0 %v5387_v15 }
 0x3e0   : > { %1869 = vmatpush.bf16.msrb.mxu2 %v5439_v23  ;;  %v7056_v23 = vor.u32 %v5820_v18, %v5248_v41  ;;  %v5435_v18 = vor.u32 %v5866_v16, %v5432_v17  ;;  %v5376_v41 = vld [vmem:[#allocation14 + $0xa8] sm:$0xf0] }
 0x3e1   : > { %v5379_v19 = vor.u32 %v5852_v34, %v5376_v41 }
 0x3e3   : > { %1967 = vmatpush.bf16.msrb.mxu0 %v5379_v19 }
 0x3e4   : > { %1870 = vmatpush.bf16.msrb.mxu2 %v5431_v26  ;;  %v5323_v26 = vor.u32 %v5838_v24, %v5320_v25  ;;  %v5864_v24 = vld [vmem:[#allocation14 + $0x104] sm:$0xf]  ;;  %v5424_v25 = vld [vmem:[#allocation14 + $0x108] sm:$0xf0] }
 0x3e5   : > { %v5427_v28 = vor.u32 %v5864_v24, %v5424_v25 }
 0x3e6   : > { %1917 = vmatpush.bf16.msra.mxu3 %v5323_v26  ;;  %v5850_v26 = vld [vmem:[#allocation14 + $0x94] sm:$0xf] }
 0x3e8   : > { %1871 = vmatpush.bf16.msrb.mxu2 %v5423_v29  ;;  %v5874_v29 = vld [vmem:[#allocation14 + $0x154] sm:$0xf] }
 0x3e9   : > { %v5467_v37 = vor.u32 %v5874_v29, %v5464_v32  ;;  %v5371_v29 = vor.u32 %v5850_v26, %v5368_v27  ;;  %v5827_v32 = vld [vmem:[%s6894_s13 + $0x98] sm:$0xf0] }
 0x3ea   : > { %1784 = vmatmul.bf16.gmra.mxu0 %v7022_v39  ;;  %1918 = vmatpush.bf16.msra.mxu3 %v5315_v38  ;;  %v7081_v38 = vor.u32 %v5827_v32, %v5270_v30 }
 0x3eb   : > { %1872 = vmatmul.bf16.vlgmr.msrb.gmra.mxu2 %v7024_v40  ;;  %1833 = vmatmul.bf16.gmra.mxu1 %v7026_v43 }
 0x3ec   : > { %2013 = vmatpush.bf16.msrb.mxu1 %v5467_v37  ;;  %1968 = vmatpush.bf16.msrb.mxu0 %v5371_v29  ;;  %v5360_v37 = vld [vmem:[#allocation14 + $0x88] sm:$0xf0] }
 0x3ed   : > { %v5363_v44 = vor.u32 %v5848_v36, %v5360_v37 }
 0x3ee   : > { %1919 = vmatpush.bf16.msra.mxu3 %v5307_v50  ;;  %v5283_v50 = vor.u32 %v5830_v47, %v5282_v46 }
 0x3f0   : > { %2014 = vmatpush.bf16.msrb.mxu1 %v5459_v48  ;;  %1969 = vmatpush.bf16.msrb.mxu0 %v5363_v44  ;;  %v5266_v48 = vld [vmem:[%s6894_s13 + $0x80] sm:$0xf] }
 0x3f1   : > { %v5267_v51 = vor.u32 %v5825_v49, %v5266_v48 }
 0x3f2   : > { %1920 = vmatpush.bf16.msra.mxu3 %v5299_v6  ;;  %v5291_v6 = vor.u32 %v5831_v2, %v5290_v0 }
 0x3f4   : > { %2015 = vmatpush.bf16.msrb.mxu1 %v5451_v63 }
 0x3f5   : > { %1921 = vmatmul.bf16.vlgmr.msra.gmra.mxu3 %v6992_v1  ;;  %v5822_v1 = vld [vmem:[%s6894_s13 + $0x70] sm:$0xf0] }
 0x3f6   : > { %v5255_v45 = vor.u32 %v5822_v1, %v5254_v33 }
 0x3f8   : > { %2016 = vmatpush.bf16.msrb.mxu1 %v5443_v12 }
 0x3fa   : > { %1789 = vmatmul.bf16.gmra.mxu0 %v7037_v53 }
 0x3fb   : > { %1877 = vmatmul.bf16.gmra.mxu2 %v7039_v54  ;;  %1838 = vmatmul.bf16.gmra.mxu1 %v7041_v55 }
 0x3fc   : > { %2017 = vmatpush.bf16.msrb.mxu1 %v5435_v18 }
 0x400   : > { %2018 = vmatpush.bf16.msrb.mxu1 %v5427_v28 }
 0x405   : > { %1926 = vmatmul.bf16.gmra.mxu3 %v7007_v35  ;;  %v5278_v35 = vld [vmem:[%s6894_s13 + $0x98] sm:$0xf]  ;;  %s4573_s13 = sand.u32 1, %s6794_s19  }
 0x406   : > { %v5279_v58 = vor.u32 %v5828_v56, %v5278_v35  ;;  %v7175_v35 = vperm.slane %v7095_v52, 1 }
 0x40a   : > { %1794 = vmatmul.bf16.gmra.mxu0 %v7052_v42 }
 0x40b   : > { %1882 = vmatmul.bf16.gmra.mxu2 %v7054_v20  ;;  %1843 = vmatmul.bf16.gmra.mxu1 %v7056_v23 }
 0x415   : > { %1931 = vmatmul.bf16.gmra.mxu3 %v7022_v39 }
 0x41a   : > { %1799 = vmatmul.bf16.gmra.mxu0 %v7067_v9 }
 0x41b   : > { %1887 = vmatmul.bf16.gmra.mxu2 %v7069_v10  ;;  %1848 = vmatmul.bf16.gmra.mxu1 %v7071_v11 }
 0x425   : > { %1936 = vmatmul.bf16.gmra.mxu3 %v7037_v53 }
 0x42a   : > { %1804 = vmatmul.bf16.gmra.mxu0 %v7081_v38 }
 0x42b   : > { %1892 = vmatmul.bf16.gmra.mxu2 %v5255_v45  ;;  %2019 = vmatmul.bf16.vlgmr.msrb.gmra.mxu1 %v7024_v40  ;;  %v7098_v40 = vperm.slane %v7095_v52, 0 }
 0x435   : > { %1941 = vmatmul.bf16.gmra.mxu3 %v7052_v42 }
 0x43a   : > { %1809 = vmatmul.bf16.gmra.mxu0 %v5283_v50 }
 0x43b   : > { %1897 = vmatmul.bf16.gmra.mxu2 %v5267_v51  ;;  %2024 = vmatmul.bf16.gmra.mxu1 %v7039_v54 }
 0x445   : > { %1946 = vmatmul.bf16.gmra.mxu3 %v7067_v9 }
 0x447   : > { %v1775_v57 = vpop.f32.mrf.mxu0 }
 0x448   : > { %v1776_v59 = vadd.f32 %v1775_v57, %v7098_v40  ;;  %v1824_v60 = vpop.f32.mrf.mxu1 }
 0x44a   : > { %v7103_v54 = vadd.f32 %v1824_v60, %v1776_v59  ;;  %1970 = vmatmul.bf16.vlgmr.msrb.gmra.mxu0 %v6996_v5 }
 0x44b   : > { %1902 = vmatmul.bf16.gmra.mxu2 %v5279_v58  ;;  %2029 = vmatmul.bf16.gmra.mxu1 %v7054_v20 }
 0x44e   : > { %v7144_v27 = vpop.f32.mrf.mxu2 }
 0x44f   : > { %v1777_v39 = vpop.f32.mrf.mxu0 }
 0x450   : > { %v1778_v61 = vadd.f32 %v1777_v39, %v7098_v40  ;;  %v1826_v62 = vpop.f32.mrf.mxu1 }
 0x452   : > { %v7109_v63 = vadd.f32 %v1826_v62, %v1778_v61 }
 0x455   : > { %1951 = vmatmul.bf16.gmra.mxu3 %v7081_v38 }
 0x456   : > { %v7150_v30 = vpop.f32.mrf.mxu2 }
 0x457   : > { %v1780_v3 = vpop.f32.mrf.mxu0 }
 0x458   : > { %v1781_v7 = vadd.f32 %v1780_v3, %v7098_v40  ;;  %v1829_v8 = vpop.f32.mrf.mxu1 }
 0x45a   : > { %v7114_v12 = vadd.f32 %v1829_v8, %v1781_v7  ;;  %1975 = vmatmul.bf16.gmra.mxu0 %v7011_v22 }
 0x45b   : > { %1907 = vmatmul.bf16.gmra.mxu2 %v5291_v6  ;;  %2034 = vmatmul.bf16.gmra.mxu1 %v7069_v10 }
 0x45e   : > { %v7158_v36 = vpop.f32.mrf.mxu2 }
 0x45f   : > { %v1782_v5 = vpop.f32.mrf.mxu0 }
 0x460   : > { %v1783_v53 = vadd.f32 %v1782_v5, %v7098_v40  ;;  %v1831_v20 = vpop.f32.mrf.mxu1 }
 0x462   : > { %v7120_v13 = vadd.f32 %v1831_v20, %v1783_v53 }
 0x465   : > { %1956 = vmatmul.bf16.gmra.mxu3 %v5283_v50 }
 0x466   : > { %v7163_v38 = vpop.f32.mrf.mxu2 }
 0x467   : > { %v1785_v14 = vpop.f32.mrf.mxu0 }
 0x468   : > { %v1786_v15 = vadd.f32 %v1785_v14, %v7098_v40  ;;  %v1834_v16 = vpop.f32.mrf.mxu1 }
 0x46a   : > { %v7123_v17 = vadd.f32 %v1834_v16, %v1786_v15  ;;  %1980 = vmatmul.bf16.gmra.mxu0 %v7026_v43 }
 0x46b   : > { %2039 = vmatmul.bf16.gmra.mxu1 %v5255_v45 }
 0x46e   : > { %v1873_v47 = vpop.f32.mrf.mxu2 }
 0x46f   : > { %v7127_v22 = vpop.f32.mrf.mxu0  ;;  %v7179_v60 = vadd.f32 %v1873_v47, %v7103_v54 }
 0x470   : > { %v7129_v42 = vpop.f32.mrf.mxu1 }
 0x477   : > { %v1790_v10 = vpop.f32.mrf.mxu0 }
 0x478   : > { %v1791_v34 = vadd.f32 %v1790_v10, %v7098_v40  ;;  %v1839_v18 = vpop.f32.mrf.mxu1  ;;  %v1922_v46 = vpop.f32.mrf.mxu3 }
 0x479   : > { %v1923_v56 = vadd.f32 %v1922_v46, %v7175_v35 }
 0x47a   : > { %v7132_v41 = vadd.f32 %v1839_v18, %v1791_v34  ;;  %1985 = vmatmul.bf16.gmra.mxu0 %v7041_v55 }
 0x47b   : > { %2044 = vmatmul.bf16.gmra.mxu1 %v5267_v51  ;;  %v1875_v51 = vpop.f32.mrf.mxu2 }
 0x47f   : > { %v7136_v19 = vpop.f32.mrf.mxu0 }
 0x480   : > { %v7138_v43 = vpop.f32.mrf.mxu1  ;;  %v1924_v49 = vpop.f32.mrf.mxu3 }
 0x481   : > { %v1925_v0 = vadd.f32 %v1924_v49, %v7175_v35 }
 0x483   : > { %v1878_v39 = vpop.f32.mrf.mxu2 }
 0x484   : > { %v7195_v15 = vadd.f32 %v1878_v39, %v7114_v12 }
 0x487   : > { %v1795_v9 = vpop.f32.mrf.mxu0 }
 0x488   : > { %v1796_v24 = vadd.f32 %v1795_v9, %v7098_v40  ;;  %v1844_v25 = vpop.f32.mrf.mxu1 }
 0x48a   : > { %v7141_v26 = vadd.f32 %v1844_v25, %v1796_v24  ;;  %1990 = vmatmul.bf16.gmra.mxu0 %v7056_v23 }
 0x48b   : > { %2049 = vmatmul.bf16.gmra.mxu1 %v5279_v58  ;;  %v1927_v58 = vpop.f32.mrf.mxu3  ;;  %v1880_v54 = vpop.f32.mrf.mxu2 }
 0x48c   : > { %v1928_v8 = vadd.f32 %v1927_v58, %v7175_v35 }
 0x48f   : > { %v7146_v55 = vpop.f32.mrf.mxu0 }
 0x490   : > { %v7148_v28 = vpop.f32.mrf.mxu1 }
 0x493   : > { %v1929_v3 = vpop.f32.mrf.mxu3  ;;  %v1883_v34 = vpop.f32.mrf.mxu2 }
 0x494   : > { %v1930_v18 = vadd.f32 %v1929_v3, %v7175_v35 }
 0x497   : > { %v1800_v29 = vpop.f32.mrf.mxu0 }
 0x498   : > { %v1801_v32 = vadd.f32 %v1800_v29, %v7098_v40  ;;  %v1849_v33 = vpop.f32.mrf.mxu1  ;;  %v7203_v29 = vadd.f32 %v1880_v54, %v7120_v13  ;;  %v1788_v13 = vadd.f32 %v7127_v22, %v7098_v40 }
 0x49a   : > { %v7153_v1 = vadd.f32 %v1849_v33, %v1801_v32  ;;  %1995 = vmatmul.bf16.gmra.mxu0 %v7071_v11 }
 0x49b   : > { %2054 = vmatmul.bf16.gmra.mxu1 %v5291_v6  ;;  %v7187_v6 = vadd.f32 %v1875_v51, %v7109_v63  ;;  %v1932_v10 = vpop.f32.mrf.mxu3  ;;  %v7211_v51 = vadd.f32 %v1883_v34, %v7123_v17 }
 0x49c   : > { %v1933_v12 = vadd.f32 %v1932_v10, %v7175_v35 }
 0x49f   : > { %v7156_v23 = vpop.f32.mrf.mxu0 }
 0x4a0   : > { %v7167_v45 = vpop.f32.mrf.mxu1 }
 0x4a3   : > { %v1934_v46 = vpop.f32.mrf.mxu3 }
 0x4a4   : > { %v1935_v58 = vadd.f32 %v1934_v46, %v7175_v35 }
 0x4a7   : > { %v7160_v37 = vpop.f32.mrf.mxu0 }
 0x4a8   : > { %v2020_v11 = vpop.f32.mrf.mxu1 }
 0x4aa   : > { %2000 = vmatmul.bf16.gmra.mxu0 %v6994_v4 }
 0x4af   : > { %v7165_v44 = vpop.f32.mrf.mxu0 }
 0x4b0   : > { %v2022_v4 = vpop.f32.mrf.mxu1 }
 0x4b7   : > { %v7169_v48 = vpop.f32.mrf.mxu0 }
 0x4b8   : > { %v2025_v62 = vpop.f32.mrf.mxu1 }
 0x4ba   : > { %2005 = vmatmul.bf16.gmra.mxu0 %v7009_v21 }
 0x4bf   : > { %v7172_v50 = vpop.f32.mrf.mxu0 }
 0x4c0   : > { %v2027_v20 = vpop.f32.mrf.mxu1 }
 0x4c7   : > { %v1971_v57 = vpop.f32.mrf.mxu0 }
 0x4c8   : > { %v1972_v59 = vadd.f32 %v1971_v57, %v1923_v56  ;;  %v2030_v25 = vpop.f32.mrf.mxu1 }
 0x4ca   : > { %v7181_v61 = vadd.f32 %v2020_v11, %v1972_v59  ;;  %v1885_v11 = vpop.f32.mrf.mxu2  ;;  %v1937_v59 = vpop.f32.mrf.mxu3 }
 0x4cc   : > { %v2060_v21 = vadd.f32 %v7181_v61, %v7179_v60 }
 0x4ce   : > { %2061 = vadd.xlane.f32.xlu0 %v2060_v21  ;;  %v1837_v21 = vadd.f32 %v7129_v42, %v1788_v13 }
 0x4cf   : > { %v1973_v52 = vpop.f32.mrf.mxu0 }
 0x4d0   : > { %v1974_v2 = vadd.f32 %v1973_v52, %v1925_v0  ;;  %v2032_v56 = vpop.f32.mrf.mxu1  ;;  %v7221_v0 = vadd.f32 %v1885_v11, %v1837_v21 }
 0x4d2   : > { %v7189_v7 = vadd.f32 %v2022_v4, %v1974_v2  ;;  %v1888_v17 = vpop.f32.mrf.mxu2  ;;  %v1938_v2 = vadd.f32 %v1937_v59, %v7175_v35 }
 0x4d4   : > { %v2063_v5 = vadd.f32 %v7189_v7, %v7187_v6 }
 0x4d6   : > { %2064 = vadd.xlane.f32.xlu0 %v2063_v5  ;;  %v1939_v5 = vpop.f32.mrf.mxu3 }
 0x4d7   : > { %v1976_v53 = vpop.f32.mrf.mxu0 }
 0x4d8   : > { %v1977_v14 = vadd.f32 %v1976_v53, %v1928_v8  ;;  %v2035_v3 = vpop.f32.mrf.mxu1  ;;  %v7229_v53 = vadd.f32 %v1888_v17, %v7132_v41 }
 0x4da   : > { %v7197_v16 = vadd.f32 %v2025_v62, %v1977_v14  ;;  %v1890_v14 = vpop.f32.mrf.mxu2 }
 0x4dc   : > { %v2066_v63 = vadd.f32 %v7197_v16, %v7195_v15 }
 0x4de   : > { %2067 = vadd.xlane.f32.xlu1 %v2066_v63  ;;  %v1940_v63 = vadd.f32 %v1939_v5, %v7175_v35  ;;  %v1798_v5 = vadd.f32 %v7146_v55, %v7098_v40 }
 0x4df   : > { %v1978_v9 = vpop.f32.mrf.mxu0 }
 0x4e0   : > { %v1979_v24 = vadd.f32 %v1978_v9, %v1930_v18  ;;  %v2037_v34 = vpop.f32.mrf.mxu1 }
 0x4e2   : > { %v7205_v32 = vadd.f32 %v2027_v20, %v1979_v24  ;;  %v1793_v20 = vadd.f32 %v7136_v19, %v7098_v40  ;;  %v1893_v46 = vpop.f32.mrf.mxu2 }
 0x4e4   : > { %v2069_v33 = vadd.f32 %v7205_v32, %v7203_v29  ;;  %v1842_v9 = vadd.f32 %v7138_v43, %v1793_v20 }
 0x4e6   : > { %2070 = vadd.xlane.f32.xlu1 %v2069_v33  ;;  %v7239_v41 = vadd.f32 %v1890_v14, %v1842_v9 }
 0x4e7   : > { %v1981_v47 = vpop.f32.mrf.mxu0 }
 0x4e8   : > { %v1982_v49 = vadd.f32 %v1981_v47, %v1933_v12  ;;  %v2040_v11 = vpop.f32.mrf.mxu1 }
 0x4ea   : > { %v7213_v4 = vadd.f32 %v2030_v25, %v1982_v49  ;;  %v1942_v25 = vpop.f32.mrf.mxu3 }
 0x4eb   : > { %v1943_v33 = vadd.f32 %v1942_v25, %v7175_v35 }
 0x4ec   : > { %v2072_v57 = vadd.f32 %v7213_v4, %v7211_v51 }
 0x4ee   : > { %2073 = vadd.xlane.f32.xlu2 %v2072_v57 }
 0x4ef   : > { %v1983_v39 = vpop.f32.mrf.mxu0 }
 0x4f0   : > { %v1984_v62 = vadd.f32 %v1983_v39, %v1935_v58  ;;  %v2042_v59 = vpop.f32.mrf.mxu1  ;;  %v1895_v39 = vpop.f32.mrf.mxu2 }
 0x4f2   : > { %v7223_v52 = vadd.f32 %v2032_v56, %v1984_v62  ;;  %v7247_v56 = vadd.f32 %v1893_v46, %v7141_v26  ;;  %v1944_v57 = vpop.f32.mrf.mxu3 }
 0x4f4   : > { %v2075_v22 = vadd.f32 %v7223_v52, %v7221_v0 }
 0x4f6   : > { %2076 = vadd.xlane.f32.xlu2 %v2075_v22  ;;  %v1945_v22 = vadd.f32 %v1944_v57, %v7175_v35 }
 0x4f7   : > { %v1986_v54 = vpop.f32.mrf.mxu0 }
 0x4f8   : > { %v1987_v8 = vadd.f32 %v1986_v54, %v1938_v2  ;;  %v2045_v20 = vpop.f32.mrf.mxu1  ;;  %v1898_v14 = vpop.f32.mrf.mxu2 }
 0x4fa   : > { %v7231_v42 = vadd.f32 %v2035_v3, %v1987_v8  ;;  %v1947_v21 = vpop.f32.mrf.mxu3 }
 0x4fc   : > { %v2078_v10 = vadd.f32 %v7231_v42, %v7229_v53 }
 0x4fe   : > { %2079 = vadd.xlane.f32.xlu0 %v2078_v10 }
 0x4ff   : > { %v1988_v18 = vpop.f32.mrf.mxu0 }
 0x500   : > { %v1989_v24 = vadd.f32 %v1988_v18, %v1940_v63  ;;  %v1900_v57 = vpop.f32.mrf.mxu2 }
 0x502   : > { %v7241_v12 = vadd.f32 %v2037_v34, %v1989_v24  ;;  %v1949_v34 = vpop.f32.mrf.mxu3  ;;  %v1948_v24 = vadd.f32 %v1947_v21, %v7175_v35 }
 0x504   : > { %v2081_v19 = vadd.f32 %v7241_v12, %v7239_v41 }
 0x506   : > { %2082 = vadd.xlane.f32.xlu1 %v2081_v19 }
 0x507   : > { %v1991_v47 = vpop.f32.mrf.mxu0 }
 0x508   : > { %v1992_v49 = vadd.f32 %v1991_v47, %v1943_v33 }
 0x50a   : > { %v7249_v43 = vadd.f32 %v2040_v11, %v1992_v49 }
 0x50c   : > { %v2084_v13 = vadd.f32 %v7249_v43, %v7247_v56 }
 0x50e   : > { %2085 = vadd.xlane.f32.xlu1 %v2084_v13  ;;  %v2047_v13 = vpop.f32.mrf.mxu1 }
 0x50f   : > { %v1993_v58 = vpop.f32.mrf.mxu0 }
 0x510   : > { %v1994_v10 = vadd.f32 %v1993_v58, %v1945_v22  ;;  %v1952_v58 = vpop.f32.mrf.mxu3 }
 0x512   : > { %v7269_v9 = vadd.f32 %v2042_v59, %v1994_v10 }
 0x517   : > { %v1996_v2 = vpop.f32.mrf.mxu0 }
 0x51f   : > { %v1998_v33 = vpop.f32.mrf.mxu0 }
 0x541   : > { %v2062_v62 = vpop.xlane.xlu0 %2061 }
 0x542   : > { %v2115_v17 = vmul.f32 %v2062_v62, %v6934_v31 }
 0x544   : > { %v7256_v26 = vsub.f32 %v7179_v60, %v2115_v17  ;;  %v7259_v3 = vsub.f32 %v7181_v61, %v2115_v17  ;;  %v1847_v61 = vadd.f32 %v7148_v28, %v1798_v5  ;;  %v1997_v28 = vadd.f32 %v1996_v2, %v1948_v24 }
 0x545   : > { %v7297_v17 = vadd.f32 %v1898_v14, %v7153_v1  ;;  %v2050_v14 = vpop.f32.mrf.mxu1 }
 0x546   : > { %v2163_v54 = vmul.f32 %v7256_v26, %v7256_v26  ;;  %v2164_v8 = vmul.f32 %v7259_v3, %v7259_v3  ;;  %v7278_v19 = vadd.f32 %v1895_v39, %v1847_v61  ;;  %v7287_v59 = vadd.f32 %v2045_v20, %v1997_v28  ;;  %v1954_v61 = vpop.f32.mrf.mxu3 }
 0x547   : > { %v1950_v39 = vadd.f32 %v1949_v34, %v7175_v35 }
 0x548   : > { %v2195_v63 = vadd.f32 %v2164_v8, %v2163_v54  ;;  %v2087_v11 = vadd.f32 %v7269_v9, %v7278_v19  ;;  %v1803_v54 = vadd.f32 %v7156_v23, %v7098_v40  ;;  %v2001_v8 = vpop.f32.mrf.mxu0 }
 0x549   : > { %v2065_v18 = vpop.xlane.xlu0 %2064  ;;  %v1999_v5 = vadd.f32 %v1998_v33, %v1950_v39 }
 0x54a   : > { %v2116_v60 = vmul.f32 %v2065_v18, %v6934_v31  ;;  %2196 = vadd.xlane.f32.xlu2 %v2195_v63  ;;  %v1852_v1 = vadd.f32 %v7167_v45, %v1803_v54  ;;  %v1903_v63 = vpop.f32.mrf.mxu2  ;;  %v1953_v18 = vadd.f32 %v1952_v58, %v7175_v35  ;;  %v1808_v54 = vadd.f32 %v7165_v44, %v7098_v40 }
 0x54b   : > { %v7309_v34 = vadd.f32 %v2047_v13, %v1999_v5 }
 0x54c   : > { %v7273_v25 = vsub.f32 %v7187_v6, %v2116_v60  ;;  %v7276_v55 = vsub.f32 %v7189_v7, %v2116_v60  ;;  %v7318_v24 = vadd.f32 %v1900_v57, %v1852_v1  ;;  %v1955_v57 = vadd.f32 %v1954_v61, %v7175_v35 }
 0x54d   : > { %v2052_v58 = vpop.f32.mrf.mxu1 }
 0x54e   : > { %v2165_v46 = vmul.f32 %v7273_v25, %v7273_v25  ;;  %v2166_v47 = vmul.f32 %v7276_v55, %v7276_v55 }
 0x550   : > { %v2198_v49 = vadd.f32 %v2166_v47, %v2165_v46  ;;  %v1806_v46 = vadd.f32 %v7160_v37, %v7098_v40  ;;  %v2002_v47 = vadd.f32 %v2001_v8, %v1953_v18  ;;  %v1957_v8 = vpop.f32.mrf.mxu3 }
 0x551   : > { %v2068_v6 = vpop.xlane.xlu1 %2067 }
 0x552   : > { %v2117_v7 = vmul.f32 %v2068_v6, %v6934_v31  ;;  %2088 = vadd.xlane.f32.xlu2 %v2087_v11  ;;  %2199 = vadd.xlane.f32.xlu0 %v2198_v49  ;;  %v2003_v11 = vpop.f32.mrf.mxu0  ;;  %v1855_v13 = vadd.f32 %v7144_v27, %v1806_v46  ;;  %v7330_v6 = vadd.f32 %v2050_v14, %v2002_v47 }
 0x553   : > { %v2004_v5 = vadd.f32 %v2003_v11, %v1955_v57  ;;  %v1958_v14 = vadd.f32 %v1957_v8, %v7175_v35 }
 0x554   : > { %v7291_v21 = vsub.f32 %v7195_v15, %v2117_v7  ;;  %v7294_v62 = vsub.f32 %v7197_v16, %v2117_v7  ;;  %v2090_v15 = vadd.f32 %v7287_v59, %v7297_v17  ;;  %v7339_v39 = vadd.f32 %v1903_v63, %v1855_v13 }
 0x555   : > { %v7351_v1 = vadd.f32 %v2052_v58, %v2004_v5 }
 0x556   : > { %v2167_v2 = vmul.f32 %v7291_v21, %v7291_v21  ;;  %v2168_v22 = vmul.f32 %v7294_v62, %v7294_v62 }
 0x558   : > { %v2201_v20 = vadd.f32 %v2168_v22, %v2167_v2  ;;  %v1905_v2 = vpop.f32.mrf.mxu2 }
 0x559   : > { %v2071_v16 = vpop.xlane.xlu1 %2070 }
 0x55a   : > { %v2118_v10 = vmul.f32 %v2071_v16, %v6934_v31  ;;  %2091 = vadd.xlane.f32.xlu2 %v2090_v15  ;;  %2202 = vadd.xlane.f32.xlu0 %v2201_v20  ;;  %v1857_v16 = vadd.f32 %v7150_v30, %v1808_v54  ;;  %v1811_v30 = vadd.f32 %v7169_v48, %v7098_v40 }
 0x55c   : > { %v7313_v23 = vsub.f32 %v7203_v29, %v2118_v10  ;;  %v7316_v60 = vsub.f32 %v7205_v32, %v2118_v10  ;;  %v2093_v29 = vadd.f32 %v7309_v34, %v7318_v24  ;;  %v2006_v10 = vpop.f32.mrf.mxu0  ;;  %v7360_v18 = vadd.f32 %v1905_v2, %v1857_v16 }
 0x55d   : > { %v2007_v47 = vadd.f32 %v2006_v10, %v1958_v14 }
 0x55e   : > { %v2169_v33 = vmul.f32 %v7313_v23, %v7313_v23  ;;  %v2170_v45 = vmul.f32 %v7316_v60, %v7316_v60 }
 0x560   : > { %v2204_v28 = vadd.f32 %v2170_v45, %v2169_v33  ;;  %v2055_v45 = vpop.f32.mrf.mxu1  ;;  %v1908_v46 = vpop.f32.mrf.mxu2 }
 0x561   : > { %v2074_v32 = vpop.xlane.xlu2 %2073 }
 0x562   : > { %v2119_v49 = vmul.f32 %v2074_v32, %v6934_v31  ;;  %2205 = vadd.xlane.f32.xlu1 %v2204_v28  ;;  %2094 = vadd.xlane.f32.xlu0 %v2093_v29  ;;  %v1860_v32 = vadd.f32 %v7158_v36, %v1811_v30  ;;  %v1813_v36 = vadd.f32 %v7172_v50, %v7098_v40 }
 0x564   : > { %v7334_v7 = vsub.f32 %v7211_v51, %v2119_v49  ;;  %v7337_v37 = vsub.f32 %v7213_v4, %v2119_v49  ;;  %v2096_v4 = vadd.f32 %v7330_v6, %v7339_v39  ;;  %v7372_v49 = vadd.f32 %v2055_v45, %v2007_v47  ;;  %v2008_v58 = vpop.f32.mrf.mxu0  ;;  %v5570_v47 = vld [vmem:[#allocation15 + $0xa8] sm:$0xf] }
 0x565   : > { %v7381_v2 = vadd.f32 %v1908_v46, %v1860_v32  ;;  %v5572_v32 = vld [vmem:[#allocation15 + $0xb4] sm:$0xf0] }
 0x566   : > { %v2171_v22 = vmul.f32 %v7334_v7, %v7334_v7  ;;  %v2172_v27 = vmul.f32 %v7337_v37, %v7337_v37 }
 0x568   : > { %v2207_v51 = vadd.f32 %v2172_v27, %v2171_v22  ;;  %v2057_v8 = vpop.f32.mrf.mxu1 }
 0x569   : > { %v2077_v15 = vpop.xlane.xlu2 %2076 }
 0x56a   : > { %v2120_v20 = vmul.f32 %v2077_v15, %v6934_v31  ;;  %2208 = vadd.xlane.f32.xlu1 %v2207_v51  ;;  %2097 = vadd.xlane.f32.xlu0 %v2096_v4  ;;  %v1910_v51 = vpop.f32.mrf.mxu2  ;;  %v1862_v4 = vadd.f32 %v7163_v38, %v1813_v36  ;;  %v5899_v36 = vld [vmem:[#allocation15 + $0x98] sm:$0xf0] }
 0x56c   : > { %v7355_v44 = vsub.f32 %v7221_v0, %v2120_v20  ;;  %v7358_v63 = vsub.f32 %v7223_v52, %v2120_v20  ;;  %v2099_v0 = vadd.f32 %v7351_v1, %v7360_v18  ;;  %v1959_v52 = vpop.f32.mrf.mxu3  ;;  %v7401_v50 = vadd.f32 %v1910_v51, %v1862_v4  ;;  %v5922_v4 = vld [vmem:[#allocation15 + $0x154] sm:$0xf] }
 0x56d   : > { %v1960_v13 = vadd.f32 %v1959_v52, %v7175_v35  ;;  %v2102_v35 = vadd.f32 %v7372_v49, %v7381_v2 }
 0x56e   : > { %v2173_v61 = vmul.f32 %v7355_v44, %v7355_v44  ;;  %v2174_v33 = vmul.f32 %v7358_v63, %v7358_v63 }
 0x56f   : > { %v2009_v54 = vadd.f32 %v2008_v58, %v1960_v13  ;;  %v5668_v58 = vld [vmem:[#allocation15 + $0x174] sm:$0xf0] }
 0x570   : > { %v2210_v28 = vadd.f32 %v2174_v33, %v2173_v61 }
 0x571   : > { %v2080_v29 = vpop.xlane.xlu0 %2079  ;;  %v7393_v15 = vadd.f32 %v2057_v8, %v2009_v54  ;;  %v5654_v54 = vld [vmem:[#allocation15 + $0x150] sm:$0xf]  ;;  %v5898_v8 = vld [vmem:[#allocation15 + $0x94] sm:$0xf] }
 0x572   : > { %v2121_v11 = vmul.f32 %v2080_v29, %v6934_v31  ;;  %2100 = vadd.xlane.f32.xlu1 %v2099_v0  ;;  %2211 = vadd.xlane.f32.xlu2 %v2210_v28  ;;  %v5902_v0 = vld [vmem:[#allocation15 + $0xb0] sm:$0xf0]  ;;  %v5666_v28 = vld [vmem:[#allocation15 + $0x168] sm:$0xf] }
 0x573   : > { %v2105_v38 = vadd.f32 %v7393_v15, %v7401_v50  ;;  %v5571_v52 = vor.u32 %v5902_v0, %v5570_v47  ;;  %v5926_v29 = vld [vmem:[#allocation15 + $0x170] sm:$0xf0] }
 0x574   : > { %v7376_v48 = vsub.f32 %v7229_v53, %v2121_v11  ;;  %v7379_v57 = vsub.f32 %v7231_v42, %v2121_v11  ;;  %v5901_v11 = vld [vmem:[#allocation15 + $0xac] sm:$0xf] }
 0x575   : > { %v7420_v13 = vor.u32 %v5901_v11, %v5572_v32  ;;  %2811 = vmatpush.bf16.msra.mxu2 %v5571_v52  ;;  %v5644_v52 = vld [vmem:[#allocation15 + $0x144] sm:$0xf0]  ;;  %v5534_v11 = vld [vmem:[#allocation15 + $0x60] sm:$0xf]  ;;  %v5893_v32 = vld [vmem:[#allocation15 + $0x68] sm:$0xf0] }
 0x576   : > { %v2175_v22 = vmul.f32 %v7376_v48, %v7376_v48  ;;  %v2176_v27 = vmul.f32 %v7379_v57, %v7379_v57 }
 0x577   : > { %2909 = vmatpush.bf16.msra.mxu0 %v7420_v13 }
 0x578   : > { %v2213_v53 = vadd.f32 %v2176_v27, %v2175_v22  ;;  %v5558_v27 = vld [vmem:[#allocation15 + $0x90] sm:$0xf] }
 0x579   : > { %v2083_v42 = vpop.xlane.xlu1 %2082 }
 0x57a   : > { %v2122_v5 = vmul.f32 %v2083_v42, %v6934_v31  ;;  %2103 = vadd.xlane.f32.xlu1 %v2102_v35  ;;  %2214 = vadd.xlane.f32.xlu2 %v2213_v53  ;;  %v5559_v35 = vor.u32 %v5899_v36, %v5558_v27  ;;  %v5923_v53 = vld [vmem:[#allocation15 + $0x158] sm:$0xf0]  ;;  %v5560_v42 = vld [vmem:[#allocation15 + $0x9c] sm:$0xf0]  ;;  %v5536_v27 = vld [vmem:[#allocation15 + $0x6c] sm:$0xf0] }
 0x57b   : > { %v7423_v51 = vor.u32 %v5898_v8, %v5560_v42  ;;  %v5522_v42 = vld [vmem:[#allocation15 + $0x48] sm:$0xf] }
 0x57c   : > { %v7396_v20 = vsub.f32 %v7239_v41, %v2122_v5  ;;  %v7399_v40 = vsub.f32 %v7241_v12, %v2122_v5  ;;  %v5655_v5 = vor.u32 %v5923_v53, %v5654_v54  ;;  %2812 = vmatpush.bf16.msra.mxu2 %v5559_v35  ;;  %v5916_v35 = vld [vmem:[#allocation15 + $0x124] sm:$0xf]  ;;  %v5632_v53 = vld [vmem:[#allocation15 + $0x12c] sm:$0xf0] }
 0x57d   : > { %2910 = vmatpush.bf16.msra.mxu0 %v7423_v51  ;;  %v5635_v8 = vor.u32 %v5916_v35, %v5632_v53  ;;  %v5498_v35 = vld [vmem:[#allocation15 + $0x18] sm:$0xf]  ;;  %v5884_v53 = vld [vmem:[#allocation15 + $0x20] sm:$0xf0] }
 0x57e   : > { %v2177_v16 = vmul.f32 %v7396_v20, %v7396_v20  ;;  %v2178_v10 = vmul.f32 %v7399_v40, %v7399_v40 }
 0x580   : > { %v2216_v14 = vadd.f32 %v2178_v10, %v2177_v16  ;;  %v5656_v16 = vld [vmem:[#allocation15 + $0x15c] sm:$0xf0] }
 0x581   : > { %v2086_v61 = vpop.xlane.xlu1 %2085  ;;  %v5659_v10 = vor.u32 %v5922_v4, %v5656_v16  ;;  %v5618_v4 = vld [vmem:[#allocation15 + $0x108] sm:$0xf] }
 0x582   : > { %v2123_v33 = vmul.f32 %v2086_v61, %v6934_v31  ;;  %2217 = vadd.xlane.f32.xlu0 %v2216_v14  ;;  %2106 = vadd.xlane.f32.xlu2 %v2105_v38  ;;  %v5546_v14 = vld [vmem:[#allocation15 + $0x78] sm:$0xf]  ;;  %v5896_v38 = vld [vmem:[#allocation15 + $0x80] sm:$0xf0] }
 0x583   : > { %v5642_v61 = vld [vmem:[#allocation15 + $0x138] sm:$0xf] }
 0x584   : > { %v7411_v41 = vsub.f32 %v7247_v56, %v2123_v33  ;;  %v7414_v12 = vsub.f32 %v7249_v43, %v2123_v33  ;;  %v5667_v56 = vor.u32 %v5926_v29, %v5666_v28  ;;  %v5925_v43 = vld [vmem:[#allocation15 + $0x16c] sm:$0xf]  ;;  %v5547_v33 = vor.u32 %v5896_v38, %v5546_v14  ;;  %v5919_v28 = vld [vmem:[#allocation15 + $0x13c] sm:$0xf]  ;;  %v5524_v38 = vld [vmem:[#allocation15 + $0x54] sm:$0xf0] }
 0x585   : > { %v5671_v22 = vor.u32 %v5925_v43, %v5668_v58  ;;  %v5647_v29 = vor.u32 %v5919_v28, %v5644_v52  ;;  %v5535_v43 = vor.u32 %v5893_v32, %v5534_v11  ;;  %v5917_v58 = vld [vmem:[#allocation15 + $0x128] sm:$0xf0]  ;;  %v5887_v28 = vld [vmem:[#allocation15 + $0x38] sm:$0xf0]  ;;  %v5606_v52 = vld [vmem:[#allocation15 + $0xf0] sm:$0xf] }
 0x586   : > { %v2179_v30 = vmul.f32 %v7411_v41, %v7411_v41  ;;  %v2180_v45 = vmul.f32 %v7414_v12, %v7414_v12  ;;  %2860 = vmatpush.bf16.msrb.mxu3 %v5667_v56  ;;  %2813 = vmatpush.bf16.msra.mxu2 %v5547_v33  ;;  %v5630_v56 = vld [vmem:[#allocation15 + $0x120] sm:$0xf]  ;;  %v5889_v14 = vld [vmem:[#allocation15 + $0x4c] sm:$0xf]  ;;  %v5911_v11 = vld [vmem:[#allocation15 + $0xf8] sm:$0xf0] }
 0x587   : > { %2958 = vmatpush.bf16.msra.mxu1 %v5671_v22  ;;  %v5892_v22 = vld [vmem:[#allocation15 + $0x64] sm:$0xf]  ;;  %v5631_v36 = vor.u32 %v5917_v58, %v5630_v56  ;;  %v7432_v33 = vor.u32 %v5889_v14, %v5524_v38  ;;  %v5886_v32 = vld [vmem:[#allocation15 + $0x34] sm:$0xf]  ;;  %v5512_v56 = vld [vmem:[#allocation15 + $0x3c] sm:$0xf0] }
 0x588   : > { %v2219_v46 = vadd.f32 %v2180_v45, %v2179_v30  ;;  %v5920_v30 = vld [vmem:[#allocation15 + $0x140] sm:$0xf0]  ;;  %v5895_v45 = vld [vmem:[#allocation15 + $0x7c] sm:$0xf]  ;;  %v7429_v54 = vor.u32 %v5892_v22, %v5536_v27  ;;  %v7435_v58 = vor.u32 %v5886_v32, %v5512_v56  ;;  %v5910_v22 = vld [vmem:[#allocation15 + $0xf4] sm:$0xf] }
 0x589   : > { %v5643_v47 = vor.u32 %v5920_v30, %v5642_v61  ;;  %v5913_v30 = vld [vmem:[#allocation15 + $0x10c] sm:$0xf]  ;;  %v5608_v27 = vld [vmem:[#allocation15 + $0xfc] sm:$0xf0]  ;;  %v5907_v38 = vld [vmem:[#allocation15 + $0xdc] sm:$0xf] }
 0x58a   : > { %2220 = vadd.xlane.f32.xlu0 %v2219_v46  ;;  %2861 = vmatpush.bf16.msrb.mxu3 %v5655_v5  ;;  %v5548_v46 = vld [vmem:[#allocation15 + $0x84] sm:$0xf0]  ;;  %v5890_v5 = vld [vmem:[#allocation15 + $0x50] sm:$0xf0] }
 0x58b   : > { %2959 = vmatpush.bf16.msra.mxu1 %v5659_v10  ;;  %v7426_v0 = vor.u32 %v5895_v45, %v5548_v46  ;;  %2814 = vmatpush.bf16.msra.mxu2 %v5535_v43  ;;  %v5523_v16 = vor.u32 %v5890_v5, %v5522_v42  ;;  %v5914_v10 = vld [vmem:[#allocation15 + $0x110] sm:$0xf0]  ;;  %v5620_v45 = vld [vmem:[#allocation15 + $0x114] sm:$0xf0]  ;;  %v5607_v43 = vor.u32 %v5911_v11, %v5606_v52  ;;  %v5908_v5 = vld [vmem:[#allocation15 + $0xe0] sm:$0xf0] }
 0x58c   : > { %v5619_v61 = vor.u32 %v5914_v10, %v5618_v4  ;;  %v5623_v46 = vor.u32 %v5913_v30, %v5620_v45  ;;  %v5499_v42 = vor.u32 %v5884_v53, %v5498_v35  ;;  %v5883_v4 = vld [vmem:[#allocation15 + $0x1c] sm:$0xf]  ;;  %v5486_v45 = vld [vmem:[#allocation15] sm:$0xf]  ;;  %v5905_v52 = vld [vmem:[#allocation15 + $0xc8] sm:$0xf0] }
 0x58d   : > { %2911 = vmatpush.bf16.msra.mxu0 %v7426_v0  ;;  %v5488_v11 = vld [vmem:[#allocation15 + $0xc] sm:$0xf0] }
 0x58e   : > { %2862 = vmatpush.bf16.msrb.mxu3 %v5643_v47  ;;  %v5510_v47 = vld [vmem:[#allocation15 + $0x30] sm:$0xf] }
 0x58f   : > { %2960 = vmatpush.bf16.msra.mxu1 %v5647_v29  ;;  %2815 = vmatpush.bf16.msra.mxu2 %v5523_v16  ;;  %v5511_v29 = vor.u32 %v5887_v28, %v5510_v47  ;;  %v5500_v16 = vld [vmem:[#allocation15 + $0x24] sm:$0xf0]  ;;  %v5582_v47 = vld [vmem:[#allocation15 + $0xc0] sm:$0xf] }
 0x590   : > { %v7438_v14 = vor.u32 %v5883_v4, %v5500_v16  ;;  %v5583_v56 = vor.u32 %v5905_v52, %v5582_v47 }
 0x591   : > { %2912 = vmatpush.bf16.msra.mxu0 %v7429_v54 }
 0x592   : > { %2863 = vmatpush.bf16.msrb.mxu3 %v5631_v36  ;;  %v5611_v36 = vor.u32 %v5910_v22, %v5608_v27  ;;  %v5904_v22 = vld [vmem:[#allocation15 + $0xc4] sm:$0xf]  ;;  %v5584_v27 = vld [vmem:[#allocation15 + $0xcc] sm:$0xf0] }
 0x593   : > { %2961 = vmatpush.bf16.msra.mxu1 %v5635_v8  ;;  %2816 = vmatpush.bf16.msra.mxu2 %v5511_v29  ;;  %v5594_v8 = vld [vmem:[#allocation15 + $0xd8] sm:$0xf]  ;;  %v5880_v29 = vld [vmem:[#allocation15 + $0x4] sm:$0xf]  ;;  %v5587_v35 = vor.u32 %v5904_v22, %v5584_v27 }
 0x594   : > { %v5595_v10 = vor.u32 %v5908_v5, %v5594_v8 }
 0x595   : > { %2913 = vmatpush.bf16.msra.mxu0 %v7432_v33 }
 0x596   : > { %2864 = vmatpush.bf16.msrb.mxu3 %v5619_v61  ;;  %v5596_v61 = vld [vmem:[#allocation15 + $0xe4] sm:$0xf0] }
 0x597   : > { %2962 = vmatpush.bf16.msra.mxu1 %v5623_v46  ;;  %2817 = vmatpush.bf16.msra.mxu2 %v5499_v42  ;;  %v5599_v30 = vor.u32 %v5907_v38, %v5596_v61  ;;  %v5881_v46 = vld [vmem:[#allocation15 + $0x8] sm:$0xf0] }
 0x598   : > { %v5487_v28 = vor.u32 %v5881_v46, %v5486_v45 }
 0x599   : > { %2914 = vmatpush.bf16.msra.mxu0 %v7435_v58 }
 0x59a   : > { %2865 = vmatpush.bf16.msrb.mxu3 %v5607_v43  ;;  %v7441_v43 = vor.u32 %v5880_v29, %v5488_v11 }
 0x59b   : > { %2963 = vmatpush.bf16.msra.mxu1 %v5611_v36  ;;  %2818 = vmatpush.bf16.msra.mxu2 %v5487_v28 }
 0x59d   : > { %2915 = vmatpush.bf16.msra.mxu0 %v7438_v14 }
 0x59e   : > { %2866 = vmatpush.bf16.msrb.mxu3 %v5595_v10 }
 0x59f   : > { %2964 = vmatpush.bf16.msra.mxu1 %v5599_v30  ;;  %5963 = vmatpush.bf16.msrb.mxu2 %v7420_v13 }
 0x5a1   : > { %2916 = vmatpush.bf16.msra.mxu0 %v7441_v43 }
 0x5a2   : > { %2867 = vmatpush.bf16.msrb.mxu3 %v5583_v56 }
 0x5a3   : > { %2965 = vmatpush.bf16.msra.mxu1 %v5587_v35  ;;  %5964 = vmatpush.bf16.msrb.mxu2 %v7423_v51 }
 0x5a7   : > { %5965 = vmatpush.bf16.msrb.mxu2 %v7426_v0 }
 0x5ab   : > { %5966 = vmatpush.bf16.msrb.mxu2 %v7429_v54 }
 0x5af   : > { %5967 = vmatpush.bf16.msrb.mxu2 %v7432_v33 }
 0x5b3   : > { %5968 = vmatpush.bf16.msrb.mxu2 %v7435_v58 }
 0x5b7   : > { %5969 = vmatpush.bf16.msrb.mxu2 %v7438_v14 }
 0x5bb   : > { %5970 = vmatpush.bf16.msrb.mxu2 %v7441_v43 }
 0x5bd   : > { %v2197_v32 = vpop.xlane.xlu2 %2196 }
 0x5be   : > { %v2243_v36 = vmul.f32 %v2197_v32, %v6934_v31 }
 0x5c0   : > { %v2259_v53 = vadd.f32 1e-05, %v2243_v36 }
 0x5c2   : > { %6135 = vrsqrt.f32 %v2259_v53  ;;  %vm2281_vm12 = vweird.f32 %v2259_v53 }
 0x5c5   : > { %v2089_v8 = vpop.xlane.xlu2 %2088  ;;  %v2200_v42 = vpop.xlane.xlu0 %2199 }
 0x5c6   : > { %v2124_v5 = vmul.f32 %v2089_v8, %v6934_v31  ;;  %v2244_v4 = vmul.f32 %v2200_v42, %v6934_v31 }
 0x5c8   : > { %v6136_v16 = vpop.eup %6135  ;;  %v7450_v10 = vsub.f32 %v7278_v19, %v2124_v5  ;;  %v7453_v38 = vsub.f32 %v7269_v9, %v2124_v5  ;;  %v2260_v61 = vadd.f32 1e-05, %v2244_v4 }
 0x5c9   : > { %v2276_v13 = vmul.f32 %v6136_v16, %v2259_v53  ;;  %vm2282_vm11 = vweird.f32 %v6136_v16 }
 0x5ca   : > { %6137 = vrsqrt.f32 %v2260_v61  ;;  %v2181_v51 = vmul.f32 %v7450_v10, %v7450_v10  ;;  %v2182_v30 = vmul.f32 %v7453_v38, %v7453_v38  ;;  %vm2283_vm13 = vmor %vm2281_vm12, %vm2282_vm11  ;;  %vm2291_vm15 = vweird.f32 %v2260_v61 }
 0x5cb   : > { %v2277_v45 = vmul.f32 %v6136_v16, %v2276_v13 }
 0x5cc   : > { %v2222_v46 = vadd.f32 %v2182_v30, %v2181_v51 }
 0x5cd   : > { %v2278_v19 = vmul.f32 0.5, %v2277_v45  ;;  %v2092_v47 = vpop.xlane.xlu2 %2091  ;;  %v2203_v28 = vpop.xlane.xlu0 %2202 }
 0x5ce   : > { %v2125_v9 = vmul.f32 %v2092_v47, %v6934_v31  ;;  %v2245_v52 = vmul.f32 %v2203_v28, %v6934_v31  ;;  %2223 = vadd.xlane.f32.xlu1 %v2222_v46 }
 0x5cf   : > { %v2279_v29 = vsub.f32 1.5, %v2278_v19 }
 0x5d0   : > { %v6138_v0 = vpop.eup %6137  ;;  %v7464_v11 = vsub.f32 %v7297_v17, %v2125_v9  ;;  %v7467_v32 = vsub.f32 %v7287_v59, %v2125_v9  ;;  %v7469_v56 = vadd.f32 1e-05, %v2245_v52 }
 0x5d1   : > { %v2286_v54 = vmul.f32 %v6138_v0, %v2260_v61  ;;  %v2280_v35 = vmul.f32 %v6136_v16, %v2279_v29  ;;  %vm2292_vm14 = vweird.f32 %v6138_v0 }
 0x5d2   : > { %6139 = vrsqrt.f32 %v7469_v56  ;;  %v2183_v22 = vmul.f32 %v7464_v11, %v7464_v11  ;;  %v2184_v27 = vmul.f32 %v7467_v32, %v7467_v32  ;;  %vm2293_vm0 = vmor %vm2291_vm15, %vm2292_vm14  ;;  %vm2301_vm2 = vweird.f32 %v7469_v56 }
 0x5d3   : > { %v2287_v36 = vmul.f32 %v6138_v0, %v2286_v54  ;;  %v2284_v51 = vsel %vm2283_vm13, %v6136_v16, %v2280_v35 }
 0x5d4   : > { %v2225_v17 = vadd.f32 %v2184_v27, %v2183_v22  ;;  %v2435_v28 = vmul.f32 %v2284_v51, %v7256_v26  ;;  %v2436_v14 = vmul.f32 %v2284_v51, %v7259_v3 }
 0x5d5   : > { %v2288_v59 = vmul.f32 0.5, %v2287_v36  ;;  %v2206_v8 = vpop.xlane.xlu1 %2205  ;;  %v2095_v42 = vpop.xlane.xlu0 %2094 }
 0x5d6   : > { %v2246_v33 = vmul.f32 %v2206_v8, %v6934_v31  ;;  %v2126_v5 = vmul.f32 %v2095_v42, %v6934_v31  ;;  %2226 = vadd.xlane.f32.xlu2 %v2225_v17 }
 0x5d7   : > { %v2289_v4 = vsub.f32 1.5, %v2288_v59 }
 0x5d8   : > { %v6140_v13 = vpop.eup %6139  ;;  %v2262_v30 = vadd.f32 1e-05, %v2246_v33  ;;  %v7481_v45 = vsub.f32 %v7318_v24, %v2126_v5  ;;  %v7484_v58 = vsub.f32 %v7309_v34, %v2126_v5 }
 0x5d9   : > { %v2290_v53 = vmul.f32 %v6138_v0, %v2289_v4  ;;  %v2296_v46 = vmul.f32 %v6140_v13, %v7469_v56  ;;  %vm2302_vm1 = vweird.f32 %v6140_v13 }
 0x5da   : > { %6141 = vrsqrt.f32 %v2262_v30  ;;  %v2185_v19 = vmul.f32 %v7481_v45, %v7481_v45  ;;  %v2186_v16 = vmul.f32 %v7484_v58, %v7484_v58  ;;  %vm2303_vm3 = vmor %vm2301_vm2, %vm2302_vm1  ;;  %vm2311_vm5 = vweird.f32 %v2262_v30 }
 0x5db   : > { %v2294_v47 = vsel %vm2293_vm0, %v6138_v0, %v2290_v53  ;;  %v2297_v24 = vmul.f32 %v6140_v13, %v2296_v46 }
 0x5dc   : > { %v2228_v34 = vadd.f32 %v2186_v16, %v2185_v19  ;;  %v2437_v9 = vmul.f32 %v2294_v47, %v7273_v25  ;;  %v2438_v61 = vmul.f32 %v2294_v47, %v7276_v55 }
 0x5dd   : > { %v2298_v52 = vmul.f32 0.5, %v2297_v24  ;;  %v2209_v29 = vpop.xlane.xlu1 %2208  ;;  %v2098_v54 = vpop.xlane.xlu0 %2097 }
 0x5de   : > { %v2247_v22 = vmul.f32 %v2209_v29, %v6934_v31  ;;  %v2127_v27 = vmul.f32 %v2098_v54, %v6934_v31  ;;  %2229 = vadd.xlane.f32.xlu0 %v2228_v34  ;;  %v7499_v0 = vpack.c.bf16 %v2437_v9, %v2435_v28  ;;  %v7501_v26 = vpack.c.bf16 %v2438_v61, %v2436_v14 }
 0x5df   : > { %v2299_v25 = vsub.f32 1.5, %v2298_v52 }
 0x5e0   : > { %v6142_v36 = vpop.eup %6141  ;;  %v7503_v35 = vadd.f32 1e-05, %v2247_v22  ;;  %v7506_v3 = vsub.f32 %v7339_v39, %v2127_v27  ;;  %v7509_v55 = vsub.f32 %v7330_v6, %v2127_v27  ;;  %2819 = vmatmul.bf16.vlgmr.msra.gmra.mxu2 %v7499_v0  ;;  %2868 = vmatmul.bf16.vlgmr.msrb.gmra.mxu3 %v7501_v26 }
 0x5e1   : > { %v2306_v43 = vmul.f32 %v6142_v36, %v2262_v30  ;;  %2917 = vmatmul.bf16.vlgmr.msra.gmra.mxu0 %v7499_v0  ;;  %2966 = vmatmul.bf16.vlgmr.msra.gmra.mxu1 %v7501_v26  ;;  %v2300_v6 = vmul.f32 %v6140_v13, %v2299_v25  ;;  %vm2312_vm4 = vweird.f32 %v6142_v36 }
 0x5e2   : > { %6143 = vrsqrt.f32 %v7503_v35  ;;  %v2187_v17 = vmul.f32 %v7506_v3, %v7506_v3  ;;  %v2188_v39 = vmul.f32 %v7509_v55, %v7509_v55  ;;  %vm2313_vm6 = vmor %vm2311_vm5, %vm2312_vm4  ;;  %vm2321_vm8 = vweird.f32 %v7503_v35 }
 0x5e3   : > { %v2307_v59 = vmul.f32 %v6142_v36, %v2306_v43  ;;  %v2304_v24 = vsel %vm2303_vm3, %v6140_v13, %v2300_v6 }
 0x5e4   : > { %v2231_v8 = vadd.f32 %v2188_v39, %v2187_v17  ;;  %v2439_v61 = vmul.f32 %v2304_v24, %v7291_v21  ;;  %v2440_v13 = vmul.f32 %v2304_v24, %v7294_v62 }
 0x5e5   : > { %v2308_v42 = vmul.f32 0.5, %v2307_v59  ;;  %v2101_v33 = vpop.xlane.xlu1 %2100  ;;  %v2212_v5 = vpop.xlane.xlu2 %2211 }
 0x5e6   : > { %v2128_v4 = vmul.f32 %v2101_v33, %v6934_v31  ;;  %v2248_v51 = vmul.f32 %v2212_v5, %v6934_v31  ;;  %2232 = vadd.xlane.f32.xlu1 %v2231_v8 }
 0x5e7   : > { %v2309_v53 = vsub.f32 1.5, %v2308_v42 }
 0x5e8   : > { %v6144_v46 = vpop.eup %6143  ;;  %v7524_v19 = vsub.f32 %v7360_v18, %v2128_v4  ;;  %v7527_v16 = vsub.f32 %v7351_v1, %v2128_v4  ;;  %v2264_v47 = vadd.f32 1e-05, %v2248_v51 }
 0x5e9   : > { %v2310_v28 = vmul.f32 %v6142_v36, %v2309_v53  ;;  %v2316_v56 = vmul.f32 %v6144_v46, %v7503_v35  ;;  %vm2322_vm7 = vweird.f32 %v6144_v46 }
 0x5ea   : > { %6145 = vrsqrt.f32 %v2264_v47  ;;  %v2189_v34 = vmul.f32 %v7524_v19, %v7524_v19  ;;  %v2190_v9 = vmul.f32 %v7527_v16, %v7527_v16  ;;  %vm2323_vm9 = vmor %vm2321_vm8, %vm2322_vm7  ;;  %vm2331_vm11 = vweird.f32 %v2264_v47 }
 0x5eb   : > { %v2317_v14 = vmul.f32 %v6144_v46, %v2316_v56  ;;  %v2314_v18 = vsel %vm2313_vm6, %v6142_v36, %v2310_v28 }
 0x5ec   : > { %v2234_v1 = vadd.f32 %v2190_v9, %v2189_v34  ;;  %v2441_v52 = vmul.f32 %v2314_v18, %v7313_v23  ;;  %v2442_v30 = vmul.f32 %v2314_v18, %v7316_v60 }
 0x5ed   : > { %v2318_v29 = vmul.f32 0.5, %v2317_v14  ;;  %v2104_v54 = vpop.xlane.xlu1 %2103  ;;  %v2215_v22 = vpop.xlane.xlu2 %2214 }
 0x5ee   : > { %v2129_v27 = vmul.f32 %v2104_v54, %v6934_v31  ;;  %v2249_v25 = vmul.f32 %v2215_v22, %v6934_v31  ;;  %2235 = vadd.xlane.f32.xlu2 %v2234_v1  ;;  %v7540_v43 = vpack.c.bf16 %v2441_v52, %v2439_v61  ;;  %v7542_v36 = vpack.c.bf16 %v2442_v30, %v2440_v13 }
 0x5ef   : > { %v2319_v17 = vsub.f32 1.5, %v2318_v29 }
 0x5f0   : > { %v6146_v21 = vpop.eup %6145  ;;  %v7545_v23 = vsub.f32 %v7381_v2, %v2129_v27  ;;  %v7548_v62 = vsub.f32 %v7372_v49, %v2129_v27  ;;  %v2265_v60 = vadd.f32 1e-05, %v2249_v25  ;;  %2824 = vmatmul.bf16.gmra.mxu2 %v7540_v43  ;;  %2873 = vmatmul.bf16.gmra.mxu3 %v7542_v36 }
 0x5f1   : > { %v2326_v39 = vmul.f32 %v6146_v21, %v2264_v47  ;;  %2922 = vmatmul.bf16.gmra.mxu0 %v7540_v43  ;;  %2971 = vmatmul.bf16.gmra.mxu1 %v7542_v36  ;;  %v2320_v49 = vmul.f32 %v6144_v46, %v2319_v17  ;;  %vm2332_vm10 = vweird.f32 %v6146_v21 }
 0x5f2   : > { %6147 = vrsqrt.f32 %v2265_v60  ;;  %v2191_v59 = vmul.f32 %v7545_v23, %v7545_v23  ;;  %v2192_v2 = vmul.f32 %v7548_v62, %v7548_v62  ;;  %vm2333_vm12 = vmor %vm2331_vm11, %vm2332_vm10  ;;  %vm2341_vm14 = vweird.f32 %v2265_v60 }
 0x5f3   : > { %v2327_v6 = vmul.f32 %v6146_v21, %v2326_v39  ;;  %v2324_v9 = vsel %vm2323_vm9, %v6144_v46, %v2320_v49 }
 0x5f4   : > { %v2237_v8 = vadd.f32 %v2192_v2, %v2191_v59  ;;  %v2444_v46 = vmul.f32 %v2324_v9, %v7337_v37 }
 0x5f5   : > { %v2328_v42 = vmul.f32 0.5, %v2327_v6  ;;  %v2107_v33 = vpop.xlane.xlu2 %2106  ;;  %v2218_v5 = vpop.xlane.xlu0 %2217 }
 0x5f6   : > { %v2130_v4 = vmul.f32 %v2107_v33, %v6934_v31  ;;  %v2250_v51 = vmul.f32 %v2218_v5, %v6934_v31  ;;  %2238 = vadd.xlane.f32.xlu0 %v2237_v8 }
 0x5f7   : > { %v2329_v53 = vsub.f32 1.5, %v2328_v42 }
 0x5f8   : > { %v6148_v24 = vpop.eup %6147  ;;  %v7562_v28 = vsub.f32 %v7401_v50, %v2130_v4  ;;  %v7565_v56 = vsub.f32 %v7393_v15, %v2130_v4  ;;  %v2266_v34 = vadd.f32 1e-05, %v2250_v51  ;;  %v2443_v50 = vmul.f32 %v2324_v9, %v7334_v7 }
 0x5f9   : > { %v2330_v14 = vmul.f32 %v6146_v21, %v2329_v53  ;;  %v2336_v35 = vmul.f32 %v6148_v24, %v2265_v60  ;;  %vm2342_vm13 = vweird.f32 %v6148_v24 }
 0x5fa   : > { %6149 = vrsqrt.f32 %v2266_v34  ;;  %v2193_v18 = vmul.f32 %v7562_v28, %v7562_v28  ;;  %v2194_v61 = vmul.f32 %v7565_v56, %v7565_v56  ;;  %vm2343_vm0 = vmor %vm2341_vm14, %vm2342_vm13  ;;  %vm2351_vm1 = vweird.f32 %v2266_v34 }
 0x5fb   : > { %v2337_v1 = vmul.f32 %v6148_v24, %v2336_v35  ;;  %v2334_v52 = vsel %vm2333_vm12, %v6146_v21, %v2330_v14 }
 0x5fc   : > { %v2240_v13 = vadd.f32 %v2194_v61, %v2193_v18  ;;  %v2445_v15 = vmul.f32 %v2334_v52, %v7355_v44  ;;  %v2446_v47 = vmul.f32 %v2334_v52, %v7358_v63 }
 0x5fd   : > { %v2338_v30 = vmul.f32 0.5, %v2337_v1  ;;  %v2221_v60 = vpop.xlane.xlu0 %2220 }
 0x5fe   : > { %2241 = vadd.xlane.f32.xlu1 %v2240_v13  ;;  %v7575_v29 = vpack.c.bf16 %v2445_v15, %v2443_v50  ;;  %v7577_v54 = vpack.c.bf16 %v2446_v47, %v2444_v46 }
 0x5ff   : > { %v2339_v27 = vsub.f32 1.5, %v2338_v30 }
 0x600   : > { %v6150_v22 = vpop.eup %6149  ;;  %2829 = vmatmul.bf16.gmra.mxu2 %v7575_v29  ;;  %2878 = vmatmul.bf16.gmra.mxu3 %v7577_v54 }
 0x601   : > { %v2346_v7 = vmul.f32 %v6150_v22, %v2266_v34  ;;  %2927 = vmatmul.bf16.gmra.mxu0 %v7575_v29  ;;  %2976 = vmatmul.bf16.gmra.mxu1 %v7577_v54  ;;  %v2340_v44 = vmul.f32 %v6148_v24, %v2339_v27  ;;  %vm2352_vm15 = vweird.f32 %v6150_v22 }
 0x602   : > { %vm2353_vm2 = vmor %vm2351_vm1, %vm2352_vm15 }
 0x603   : > { %v2347_v37 = vmul.f32 %v6150_v22, %v2346_v7  ;;  %v2344_v17 = vsel %vm2343_vm0, %v6148_v24, %v2340_v44 }
 0x604   : > { %v2447_v59 = vmul.f32 %v2344_v17, %v7376_v48  ;;  %v2448_v6 = vmul.f32 %v2344_v17, %v7379_v57  ;;  %v2251_v48 = vmul.f32 %v2221_v60, %v6934_v31  ;;  %v7613_v17 = vld [vmem:[%s8904_s6] sm:$0x7] }
 0x605   : > { %v2348_v63 = vmul.f32 0.5, %v2347_v37 }
 0x607   : > { %v2349_v25 = vsub.f32 1.5, %v2348_v63 }
 0x609   : > { %v2350_v21 = vmul.f32 %v6150_v22, %v2349_v25 }
 0x60b   : > { %v2354_v39 = vsel %vm2353_vm2, %v6150_v22, %v2350_v21 }
 0x60c   : > { %v2449_v2 = vmul.f32 %v2354_v39, %v7396_v20  ;;  %v2450_v49 = vmul.f32 %v2354_v39, %v7399_v40  ;;  %v2267_v20 = vadd.f32 1e-05, %v2251_v48 }
 0x60e   : > { %v7587_v8 = vpack.c.bf16 %v2449_v2, %v2447_v59  ;;  %v7589_v42 = vpack.c.bf16 %v2450_v49, %v2448_v6  ;;  %6151 = vrsqrt.f32 %v2267_v20  ;;  %vm2361_vm4 = vweird.f32 %v2267_v20 }
 0x610   : > { %2834 = vmatmul.bf16.gmra.mxu2 %v7587_v8  ;;  %2883 = vmatmul.bf16.gmra.mxu3 %v7589_v42 }
 0x611   : > { %2932 = vmatmul.bf16.gmra.mxu0 %v7587_v8  ;;  %2981 = vmatmul.bf16.gmra.mxu1 %v7589_v42 }
 0x614   : > { %v6152_v57 = vpop.eup %6151 }
 0x615   : > { %v2356_v33 = vmul.f32 %v6152_v57, %v2267_v20  ;;  %vm2362_vm3 = vweird.f32 %v6152_v57 }
 0x616   : > { %vm2363_vm6 = vmor %vm2361_vm4, %vm2362_vm3 }
 0x617   : > { %v2357_v51 = vmul.f32 %v6152_v57, %v2356_v33 }
 0x619   : > { %v2358_v53 = vmul.f32 0.5, %v2357_v51  ;;  %v5924_v51 = vld [vmem:[#allocation15 + $0x160] sm:$0xf0] }
 0x61b   : > { %v2359_v35 = vsub.f32 1.5, %v2358_v53 }
 0x61d   : > { %v2360_v1 = vmul.f32 %v6152_v57, %v2359_v35 }
 0x61f   : > { %v2364_v27 = vsel %vm2363_vm6, %v6152_v57, %v2360_v1 }
 0x620   : > { %v2451_v44 = vmul.f32 %v2364_v27, %v7411_v41  ;;  %v2452_v25 = vmul.f32 %v2364_v27, %v7414_v12  ;;  %v7621_v41 = vperm.slane %v7613_v17, 1  ;;  %v5927_v12 = vld [vmem:[#allocation15 + $0x178] sm:$0xf0] }
 0x641   : > { %v2224_v40 = vpop.xlane.xlu1 %2223 }
 0x642   : > { %v2252_v5 = vmul.f32 %v2224_v40, %v6934_v31 }
 0x644   : > { %v2268_v4 = vadd.f32 1e-05, %v2252_v5 }
 0x646   : > { %6153 = vrsqrt.f32 %v2268_v4  ;;  %vm2371_vm7 = vweird.f32 %v2268_v4 }
 0x649   : > { %v2227_v24 = vpop.xlane.xlu2 %2226 }
 0x64a   : > { %v2253_v34 = vmul.f32 %v2227_v24, %v6934_v31 }
 0x64c   : > { %v6154_v9 = vpop.eup %6153  ;;  %v7598_v14 = vadd.f32 1e-05, %v2253_v34  ;;  %v7632_v34 = vperm.slane %v7613_v17, 0 }
 0x64d   : > { %v2366_v18 = vmul.f32 %v6154_v9, %v2268_v4  ;;  %vm2372_vm5 = vweird.f32 %v6154_v9  ;;  %v5662_v4 = vld [vmem:[#allocation15 + $0x158] sm:$0xf] }
 0x64e   : > { %6155 = vrsqrt.f32 %v7598_v14  ;;  %vm2373_vm8 = vmor %vm2371_vm7, %vm2372_vm5  ;;  %vm2381_vm10 = vweird.f32 %v7598_v14 }
 0x64f   : > { %v2367_v61 = vmul.f32 %v6154_v9, %v2366_v18 }
 0x651   : > { %v2368_v52 = vmul.f32 0.5, %v2367_v61  ;;  %v2230_v50 = vpop.xlane.xlu0 %2229 }
 0x652   : > { %v2254_v13 = vmul.f32 %v2230_v50, %v6934_v31 }
 0x653   : > { %v2369_v15 = vsub.f32 1.5, %v2368_v52 }
 0x654   : > { %v6156_v46 = vpop.eup %6155  ;;  %v7602_v47 = vadd.f32 1e-05, %v2254_v13 }
 0x655   : > { %v2370_v30 = vmul.f32 %v6154_v9, %v2369_v15  ;;  %v2376_v22 = vmul.f32 %v6156_v46, %v7598_v14  ;;  %vm2382_vm9 = vweird.f32 %v6156_v46  ;;  %v5650_v15 = vld [vmem:[#allocation15 + $0x140] sm:$0xf] }
 0x656   : > { %6157 = vrsqrt.f32 %v7602_v47  ;;  %vm2383_vm11 = vmor %vm2381_vm10, %vm2382_vm9  ;;  %vm2391_vm13 = vweird.f32 %v7602_v47 }
 0x657   : > { %v2377_v7 = vmul.f32 %v6156_v46, %v2376_v22  ;;  %v2374_v37 = vsel %vm2373_vm8, %v6154_v9, %v2370_v30  ;;  %v5663_v9 = vor.u32 %v5924_v51, %v5662_v4  ;;  %v5921_v30 = vld [vmem:[#allocation15 + $0x148] sm:$0xf0]  ;;  %v5626_v4 = vld [vmem:[#allocation15 + $0x110] sm:$0xf] }
 0x658   : > { %v2453_v63 = vmul.f32 %v2374_v37, %v7450_v10  ;;  %v2454_v21 = vmul.f32 %v2374_v37, %v7453_v38  ;;  %v5674_v10 = vld [vmem:[#allocation15 + $0x170] sm:$0xf] }
 0x659   : > { %v2378_v39 = vmul.f32 0.5, %v2377_v7  ;;  %v2233_v59 = vpop.xlane.xlu1 %2232  ;;  %v5675_v20 = vor.u32 %v5927_v12, %v5674_v10 }
 0x65a   : > { %v2255_v2 = vmul.f32 %v2233_v59, %v6934_v31  ;;  %v7616_v6 = vpack.c.bf16 %v2453_v63, %v2451_v44  ;;  %v7618_v49 = vpack.c.bf16 %v2454_v21, %v2452_v25  ;;  %v5651_v44 = vor.u32 %v5921_v30, %v5650_v15 }
 0x65b   : > { %v2379_v38 = vsub.f32 1.5, %v2378_v39  ;;  %3056 = vmatpush.bf16.msra.mxu3 %v5675_v20 }
 0x65c   : > { %v6158_v60 = vpop.eup %6157  ;;  %v7623_v48 = vadd.f32 1e-05, %v2255_v2  ;;  %2839 = vmatmul.bf16.gmra.mxu2 %v7616_v6  ;;  %2888 = vmatmul.bf16.gmra.mxu3 %v7618_v49  ;;  %v5638_v2 = vld [vmem:[#allocation15 + $0x128] sm:$0xf] }
 0x65d   : > { %v2386_v57 = vmul.f32 %v6158_v60, %v7602_v47  ;;  %2986 = vmatmul.bf16.gmra.mxu1 %v7618_v49  ;;  %v2380_v53 = vmul.f32 %v6156_v46, %v2379_v38  ;;  %vm2392_vm12 = vweird.f32 %v6158_v60 }
 0x65e   : > { %6159 = vrsqrt.f32 %v7623_v48  ;;  %v2918_v33 = vpop.f32.mrf.mxu0  ;;  %v2967_v24 = vpop.f32.mrf.mxu1  ;;  %vm2393_vm14 = vmor %vm2391_vm13, %vm2392_vm12  ;;  %vm2401_vm0 = vweird.f32 %v7623_v48  ;;  %vm3356_vm12 = vcmask 130048  }
 0x65f   : > { %v2387_v40 = vmul.f32 %v6158_v60, %v2386_v57  ;;  %v2919_v5 = vadd.f32 %v2918_v33, %v7621_v41  ;;  %3057 = vmatpush.bf16.msra.mxu3 %v5663_v9  ;;  %v2384_v37 = vsel %vm2383_vm11, %v6156_v46, %v2380_v53  ;;  %v5918_v46 = vld [vmem:[#allocation15 + $0x130] sm:$0xf0] }
 0x660   : > { %v2455_v59 = vmul.f32 %v2384_v37, %v7464_v11  ;;  %v2456_v47 = vmul.f32 %v2384_v37, %v7467_v32  ;;  %v5639_v38 = vor.u32 %v5918_v46, %v5638_v2 }
 0x661   : > { %v2388_v35 = vmul.f32 0.5, %v2387_v40  ;;  %v7634_v18 = vadd.f32 %v2967_v24, %v2919_v5  ;;  %v2236_v61 = vpop.xlane.xlu2 %2235 }
 0x662   : > { %v2256_v1 = vmul.f32 %v2236_v61, %v6934_v31  ;;  %v5912_v61 = vld [vmem:[#allocation15 + $0x100] sm:$0xf0] }
 0x663   : > { %v2389_v52 = vsub.f32 1.5, %v2388_v35  ;;  %v2820_v50 = vpop.f32.mrf.mxu2  ;;  %v2869_v13 = vpop.f32.mrf.mxu3  ;;  %3058 = vmatpush.bf16.msra.mxu3 %v5651_v44  ;;  %v5614_v35 = vld [vmem:[#allocation15 + $0xf8] sm:$0xf]  ;;  %v5602_v44 = vld [vmem:[#allocation15 + $0xe0] sm:$0xf] }
 0x664   : > { %v7638_v22 = vpop.eup %6159  ;;  %v7640_v27 = vadd.f32 1e-05, %v2256_v1  ;;  %v2821_v7 = vadd.f32 %v2820_v50, %v7632_v34 }
 0x665   : > { %v2390_v63 = vmul.f32 %v6158_v60, %v2389_v52  ;;  %v2396_v14 = vmul.f32 %v7638_v22, %v7623_v48  ;;  %vm2402_vm15 = vweird.f32 %v7638_v22  ;;  %v5615_v52 = vor.u32 %v5912_v61, %v5614_v35 }
 0x666   : > { %6161 = vrsqrt.f32 %v7640_v27  ;;  %v7647_v25 = vadd.f32 %v2869_v13, %v2821_v7  ;;  %vm2403_vm1 = vmor %vm2401_vm0, %vm2402_vm15  ;;  %vm2411_vm3 = vweird.f32 %v7640_v27 }
 0x667   : > { %v2397_v21 = vmul.f32 %v7638_v22, %v2396_v14  ;;  %v2394_v39 = vsel %vm2393_vm14, %v6158_v60, %v2390_v63  ;;  %3059 = vmatpush.bf16.msra.mxu3 %v5639_v38  ;;  %v5909_v63 = vld [vmem:[#allocation15 + $0xe8] sm:$0xf0]  ;;  %v5590_v38 = vld [vmem:[#allocation15 + $0xc8] sm:$0xf] }
 0x668   : > { %v2457_v10 = vmul.f32 %v2394_v39, %v7481_v45  ;;  %v2458_v12 = vmul.f32 %v2394_v39, %v7484_v58  ;;  %v5915_v45 = vld [vmem:[#allocation15 + $0x118] sm:$0xf0]  ;;  %v5603_v2 = vor.u32 %v5909_v63, %v5602_v44 }
 0x669   : > { %v2398_v20 = vmul.f32 0.5, %v2397_v21  ;;  %v2239_v57 = vpop.xlane.xlu0 %2238  ;;  %v5627_v58 = vor.u32 %v5915_v45, %v5626_v4 }
 0x66a   : > { %v2257_v33 = vmul.f32 %v2239_v57, %v6934_v31  ;;  %v7655_v40 = vpack.c.bf16 %v2457_v10, %v2455_v59  ;;  %v7657_v5 = vpack.c.bf16 %v2458_v12, %v2456_v47 }
 0x66b   : > { %v7659_v60 = vpop.f32.mrf.mxu2  ;;  %v7661_v11 = vpop.f32.mrf.mxu3  ;;  %v2399_v32 = vsub.f32 1.5, %v2398_v20  ;;  %3060 = vmatpush.bf16.msra.mxu3 %v5627_v58  ;;  %v5906_v20 = vld [vmem:[#allocation15 + $0xd0] sm:$0xf0] }
 0x66c   : > { %v6162_v51 = vpop.eup %6161  ;;  %v7663_v53 = vadd.f32 1e-05, %v2257_v33  ;;  %2844 = vmatmul.bf16.gmra.mxu2 %v7655_v40  ;;  %2893 = vmatmul.bf16.gmra.mxu3 %v7657_v5 }
 0x66d   : > { %v2406_v24 = vmul.f32 %v6162_v51, %v7640_v27  ;;  %2991 = vmatmul.bf16.gmra.mxu1 %v7657_v5  ;;  %v2400_v1 = vmul.f32 %v7638_v22, %v2399_v32  ;;  %vm2412_vm2 = vweird.f32 %v6162_v51  ;;  %v5591_v27 = vor.u32 %v5906_v20, %v5590_v38  ;;  %v5897_v38 = vld [vmem:[#allocation15 + $0x88] sm:$0xf0] }
 0x66e   : > { %6163 = vrsqrt.f32 %v7663_v53  ;;  %vm2413_vm4 = vmor %vm2411_vm3, %vm2412_vm2  ;;  %vm2421_vm6 = vweird.f32 %v7663_v53 }
 0x66f   : > { %v2407_v9 = vmul.f32 %v6162_v51, %v2406_v24  ;;  %3061 = vmatpush.bf16.msra.mxu3 %v5615_v52  ;;  %v2404_v59 = vsel %vm2403_vm1, %v7638_v22, %v2400_v1 }
 0x670   : > { %v2459_v12 = vmul.f32 %v2404_v59, %v7506_v3  ;;  %v2460_v22 = vmul.f32 %v2404_v59, %v7509_v55 }
 0x671   : > { %v2408_v50 = vmul.f32 0.5, %v2407_v9  ;;  %v2242_v13 = vpop.xlane.xlu1 %2241 }
 0x672   : > { %v2258_v15 = vmul.f32 %v2242_v13, %v6934_v31 }
 0x673   : > { %v2409_v30 = vsub.f32 1.5, %v2408_v50  ;;  %v2825_v7 = vpop.f32.mrf.mxu2  ;;  %v2874_v37 = vpop.f32.mrf.mxu3  ;;  %3062 = vmatpush.bf16.msra.mxu3 %v5603_v2  ;;  %v5903_v2 = vld [vmem:[#allocation15 + $0xb8] sm:$0xf0] }
 0x674   : > { %v6164_v14 = vpop.eup %6163  ;;  %v2274_v21 = vadd.f32 1e-05, %v2258_v15  ;;  %v2826_v39 = vadd.f32 %v2825_v7, %v7632_v34 }
 0x675   : > { %v2410_v46 = vmul.f32 %v6162_v51, %v2409_v30  ;;  %v2416_v31 = vmul.f32 %v6164_v14, %v7663_v53  ;;  %vm2422_vm5 = vweird.f32 %v6164_v14 }
 0x676   : > { %6165 = vrsqrt.f32 %v2274_v21  ;;  %v7678_v48 = vadd.f32 %v2874_v37, %v2826_v39  ;;  %vm2423_vm8 = vmor %vm2421_vm6, %vm2422_vm5  ;;  %vm2431_vm9 = vweird.f32 %v2274_v21 }
 0x677   : > { %v2417_v10 = vmul.f32 %v6164_v14, %v2416_v31  ;;  %v2414_v47 = vsel %vm2413_vm4, %v6162_v51, %v2410_v46  ;;  %3063 = vmatpush.bf16.msra.mxu3 %v5591_v27  ;;  %v5566_v31 = vld [vmem:[#allocation15 + $0x98] sm:$0xf]  ;;  %v5530_v27 = vld [vmem:[#allocation15 + $0x50] sm:$0xf] }
 0x678   : > { %v2461_v57 = vmul.f32 %v2414_v47, %v7524_v19  ;;  %v2462_v33 = vmul.f32 %v2414_v47, %v7527_v16 }
 0x679   : > { %v2418_v4 = vmul.f32 0.5, %v2417_v10  ;;  %v5900_v10 = vld [vmem:[#allocation15 + $0xa0] sm:$0xf0] }
 0x67a   : > { %v7684_v45 = vpack.c.bf16 %v2461_v57, %v2459_v12  ;;  %v7686_v32 = vpack.c.bf16 %v2462_v33, %v2460_v22  ;;  %v5567_v47 = vor.u32 %v5900_v10, %v5566_v31  ;;  %v5554_v12 = vld [vmem:[#allocation15 + $0x80] sm:$0xf]  ;;  %v5542_v57 = vld [vmem:[#allocation15 + $0x68] sm:$0xf]  ;;  %v5894_v22 = vld [vmem:[#allocation15 + $0x70] sm:$0xf0] }
 0x67b   : > { %v7688_v58 = vpop.f32.mrf.mxu2  ;;  %v7690_v51 = vpop.f32.mrf.mxu3  ;;  %v2419_v19 = vsub.f32 1.5, %v2418_v4  ;;  %v5555_v20 = vor.u32 %v5897_v38, %v5554_v12  ;;  %v5543_v33 = vor.u32 %v5894_v22, %v5542_v57  ;;  %v5891_v4 = vld [vmem:[#allocation15 + $0x58] sm:$0xf0] }
 0x67c   : > { %v6166_v3 = vpop.eup %6165  ;;  %2849 = vmatmul.bf16.gmra.mxu2 %v7684_v45  ;;  %2898 = vmatmul.bf16.gmra.mxu3 %v7686_v32 }
 0x67d   : > { %v2426_v55 = vmul.f32 %v6166_v3, %v2274_v21  ;;  %2996 = vmatmul.bf16.gmra.mxu1 %v7686_v32  ;;  %v2420_v24 = vmul.f32 %v6164_v14, %v2419_v19  ;;  %vm2432_vm7 = vweird.f32 %v6166_v3  ;;  %v5888_v19 = vld [vmem:[#allocation15 + $0x40] sm:$0xf0] }
 0x67e   : > { %vm2433_vm10 = vmor %vm2431_vm9, %vm2432_vm7 }
 0x67f   : > { %v2427_v16 = vmul.f32 %v6166_v3, %v2426_v55  ;;  %v2424_v13 = vsel %vm2423_vm8, %v6164_v14, %v2420_v24  ;;  %v5885_v24 = vld [vmem:[#allocation15 + $0x28] sm:$0xf0] }
 0x680   : > { %v2463_v7 = vmul.f32 %v2424_v13, %v7545_v23  ;;  %v2464_v53 = vmul.f32 %v2424_v13, %v7548_v62 }
 0x681   : > { %v2428_v9 = vmul.f32 0.5, %v2427_v16  ;;  %v5506_v16 = vld [vmem:[#allocation15 + $0x20] sm:$0xf] }
 0x683   : > { %v2429_v35 = vsub.f32 1.5, %v2428_v9  ;;  %v2830_v61 = vpop.f32.mrf.mxu2  ;;  %v2879_v1 = vpop.f32.mrf.mxu3  ;;  %v5507_v9 = vor.u32 %v5885_v24, %v5506_v16 }
 0x684   : > { %v2831_v52 = vadd.f32 %v2830_v61, %v7632_v34  ;;  %v5882_v61 = vld [vmem:[#allocation15 + $0x10] sm:$0xf0] }
 0x685   : > { %v2430_v50 = vmul.f32 %v6166_v3, %v2429_v35  ;;  %v5494_v35 = vld [vmem:[#allocation15 + $0x8] sm:$0xf] }
 0x686   : > { %v7697_v15 = vadd.f32 %v2879_v1, %v2831_v52  ;;  %v5495_v1 = vor.u32 %v5882_v61, %v5494_v35 }
 0x687   : > { %v2434_v30 = vsel %vm2433_vm10, %v6166_v3, %v2430_v50  ;;  %v5518_v3 = vld [vmem:[#allocation15 + $0x38] sm:$0xf] }
 0x688   : > { %v2465_v37 = vmul.f32 %v2434_v30, %v7562_v28  ;;  %v2466_v44 = vmul.f32 %v2434_v30, %v7565_v56  ;;  %v5578_v56 = vld [vmem:[#allocation15 + $0xb0] sm:$0xf]  ;;  %v5519_v55 = vor.u32 %v5888_v19, %v5518_v3 }
 0x689   : > { %v5579_v46 = vor.u32 %v5903_v2, %v5578_v56 }
 0x68a   : > { %v7703_v63 = vpack.c.bf16 %v2465_v37, %v2463_v7  ;;  %v7705_v39 = vpack.c.bf16 %v2466_v44, %v2464_v53 }
 0x68b   : > { %v7707_v59 = vpop.f32.mrf.mxu2  ;;  %v7709_v21 = vpop.f32.mrf.mxu3  ;;  %3007 = vmatpush.bf16.msra.mxu2 %v5579_v46 }
 0x68c   : > { %2854 = vmatmul.bf16.gmra.mxu2 %v7703_v63  ;;  %2903 = vmatmul.bf16.gmra.mxu3 %v7705_v39 }
 0x68d   : > { %3001 = vmatmul.bf16.gmra.mxu1 %v7705_v39 }
 0x68f   : > { %3008 = vmatpush.bf16.msra.mxu2 %v5567_v47 }
 0x693   : > { %v2835_v23 = vpop.f32.mrf.mxu2  ;;  %v2884_v62 = vpop.f32.mrf.mxu3  ;;  %3009 = vmatpush.bf16.msra.mxu2 %v5555_v20 }
 0x694   : > { %v2836_v28 = vadd.f32 %v2835_v23, %v7632_v34 }
 0x696   : > { %v7715_v14 = vadd.f32 %v2884_v62, %v2836_v28 }
 0x697   : > { %3010 = vmatpush.bf16.msra.mxu2 %v5543_v33 }
 0x69b   : > { %v7727_v52 = vpop.f32.mrf.mxu2  ;;  %v7729_v50 = vpop.f32.mrf.mxu3 }
 0x69c   : > { %2937 = vmatmul.bf16.vlgmr.msrb.gmra.mxu2 %v7616_v6  ;;  %3064 = vmatmul.bf16.vlgmr.msra.gmra.mxu3 %v7501_v26  ;;  %v5531_v26 = vor.u32 %v5891_v4, %v5530_v27 }
 0x69e   : > { %3011 = vmatpush.bf16.msra.mxu2 %v5531_v26 }
 0x6a2   : > { %3012 = vmatpush.bf16.msra.mxu2 %v5519_v55 }
 0x6a6   : > { %3013 = vmatpush.bf16.msra.mxu2 %v5507_v9 }
 0x6aa   : > { %3014 = vmatpush.bf16.msra.mxu2 %v5495_v1 }
 0x6ac   : > { %2942 = vmatmul.bf16.gmra.mxu2 %v7655_v40  ;;  %3069 = vmatmul.bf16.gmra.mxu3 %v7542_v36  ;;  %v7725_v36 = vpop.f32.mrf.mxu1 }
 0x6b4   : > { %v7731_v13 = vpop.f32.mrf.mxu1 }
 0x6bc   : > { %2947 = vmatmul.bf16.gmra.mxu2 %v7684_v45  ;;  %3074 = vmatmul.bf16.gmra.mxu3 %v7577_v54  ;;  %v7736_v37 = vpop.f32.mrf.mxu1 }
 0x6c4   : > { %v7739_v62 = vpop.f32.mrf.mxu1 }
 0x6cc   : > { %2952 = vmatmul.bf16.gmra.mxu2 %v7703_v63  ;;  %3079 = vmatmul.bf16.gmra.mxu3 %v7589_v42  ;;  %v7743_v2 = vpop.f32.mrf.mxu1 }
 0x6d4   : > { %v7747_v12 = vpop.f32.mrf.mxu1 }
 0x6dc   : > { %3015 = vmatmul.bf16.vlgmr.msra.gmra.mxu2 %v7499_v0  ;;  %3084 = vmatmul.bf16.gmra.mxu3 %v7618_v49  ;;  %v7749_v57 = vpop.f32.mrf.mxu1 }
 0x6df   : > { %v2840_v30 = vpop.f32.mrf.mxu2  ;;  %v2889_v7 = vpop.f32.mrf.mxu3 }
 0x6e0   : > { %v2841_v54 = vadd.f32 %v2840_v30, %v7632_v34 }
 0x6e2   : > { %v2890_v53 = vadd.f32 %v2889_v7, %v2841_v54 }
 0x6e4   : > { %v2987_v22 = vpop.f32.mrf.mxu1 }
 0x6e7   : > { %v2842_v42 = vpop.f32.mrf.mxu2  ;;  %v2891_v44 = vpop.f32.mrf.mxu3 }
 0x6e8   : > { %v2843_v23 = vadd.f32 %v2842_v42, %v7632_v34 }
 0x6ea   : > { %v2892_v28 = vadd.f32 %v2891_v44, %v2843_v23 }
 0x6ec   : > { %v3109_v56 = vpack.c.bf16 %v2892_v28, %v2890_v53  ;;  %3020 = vmatmul.bf16.gmra.mxu2 %v7540_v43  ;;  %3089 = vmatmul.bf16.gmra.mxu3 %v7657_v5  ;;  %v2989_v55 = vpop.f32.mrf.mxu1 }
 0x6ef   : > { %v2845_v0 = vpop.f32.mrf.mxu2  ;;  %v2894_v49 = vpop.f32.mrf.mxu3 }
 0x6f0   : > { %v2846_v30 = vadd.f32 %v2845_v0, %v7632_v34  ;;  %v2838_v0 = vadd.f32 %v7727_v52, %v7632_v34 }
 0x6f2   : > { %v2895_v42 = vadd.f32 %v2894_v49, %v2846_v30  ;;  %v2887_v49 = vadd.f32 %v7729_v50, %v2838_v0 }
 0x6f4   : > { %v7763_v7 = vpop.f32.mrf.mxu1 }
 0x6f7   : > { %v2847_v46 = vpop.f32.mrf.mxu2  ;;  %v2896_v31 = vpop.f32.mrf.mxu3 }
 0x6f8   : > { %v2848_v61 = vadd.f32 %v2847_v46, %v7632_v34 }
 0x6fa   : > { %v2897_v54 = vadd.f32 %v2896_v31, %v2848_v61 }
 0x6fc   : > { %3025 = vmatmul.bf16.gmra.mxu2 %v7575_v29  ;;  %3094 = vmatmul.bf16.gmra.mxu3 %v7686_v32  ;;  %v3110_v23 = vpack.c.bf16 %v2897_v54, %v2895_v42 }
 0x6ff   : > { %v2850_v10 = vpop.f32.mrf.mxu2  ;;  %v2899_v47 = vpop.f32.mrf.mxu3 }
 0x707   : > { %v2852_v38 = vpop.f32.mrf.mxu2  ;;  %v2901_v20 = vpop.f32.mrf.mxu3 }
 0x708   : > { %v2853_v3 = vadd.f32 %v2852_v38, %v7632_v34 }
 0x70a   : > { %v2902_v16 = vadd.f32 %v2901_v20, %v2853_v3  ;;  %v2833_v20 = vadd.f32 %v7707_v59, %v7632_v34  ;;  %v1304_v3 = vld [vmem:[#allocation6 + $0x10] sm:$0xff] }
 0x70c   : > { %3030 = vmatmul.bf16.gmra.mxu2 %v7587_v8  ;;  %3099 = vmatmul.bf16.gmra.mxu3 %v7705_v39  ;;  %v2851_v8 = vadd.f32 %v2850_v10, %v7632_v34  ;;  %v2994_v10 = vpop.f32.mrf.mxu1  ;;  %v2882_v52 = vadd.f32 %v7709_v21, %v2833_v20 }
 0x70e   : > { %v2900_v9 = vadd.f32 %v2899_v47, %v2851_v8  ;;  %v7773_v47 = vpop.f32.mrf.mxu0  ;;  %v3107_v50 = vpack.c.bf16 %v2882_v52, %v7697_v15 }
 0x70f   : > { %v2855_v43 = vpop.f32.mrf.mxu2  ;;  %v2904_v5 = vpop.f32.mrf.mxu3 }
 0x710   : > { %v2856_v33 = vadd.f32 %v2855_v43, %v7632_v34  ;;  %v3111_v1 = vpack.c.bf16 %v2902_v16, %v2900_v9 }
 0x712   : > { %v2905_v4 = vadd.f32 %v2904_v5, %v2856_v33 }
 0x714   : > { %v2997_v38 = vpop.f32.mrf.mxu1 }
 0x716   : > { %v7780_v43 = vpop.f32.mrf.mxu0 }
 0x717   : > { %v2857_v29 = vpop.f32.mrf.mxu2  ;;  %v2906_v27 = vpop.f32.mrf.mxu3 }
 0x718   : > { %v2858_v32 = vadd.f32 %v2857_v29, %v7632_v34 }
 0x71a   : > { %v2907_v26 = vadd.f32 %v2906_v27, %v2858_v32 }
 0x71c   : > { %v3112_v19 = vpack.c.bf16 %v2907_v26, %v2905_v4  ;;  %3035 = vmatmul.bf16.gmra.mxu2 %v7616_v6  ;;  %v2999_v33 = vpop.f32.mrf.mxu1 }
 0x71e   : > { %3287 = vmatpush.bf16.xpose.msrb.mxu2 %v3112_v19  ;;  %v1307_v19 = vld [vmem:[#allocation6 + $0x18] sm:$0xff] }
 0x71f   : > { %v2938_v39 = vpop.f32.mrf.mxu2 }
 0x720   : > { %v2939_v24 = vadd.f32 %v2938_v39, %v7621_v41 }
 0x722   : > { %v7759_v35 = vadd.f32 %v2987_v22, %v2939_v24  ;;  %v3065_v22 = vpop.f32.mrf.mxu3 }
 0x724   : > { %v3002_v27 = vpop.f32.mrf.mxu1 }
 0x726   : > { %3288 = vmatpush.bf16.xpose.msrb.mxu2 %v3111_v1 }
 0x727   : > { %v2940_v6 = vpop.f32.mrf.mxu2 }
 0x728   : > { %v2941_v53 = vadd.f32 %v2940_v6, %v7621_v41 }
 0x72a   : > { %v7766_v44 = vadd.f32 %v2989_v55, %v2941_v53  ;;  %v3067_v21 = vpop.f32.mrf.mxu3 }
 0x72c   : > { %3040 = vmatmul.bf16.gmra.mxu2 %v7655_v40  ;;  %v3117_v28 = vpack.c.bf16 %v7766_v44, %v7759_v35  ;;  %v3108_v40 = vpack.c.bf16 %v2887_v49, %v7715_v14  ;;  %v7787_v14 = vpop.f32.mrf.mxu0 }
 0x72e   : > { %3289 = vmatpush.bf16.xpose.msrb.mxu2 %v3110_v23 }
 0x72f   : > { %v2943_v46 = vpop.f32.mrf.mxu2 }
 0x730   : > { %v2944_v0 = vadd.f32 %v2943_v46, %v7621_v41 }
 0x732   : > { %v3070_v55 = vpop.f32.mrf.mxu3 }
 0x734   : > { %v2928_v4 = vpop.f32.mrf.mxu0 }
 0x736   : > { %3290 = vmatpush.bf16.xpose.msrb.mxu2 %v3109_v56  ;;  %v2828_v56 = vadd.f32 %v7688_v58, %v7632_v34 }
 0x737   : > { %v2945_v31 = vpop.f32.mrf.mxu2 }
 0x738   : > { %v2877_v59 = vadd.f32 %v7690_v51, %v2828_v56  ;;  %v2946_v42 = vadd.f32 %v2945_v31, %v7621_v41 }
 0x73a   : > { %v3106_v32 = vpack.c.bf16 %v2877_v59, %v7678_v48  ;;  %v3004_v48 = vpop.f32.mrf.mxu1  ;;  %v3072_v6 = vpop.f32.mrf.mxu3  ;;  %v2995_v20 = vadd.f32 %v2994_v10, %v2946_v42 }
 0x73c   : > { %3045 = vmatmul.bf16.gmra.mxu2 %v7684_v45  ;;  %v2823_v45 = vadd.f32 %v7659_v60, %v7632_v34 }
 0x73e   : > { %3291 = vmatpush.bf16.xpose.msrb.mxu2 %v3108_v40  ;;  %v2872_v15 = vadd.f32 %v7661_v11, %v2823_v45  ;;  %v7799_v11 = vperm.slane %v7613_v17, 2 }
 0x73f   : > { %v2948_v5 = vpop.f32.mrf.mxu2 }
 0x740   : > { %v3105_v26 = vpack.c.bf16 %v2872_v15, %v7647_v25  ;;  %v2930_v25 = vpop.f32.mrf.mxu0  ;;  %v2949_v9 = vadd.f32 %v2948_v5, %v7621_v41  ;;  %v2993_v5 = vadd.f32 %v7763_v7, %v2944_v0 }
 0x742   : > { %v2998_v54 = vadd.f32 %v2997_v38, %v2949_v9  ;;  %v3075_v56 = vpop.f32.mrf.mxu3 }
 0x746   : > { %3292 = vmatpush.bf16.xpose.msrb.mxu2 %v3107_v50  ;;  %v3118_v50 = vpack.c.bf16 %v2995_v20, %v2993_v5 }
 0x747   : > { %v2950_v29 = vpop.f32.mrf.mxu2 }
 0x748   : > { %v2951_v16 = vadd.f32 %v2950_v29, %v7621_v41  ;;  %v2933_v17 = vpop.f32.mrf.mxu0 }
 0x749   : > { %v2934_v59 = vadd.f32 %v2933_v17, %v7621_v41 }
 0x74a   : > { %v3000_v1 = vadd.f32 %v2999_v33, %v2951_v16  ;;  %v3077_v29 = vpop.f32.mrf.mxu3 }
 0x74c   : > { %3050 = vmatmul.bf16.gmra.mxu2 %v7703_v63  ;;  %v1310_v63 = vpack.c.bf16 %v1307_v19, %v1304_v3  ;;  %v3119_v23 = vpack.c.bf16 %v3000_v1, %v2998_v54  ;;  %v2926_v19 = vadd.f32 %v7787_v14, %v7621_v41 }
 0x74e   : > { %3293 = vmatpush.bf16.xpose.msrb.mxu2 %v3106_v32 }
 0x74f   : > { %v2953_v58 = vpop.f32.mrf.mxu2 }
 0x750   : > { %v2954_v51 = vadd.f32 %v2953_v58, %v7621_v41  ;;  %v2935_v46 = vpop.f32.mrf.mxu0  ;;  %v2931_v58 = vadd.f32 %v2930_v25, %v7621_v41 }
 0x751   : > { %v2936_v10 = vadd.f32 %v2935_v46, %v7621_v41 }
 0x752   : > { %v3003_v8 = vadd.f32 %v3002_v27, %v2954_v51  ;;  %v2929_v51 = vadd.f32 %v2928_v4, %v7621_v41  ;;  %v3080_v35 = vpop.f32.mrf.mxu3 }
 0x753   : > { %v2985_v45 = vadd.f32 %v7749_v57, %v2936_v10 }
 0x754   : > { %v2978_v3 = vadd.f32 %v7739_v62, %v2929_v51  ;;  %v2921_v62 = vadd.f32 %v7773_v47, %v7621_v41 }
 0x756   : > { %3294 = vmatpush.bf16.xpose.msrb.mxu2 %v3105_v26  ;;  %v2970_v16 = vadd.f32 %v7725_v36, %v2921_v62 }
 0x757   : > { %v2955_v34 = vpop.f32.mrf.mxu2 }
 0x758   : > { %v2956_v60 = vadd.f32 %v2955_v34, %v7621_v41  ;;  %v2924_v34 = vadd.f32 %v7780_v43, %v7621_v41  ;;  %v3113_v9 = vpack.c.bf16 %v2970_v16, %v7634_v18 }
 0x75a   : > { %v3005_v39 = vadd.f32 %v3004_v48, %v2956_v60  ;;  %v2975_v60 = vadd.f32 %v7736_v37, %v2926_v19 }
 0x75c   : > { %v3120_v24 = vpack.c.bf16 %v3005_v39, %v3003_v8 }
 0x75d   : > { %3295 = vmatmul.bf16.vlgmr.msrb.gmra.mxu2 %v1310_v63  ;;  %v2973_v63 = vadd.f32 %v7731_v13, %v2924_v34 }
 0x75e   : > { %3185 = vmatpush.bf16.xpose.msrb.mxu0 %v3120_v24 }
 0x75f   : > { %v3016_v61 = vpop.f32.mrf.mxu2  ;;  %v3114_v39 = vpack.c.bf16 %v2975_v60, %v2973_v63 }
 0x760   : > { %v3017_v30 = vadd.f32 %v3016_v61, %v7799_v11 }
 0x762   : > { %v7803_v53 = vadd.f32 %v3065_v22, %v3017_v30 }
 0x766   : > { %3186 = vmatpush.bf16.xpose.msrb.mxu0 %v3119_v23 }
 0x767   : > { %v3018_v49 = vpop.f32.mrf.mxu2 }
 0x768   : > { %v3019_v40 = vadd.f32 %v3018_v49, %v7799_v11 }
 0x76a   : > { %v7809_v52 = vadd.f32 %v3067_v21, %v3019_v40  ;;  %v2983_v21 = vadd.f32 %v7747_v12, %v2934_v59 }
 0x76c   : > { %v3121_v38 = vpack.c.bf16 %v7809_v52, %v7803_v53  ;;  %v3116_v15 = vpack.c.bf16 %v2985_v45, %v2983_v21 }
 0x76e   : > { %3187 = vmatpush.bf16.xpose.msrb.mxu0 %v3118_v50 }
 0x76f   : > { %v3021_v31 = vpop.f32.mrf.mxu2 }
 0x770   : > { %v3022_v22 = vadd.f32 %v3021_v31, %v7799_v11  ;;  %v3129_v31 = vlaneseq }
 0x772   : > { %v7814_v33 = vadd.f32 %v3070_v55, %v3022_v22 }
 0x776   : > { %3188 = vmatpush.bf16.xpose.msrb.mxu0 %v3117_v28  ;;  %v2980_v28 = vadd.f32 %v7743_v2, %v2931_v58  ;;  %v3082_v2 = vpop.f32.mrf.mxu3 }
 0x777   : > { %v3023_v7 = vpop.f32.mrf.mxu2 }
 0x778   : > { %v3024_v32 = vadd.f32 %v3023_v7, %v7799_v11  ;;  %v3115_v55 = vpack.c.bf16 %v2980_v28, %v2978_v3 }
 0x77a   : > { %v7824_v27 = vadd.f32 %v3072_v6, %v3024_v32  ;;  %v7858_v32 = vshrl.u32 %v3129_v31, 7 }
 0x77c   : > { %v3122_v26 = vpack.c.bf16 %v7824_v27, %v7814_v33  ;;  %vm3285_vm11 = vcmp.lt.s32.totalorder %v7858_v32, 4 }
 0x77e   : > { %3189 = vmatpush.bf16.xpose.msrb.mxu0 %v3116_v15  ;;  %v3085_v25 = vpop.f32.mrf.mxu3 }
 0x77f   : > { %v3026_v44 = vpop.f32.mrf.mxu2 }
 0x780   : > { %v3027_v57 = vadd.f32 %v3026_v44, %v7799_v11 }
 0x782   : > { %v7833_v12 = vadd.f32 %v3075_v56, %v3027_v57 }
 0x786   : > { %3190 = vmatpush.bf16.xpose.msrb.mxu0 %v3115_v55  ;;  %v3087_v47 = vpop.f32.mrf.mxu3 }
 0x787   : > { %v3028_v4 = vpop.f32.mrf.mxu2 }
 0x788   : > { %v3029_v48 = vadd.f32 %v3028_v4, %v7799_v11 }
 0x78a   : > { %v7842_v8 = vadd.f32 %v3077_v29, %v3029_v48 }
 0x78c   : > { %v3123_v14 = vpack.c.bf16 %v7842_v8, %v7833_v12 }
 0x78e   : > { %3191 = vmatpush.bf16.xpose.msrb.mxu0 %v3114_v39  ;;  %v3090_v42 = vpop.f32.mrf.mxu3 }
 0x78f   : > { %v3031_v43 = vpop.f32.mrf.mxu2 }
 0x790   : > { %v3032_v37 = vadd.f32 %v3031_v43, %v7799_v11 }
 0x792   : > { %v3081_v24 = vadd.f32 %v3080_v35, %v3032_v37 }
 0x796   : > { %3192 = vmatpush.bf16.xpose.msrb.mxu0 %v3113_v9  ;;  %v3092_v0 = vpop.f32.mrf.mxu3 }
 0x797   : > { %v3033_v13 = vpop.f32.mrf.mxu2 }
 0x798   : > { %v3034_v61 = vadd.f32 %v3033_v13, %v7799_v11  ;;  %v1305_v13 = vld [vmem:[#allocation6 + $0x8] sm:$0xff] }
 0x79a   : > { %v3083_v1 = vadd.f32 %v3082_v2, %v3034_v61  ;;  %v1308_v61 = vld [vmem:[#allocation6 + $0x20] sm:$0xff] }
 0x79c   : > { %v3124_v41 = vpack.c.bf16 %v3083_v1, %v3081_v24 }
 0x79e   : > { %v3095_v49 = vpop.f32.mrf.mxu3 }
 0x79f   : > { %v3036_v30 = vpop.f32.mrf.mxu2 }
 0x7a0   : > { %v3037_v6 = vadd.f32 %v3036_v30, %v7799_v11 }
 0x7a2   : > { %v3086_v54 = vadd.f32 %v3085_v25, %v3037_v6 }
 0x7a6   : > { %v3097_v40 = vpop.f32.mrf.mxu3 }
 0x7a7   : > { %v3038_v23 = vpop.f32.mrf.mxu2 }
 0x7a8   : > { %v3039_v44 = vadd.f32 %v3038_v23, %v7799_v11 }
 0x7aa   : > { %v3088_v4 = vadd.f32 %v3087_v47, %v3039_v44 }
 0x7ac   : > { %v3125_v62 = vpack.c.bf16 %v3088_v4, %v3086_v54 }
 0x7ae   : > { %v3100_v5 = vpop.f32.mrf.mxu3 }
 0x7af   : > { %v3041_v36 = vpop.f32.mrf.mxu2 }
 0x7b0   : > { %v3042_v51 = vadd.f32 %v3041_v36, %v7799_v11 }
 0x7b2   : > { %v3091_v55 = vadd.f32 %v3090_v42, %v3042_v51 }
 0x7b6   : > { %v3102_v29 = vpop.f32.mrf.mxu3 }
 0x7b7   : > { %v3043_v17 = vpop.f32.mrf.mxu2 }
 0x7b8   : > { %v3044_v21 = vadd.f32 %v3043_v17, %v7799_v11 }
 0x7ba   : > { %v3093_v28 = vadd.f32 %v3092_v0, %v3044_v21 }
 0x7bc   : > { %v3126_v48 = vpack.c.bf16 %v3093_v28, %v3091_v55 }
 0x7bf   : > { %v3046_v20 = vpop.f32.mrf.mxu2 }
 0x7c0   : > { %v3047_v59 = vadd.f32 %v3046_v20, %v7799_v11 }
 0x7c2   : > { %v3096_v35 = vadd.f32 %v3095_v49, %v3047_v59 }
 0x7c7   : > { %v3048_v18 = vpop.f32.mrf.mxu2 }
 0x7c8   : > { %v3049_v46 = vadd.f32 %v3048_v18, %v7799_v11 }
 0x7ca   : > { %v3098_v58 = vadd.f32 %v3097_v40, %v3049_v46 }
 0x7cc   : > { %v3127_v3 = vpack.c.bf16 %v3098_v58, %v3096_v35 }
 0x7cf   : > { %v3051_v56 = vpop.f32.mrf.mxu2 }
 0x7d0   : > { %v3052_v50 = vadd.f32 %v3051_v56, %v7799_v11 }
 0x7d2   : > { %v3101_v7 = vadd.f32 %v3100_v5, %v3052_v50 }
 0x7d7   : > { %v3053_v22 = vpop.f32.mrf.mxu2 }
 0x7d8   : > { %v3054_v10 = vadd.f32 %v3053_v22, %v7799_v11 }
 0x7da   : > { %v3103_v45 = vadd.f32 %v3102_v29, %v3054_v10 }
 0x7dc   : > { %v3128_v15 = vpack.c.bf16 %v3103_v45, %v3101_v7  ;;  %v6664_v7 = vmov 128.0  }
 0x7de   : > { %3265 = vmatpush.bf16.msrb.mxu1 %v3128_v15 }
 0x7e0   : > { %v3296_v57 = vpop.f32.mrf.mxu2 }
 0x7e1   : > { %v3305_v19 = vsel %vm3285_vm11, %v3296_v57, -1e+30 }
 0x7e2   : > { %v3307_v34 = vmax.f32 %v3305_v19, -1e+30  ;;  %3266 = vmatpush.bf16.msrb.mxu1 %v3127_v3 }
 0x7e4   : > { %v3308_v60 = vrot.slane %v3307_v34, 4 }
 0x7e6   : > { %v3309_v2 = vmax.f32 %v3307_v34, %v3308_v60  ;;  %3267 = vmatpush.bf16.msrb.mxu1 %v3126_v48 }
 0x7e8   : > { %v3310_v63 = vrot.slane %v3309_v2, 2  ;;  %v3298_v39 = vpop.f32.mrf.mxu2 }
 0x7ea   : > { %v3311_v43 = vmax.f32 %v3309_v2, %v3310_v63  ;;  %3268 = vmatpush.bf16.msrb.mxu1 %v3125_v62 }
 0x7ec   : > { %v3312_v16 = vrot.slane %v3311_v43, 1 }
 0x7ee   : > { %v3313_v37 = vmax.f32 %v3311_v43, %v3312_v16  ;;  %3269 = vmatpush.bf16.msrb.mxu1 %v3124_v41  ;;  %v1311_v41 = vpack.c.bf16 %v1308_v61, %v1305_v13 }
 0x7f0   : > { %v3314_v11 = vsub.f32 %v3305_v19, %v3313_v37  ;;  %v3315_v24 = vsub.f32 -1e+30, %v3313_v37  ;;  %3388 = vmatpush.bf16.msrb.mxu3 %v1311_v41 }
 0x7f2   : > { %v3316_v25 = vmul.f32 1.442695, %v3314_v11  ;;  %v3318_v9 = vmul.f32 1.442695, %v3315_v24  ;;  %3270 = vmatpush.bf16.msrb.mxu1 %v3123_v14 }
 0x7f4   : > { %6167 = vpow2.f32 %v3316_v25 }
 0x7f5   : > { %6169 = vpow2.f32 %v3318_v9 }
 0x7f6   : > { %3271 = vmatpush.bf16.msrb.mxu1 %v3122_v26 }
 0x7fa   : > { %v6168_v1 = vpop.eup %6167  ;;  %3272 = vmatpush.bf16.msrb.mxu1 %v3121_v38 }
 0x7fb   : > { %v6170_v47 = vpop.eup %6169 }
 0x7fc   : > { %v3320_v30 = vadd.f32 %v6170_v47, %v6168_v1 }
 0x7fe   : > { %v3321_v12 = vrot.slane %v3320_v30, 4 }
 0x800   : > { %v3322_v8 = vadd.f32 %v3321_v12, %v3320_v30 }
 0x802   : > { %v3323_v14 = vrot.slane %v3322_v8, 2 }
 0x804   : > { %v3324_v6 = vadd.f32 %v3323_v14, %v3322_v8 }
 0x806   : > { %v3325_v54 = vrot.slane %v3324_v6, 1 }
 0x808   : > { %v3326_v42 = vadd.f32 %v3325_v54, %v3324_v6  ;;  %v5935_v54 = vld [vmem:[#allocation17 + $0x38] sm:$0xff] }
 0x809   : > { %3833 = vmatpush.bf16.msra.mxu0 %v5935_v54 }
 0x80a   : > { %6171 = vrcp.f32 %v3326_v42  ;;  %v5934_v42 = vld [vmem:[#allocation17 + $0x30] sm:$0xff] }
 0x80b   : > { %6173 = vrcp.f32 %v6664_v7 }
 0x80d   : > { %3834 = vmatpush.bf16.msra.mxu0 %v5934_v42 }
 0x810   : > { %v6172_v33 = vpop.eup %6171 }
 0x811   : > { %v3328_v27 = vmul.f32 %v6172_v33, %v6168_v1  ;;  %v3329_v26 = vmul.f32 %v6172_v33, %v6170_v47  ;;  %v6174_v45 = vpop.eup %6173  ;;  %v5933_v33 = vld [vmem:[#allocation17 + $0x28] sm:$0xff] }
 0x812   : > { %v3463_v21 = vmul.f32 128.0, %v6174_v45  ;;  %vm3467_vm13 = vweird.f32 %v6174_v45  ;;  %3835 = vmatpush.bf16.msra.mxu0 %v5933_v33 }
 0x813   : > { %v3330_v23 = vpack.c.bf16 %v3328_v27, %v3328_v27  ;;  %v3331_v36 = vpack.c.bf16 %v3329_v26, %v3329_v26  ;;  %v5953_v0 = vpack.c.bf16 %v3329_v26, %v3328_v27  ;;  %v5932_v27 = vld [vmem:[#allocation17 + $0x20] sm:$0xff]  ;;  %v1303_v26 = vld [vmem:[#allocation6 + $0x28] sm:$0xff] }
 0x814   : > { %v3464_v58 = vsub.f32 1.0, %v3463_v21 }
 0x815   : > { %5954 = vst [vmem:[%s667_s25] sm:$0xff] %v5953_v0   ;;  %v3336_v53 = vunpack.c.l.b16 %v3330_v23  ;;  %v3337_v52 = vunpack.c.l.b16 %v3331_v36  ;;  %v1306_v23 = vld [vmem:[#allocation6] sm:$0xff]  ;;  %v5931_v0 = vld [vmem:[#allocation17 + $0x18] sm:$0xff] }
 0x816   : > { %v3465_v51 = vmul.f32 %v6174_v45, %v3464_v58  ;;  %3836 = vmatpush.bf16.msra.mxu0 %v5932_v27  ;;  %v1309_v36 = vpack.c.bf16 %v1306_v23, %v1303_v26 }
 0x817   : > { %v3338_v38 = vpack.c.b16 %v3337_v52, %v3336_v53  ;;  %v5930_v53 = vld [vmem:[#allocation17 + $0x10] sm:$0xff]  ;;  %v5929_v52 = vld [vmem:[#allocation17 + $0x8] sm:$0xff] }
 0x818   : > { %v3466_v35 = vadd.f32 %v6174_v45, %v3465_v51  ;;  %3193 = vmatmul.bf16.vlgmr.msrb.gmra.mxu0 %v1309_v36 }
 0x819   : > { %3340 = vxpose.xlu2.c.b16.start.end [1/1] (short) %v3338_v38, 128  ;;  %v5928_v38 = vld [vmem:[#allocation17] sm:$0xff] }
 0x81a   : > { %v7883_v44 = vsel %vm3467_vm13, %v6174_v45, %v3466_v35  ;;  %3837 = vmatpush.bf16.msra.mxu0 %v5931_v0 }
 0x81e   : > { %3838 = vmatpush.bf16.msra.mxu0 %v5930_v53 }
 0x822   : > { %3839 = vmatpush.bf16.msra.mxu0 %v5929_v52 }
 0x826   : > { %3840 = vmatpush.bf16.msra.mxu0 %v5928_v38 }
 0x8ba   : > { %v3348_v17 = vpop.trf.xlu2 }
 0x8bb   : > { %5677 = vmatmul.msk.bf16.vlgmr.msrb.gmra.mxu3 %vm3356_vm12, %v3348_v17 }
 0x8ca   : > { %v3349_v49 = vpop.trf.xlu2 }
 0x8cb   : > { %5678 = vmatmul.msk.bf16.gmra.mxu3 %vm3356_vm12, %v3349_v49 }
 0x8da   : > { %v3350_v20 = vpop.trf.xlu2 }
 0x8db   : > { %5679 = vmatmul.msk.bf16.gmra.mxu3 %vm3356_vm12, %v3350_v20 }
 0x8ea   : > { %v3351_v40 = vpop.trf.xlu2 }
 0x8eb   : > { %5680 = vmatmul.msk.bf16.gmra.mxu3 %vm3356_vm12, %v3351_v40 }
 0x8fa   : > { %v3352_v18 = vpop.trf.xlu2 }
 0x8fb   : > { %5681 = vmatmul.msk.bf16.gmra.mxu3 %vm3356_vm12, %v3352_v18 }
 0x90a   : > { %v3353_v5 = vpop.trf.xlu2 }
 0x90b   : > { %5682 = vmatmul.msk.bf16.gmra.mxu3 %vm3356_vm12, %v3353_v5 }
 0x91a   : > { %v3354_v59 = vpop.trf.xlu2 }
 0x91b   : > { %5683 = vmatmul.msk.bf16.gmra.mxu3 %vm3356_vm12, %v3354_v59 }
 0x92a   : > { %v3355_v15 = vpop.trf.xlu2 }
 0x92b   : > { %5684 = vmatmul.msk.bf16.gmra.mxu3 %vm3356_vm12, %v3355_v15 }
 0x93e   : > { %v3390_v56 = vpop.f32.mrf.mxu3 }
 0x93f   : > { %3430 = vadd.xlane.f32.xlu0 %v3390_v56 }
 0x946   : > { %v3392_v50 = vpop.f32.mrf.mxu3 }
 0x947   : > { %3432 = vadd.xlane.f32.xlu1 %v3392_v50 }
 0x94e   : > { %v3395_v22 = vpop.f32.mrf.mxu3 }
 0x94f   : > { %3434 = vadd.xlane.f32.xlu0 %v3395_v22 }
 0x956   : > { %v3397_v46 = vpop.f32.mrf.mxu3 }
 0x957   : > { %3436 = vadd.xlane.f32.xlu1 %v3397_v46 }
 0x95e   : > { %v3400_v10 = vpop.f32.mrf.mxu3 }
 0x95f   : > { %3438 = vadd.xlane.f32.xlu0 %v3400_v10 }
 0x966   : > { %v3402_v29 = vpop.f32.mrf.mxu3 }
 0x967   : > { %3440 = vadd.xlane.f32.xlu1 %v3402_v29 }
 0x96e   : > { %v7888_v19 = vpop.f32.mrf.mxu3 }
 0x976   : > { %v7897_v2 = vpop.f32.mrf.mxu3 }
 0x97e   : > { %v7906_v37 = vpop.f32.mrf.mxu3 }
 0x986   : > { %v7915_v61 = vpop.f32.mrf.mxu3 }
 0x98e   : > { %v7923_v12 = vpop.f32.mrf.mxu3 }
 0x996   : > { %v7930_v6 = vpop.f32.mrf.mxu3 }
 0x99e   : > { %v7941_v7 = vpop.f32.mrf.mxu3 }
 0x9b2   : > { %v3431_v28 = vpop.xlane.xlu0 %3430 }
 0x9b3   : > { %v3469_v57 = vmul.f32 %v7883_v44, %v3431_v28 }
 0x9b5   : > { %v7886_v3 = vsub.f32 %v3390_v56, %v3469_v57 }
 0x9b7   : > { %v3501_v55 = vmul.f32 %v7886_v3, %v7886_v3 }
 0x9b9   : > { %3517 = vadd.xlane.f32.xlu0 %v3501_v55 }
 0x9ba   : > { %v3433_v34 = vpop.xlane.xlu1 %3432 }
 0x9bb   : > { %v3470_v4 = vmul.f32 %v7883_v44, %v3433_v34 }
 0x9bd   : > { %v7893_v60 = vsub.f32 %v3392_v50, %v3470_v4 }
 0x9bf   : > { %v3502_v48 = vmul.f32 %v7893_v60, %v7893_v60 }
 0x9c1   : > { %3519 = vadd.xlane.f32.xlu1 %v3502_v48  ;;  %3442 = vadd.xlane.f32.xlu0 %v7888_v19 }
 0x9c2   : > { %v3435_v63 = vpop.xlane.xlu0 %3434 }
 0x9c3   : > { %v3471_v62 = vmul.f32 %v7883_v44, %v3435_v63 }
 0x9c5   : > { %v7901_v39 = vsub.f32 %v3395_v22, %v3471_v62 }
 0x9c7   : > { %v3503_v43 = vmul.f32 %v7901_v39, %v7901_v39 }
 0x9c9   : > { %3521 = vadd.xlane.f32.xlu2 %v3503_v43  ;;  %3444 = vadd.xlane.f32.xlu1 %v7897_v2 }
 0x9ca   : > { %v3437_v16 = vpop.xlane.xlu1 %3436 }
 0x9cb   : > { %v3472_v11 = vmul.f32 %v7883_v44, %v3437_v16 }
 0x9cd   : > { %v7909_v24 = vsub.f32 %v3397_v46, %v3472_v11 }
 0x9cf   : > { %v3504_v25 = vmul.f32 %v7909_v24, %v7909_v24 }
 0x9d1   : > { %3523 = vadd.xlane.f32.xlu0 %v3504_v25  ;;  %3446 = vadd.xlane.f32.xlu1 %v7906_v37  ;;  %v7956_v25 = vpop.f32.mrf.mxu3 }
 0x9d2   : > { %v3439_v9 = vpop.xlane.xlu0 %3438 }
 0x9d3   : > { %v3473_v13 = vmul.f32 %v7883_v44, %v3439_v9 }
 0x9d5   : > { %v7917_v1 = vsub.f32 %v3400_v10, %v3473_v13 }
 0x9d7   : > { %v3505_v41 = vmul.f32 %v7917_v1, %v7917_v1 }
 0x9d9   : > { %3525 = vadd.xlane.f32.xlu1 %v3505_v41  ;;  %3448 = vadd.xlane.f32.xlu0 %v7915_v61 }
 0x9da   : > { %v3441_v47 = vpop.xlane.xlu1 %3440 }
 0x9db   : > { %v3474_v30 = vmul.f32 %v7883_v44, %v3441_v47 }
 0x9dd   : > { %v7925_v8 = vsub.f32 %v3402_v29, %v3474_v30 }
 0x9df   : > { %v3506_v14 = vmul.f32 %v7925_v8, %v7925_v8 }
 0x9e1   : > { %3527 = vadd.xlane.f32.xlu0 %v3506_v14  ;;  %3450 = vadd.xlane.f32.xlu1 %v7923_v12 }
 0x9e9   : > { %3452 = vadd.xlane.f32.xlu0 %v7930_v6 }
 0xa2c   : > { %v3518_v17 = vpop.xlane.xlu0 %3517 }
 0xa2d   : > { %v3549_v49 = vmul.f32 %v3518_v17, %v7883_v44 }
 0xa2f   : > { %v3565_v20 = vadd.f32 1e-05, %v3549_v49 }
 0xa31   : > { %6175 = vrsqrt.f32 %v3565_v20  ;;  %vm3587_vm15 = vweird.f32 %v3565_v20 }
 0xa34   : > { %v3520_v40 = vpop.xlane.xlu1 %3519  ;;  %v3443_v18 = vpop.xlane.xlu0 %3442 }
 0xa35   : > { %v3550_v5 = vmul.f32 %v3520_v40, %v7883_v44  ;;  %v3475_v56 = vmul.f32 %v7883_v44, %v3443_v18 }
 0xa37   : > { %v6176_v50 = vpop.eup %6175  ;;  %v3566_v22 = vadd.f32 1e-05, %v3550_v5  ;;  %v7937_v46 = vsub.f32 %v7888_v19, %v3475_v56 }
 0xa38   : > { %v3582_v10 = vmul.f32 %v6176_v50, %v3565_v20  ;;  %vm3588_vm14 = vweird.f32 %v6176_v50 }
 0xa39   : > { %6177 = vrsqrt.f32 %v3566_v22  ;;  %v3507_v29 = vmul.f32 %v7937_v46, %v7937_v46  ;;  %vm3589_vm1 = vmor %vm3587_vm15, %vm3588_vm14  ;;  %vm3597_vm2 = vweird.f32 %v3566_v22 }
 0xa3a   : > { %v3583_v59 = vmul.f32 %v6176_v50, %v3582_v10 }
 0xa3b   : > { %3529 = vadd.xlane.f32.xlu1 %v3507_v29 }
 0xa3c   : > { %v3584_v45 = vmul.f32 0.5, %v3583_v59  ;;  %v3445_v21 = vpop.xlane.xlu1 %3444  ;;  %v3522_v58 = vpop.xlane.xlu2 %3521 }
 0xa3d   : > { %v3476_v15 = vmul.f32 %v7883_v44, %v3445_v21  ;;  %v3551_v51 = vmul.f32 %v3522_v58, %v7883_v44 }
 0xa3e   : > { %v3585_v19 = vsub.f32 1.5, %v3584_v45 }
 0xa3f   : > { %v6178_v35 = vpop.eup %6177  ;;  %v7946_v28 = vsub.f32 %v7897_v2, %v3476_v15  ;;  %v7948_v57 = vadd.f32 1e-05, %v3551_v51 }
 0xa40   : > { %v3592_v55 = vmul.f32 %v6178_v35, %v3566_v22  ;;  %v3586_v48 = vmul.f32 %v6176_v50, %v3585_v19  ;;  %vm3598_vm0 = vweird.f32 %v6178_v35 }
 0xa41   : > { %6179 = vrsqrt.f32 %v7948_v57  ;;  %v3508_v34 = vmul.f32 %v7946_v28, %v7946_v28  ;;  %vm3599_vm3 = vmor %vm3597_vm2, %vm3598_vm0  ;;  %vm3607_vm5 = vweird.f32 %v7948_v57 }
 0xa42   : > { %v3593_v4 = vmul.f32 %v6178_v35, %v3592_v55  ;;  %v3590_v47 = vsel %vm3589_vm1, %v6176_v50, %v3586_v48 }
 0xa43   : > { %3531 = vadd.xlane.f32.xlu0 %v3508_v34  ;;  %3454 = vadd.xlane.f32.xlu1 %v7941_v7  ;;  %v3741_v27 = vmul.f32 %v3590_v47, %v7886_v3 }
 0xa44   : > { %v3594_v63 = vmul.f32 0.5, %v3593_v4  ;;  %v3524_v62 = vpop.xlane.xlu0 %3523  ;;  %v3447_v43 = vpop.xlane.xlu1 %3446 }
 0xa45   : > { %v3552_v2 = vmul.f32 %v3524_v62, %v7883_v44  ;;  %v3477_v16 = vmul.f32 %v7883_v44, %v3447_v43 }
 0xa46   : > { %v3595_v11 = vsub.f32 1.5, %v3594_v63 }
 0xa47   : > { %v6180_v9 = vpop.eup %6179  ;;  %v3568_v13 = vadd.f32 1e-05, %v3552_v2  ;;  %v7959_v41 = vsub.f32 %v7906_v37, %v3477_v16 }
 0xa48   : > { %v3596_v30 = vmul.f32 %v6178_v35, %v3595_v11  ;;  %v3602_v14 = vmul.f32 %v6180_v9, %v7948_v57  ;;  %vm3608_vm4 = vweird.f32 %v6180_v9 }
 0xa49   : > { %6181 = vrsqrt.f32 %v3568_v13  ;;  %v3509_v54 = vmul.f32 %v7959_v41, %v7959_v41  ;;  %vm3609_vm7 = vmor %vm3607_vm5, %vm3608_vm4  ;;  %vm3617_vm8 = vweird.f32 %v3568_v13 }
 0xa4a   : > { %v3600_v42 = vsel %vm3599_vm3, %v6178_v35, %v3596_v30  ;;  %v3603_v33 = vmul.f32 %v6180_v9, %v3602_v14 }
 0xa4b   : > { %v3742_v26 = vmul.f32 %v3600_v42, %v7893_v60  ;;  %3533 = vadd.xlane.f32.xlu1 %v3509_v54  ;;  %3456 = vadd.xlane.f32.xlu0 %v7956_v25  ;;  %v7972_v60 = vpop.f32.mrf.mxu3 }
 0xa4c   : > { %v3604_v37 = vmul.f32 0.5, %v3603_v33  ;;  %v3526_v23 = vpop.xlane.xlu1 %3525  ;;  %v3449_v36 = vpop.xlane.xlu0 %3448 }
 0xa4d   : > { %v3757_v0 = vpack.c.bf16 %v3742_v26, %v3741_v27  ;;  %v3553_v53 = vmul.f32 %v3526_v23, %v7883_v44  ;;  %v3478_v52 = vmul.f32 %v7883_v44, %v3449_v36  ;;  %v3194_v27 = vpop.f32.mrf.mxu0  ;;  %v3130_v26 = vand.u32 127, %v3129_v31 }
 0xa4e   : > { %v3605_v3 = vsub.f32 1.5, %v3604_v37  ;;  %v8000_v37 = vstv %s5676_s12  ;;  %v8003_v23 = vstv %s6912_s3 }
 0xa4f   : > { %v6182_v38 = vpop.eup %6181  ;;  %v3569_v17 = vadd.f32 1e-05, %v3553_v53  ;;  %v7970_v49 = vsub.f32 %v7915_v61, %v3478_v52  ;;  %3841 = vmatmul.bf16.vlgmr.msra.gmra.mxu0 %v3757_v0  ;;  %v3133_v36 = vadd.s32 %v8000_v37, %v3130_v26 }
 0xa50   : > { %v3612_v20 = vmul.f32 %v6182_v38, %v3568_v13  ;;  %v3606_v5 = vmul.f32 %v6180_v9, %v3605_v3  ;;  %vm3618_vm6 = vweird.f32 %v6182_v38 }
 0xa51   : > { %6183 = vrsqrt.f32 %v3569_v17  ;;  %v3510_v40 = vmul.f32 %v7970_v49, %v7970_v49  ;;  %vm3619_vm9 = vmor %vm3617_vm8, %vm3618_vm6  ;;  %vm3627_vm11 = vweird.f32 %v3569_v17  ;;  %vm3135_vm0 = vcmp.lt.s32.totalorder %v3133_v36, %v8003_v23 }
 0xa52   : > { %v3613_v18 = vmul.f32 %v6182_v38, %v3612_v20  ;;  %v3610_v51 = vsel %vm3609_vm7, %v6180_v9, %v3606_v5  ;;  %v8008_v53 = vsel %vm3135_vm0, %v3194_v27, -1e+30 }
 0xa53   : > { %3535 = vadd.xlane.f32.xlu0 %v3510_v40  ;;  %3458 = vadd.xlane.f32.xlu1 %v7972_v60  ;;  %v7985_v55 = vpop.f32.mrf.mxu3  ;;  %v3743_v34 = vmul.f32 %v3610_v51, %v7901_v39 }
 0xa54   : > { %v3614_v56 = vmul.f32 0.5, %v3613_v18  ;;  %v3528_v50 = vpop.xlane.xlu0 %3527  ;;  %v3451_v22 = vpop.xlane.xlu1 %3450 }
 0xa55   : > { %v3554_v61 = vmul.f32 %v3528_v50, %v7883_v44  ;;  %v3479_v10 = vmul.f32 %v7883_v44, %v3451_v22  ;;  %v3196_v52 = vpop.f32.mrf.mxu0 }
 0xa56   : > { %v3615_v29 = vsub.f32 1.5, %v3614_v56 }
 0xa57   : > { %v6184_v59 = vpop.eup %6183  ;;  %v3570_v45 = vadd.f32 1e-05, %v3554_v61  ;;  %v7981_v21 = vsub.f32 %v7923_v12, %v3479_v10 }
 0xa58   : > { %v3616_v58 = vmul.f32 %v6182_v38, %v3615_v29  ;;  %v3622_v15 = vmul.f32 %v6184_v59, %v3569_v17  ;;  %vm3628_vm10 = vweird.f32 %v6184_v59 }
 0xa59   : > { %6185 = vrsqrt.f32 %v3570_v45  ;;  %v3511_v35 = vmul.f32 %v7981_v21, %v7981_v21  ;;  %vm3629_vm13 = vmor %vm3627_vm11, %vm3628_vm10  ;;  %vm3637_vm14 = vweird.f32 %v3570_v45 }
 0xa5a   : > { %v3623_v19 = vmul.f32 %v6184_v59, %v3622_v15  ;;  %v3620_v57 = vsel %vm3619_vm9, %v6182_v38, %v3616_v58  ;;  %v8010_v38 = vsel %vm3135_vm0, %v3196_v52, -1e+30 }
 0xa5b   : > { %3537 = vadd.xlane.f32.xlu1 %v3511_v35  ;;  %3460 = vadd.xlane.f32.xlu0 %v7985_v55  ;;  %v3744_v12 = vmul.f32 %v3620_v57, %v7909_v24  ;;  %v5948_v31 = vpack.c.bf16 %v8010_v38, %v8008_v53 }
 0xa5c   : > { %v3624_v4 = vmul.f32 0.5, %v3623_v19  ;;  %v3453_v48 = vpop.xlane.xlu0 %3452 }
 0xa5d   : > { %v3480_v63 = vmul.f32 %v7883_v44, %v3453_v48  ;;  %v3758_v62 = vpack.c.bf16 %v3744_v12, %v3743_v34  ;;  %5949 = vst [vmem:[%s8861_s23] sm:$0xff] %v5948_v31  }
 0xa5e   : > { %v3625_v16 = vsub.f32 1.5, %v3624_v4 }
 0xa5f   : > { %v6186_v43 = vpop.eup %6185  ;;  %v7992_v2 = vsub.f32 %v7930_v6, %v3480_v63  ;;  %3846 = vmatmul.bf16.gmra.mxu0 %v3758_v62 }
 0xa60   : > { %v3632_v11 = vmul.f32 %v6186_v43, %v3570_v45  ;;  %v3626_v39 = vmul.f32 %v6184_v59, %v3625_v16  ;;  %vm3638_vm12 = vweird.f32 %v6186_v43 }
 0xa61   : > { %v3512_v9 = vmul.f32 %v7992_v2, %v7992_v2  ;;  %vm3639_vm15 = vmor %vm3637_vm14, %vm3638_vm12 }
 0xa62   : > { %v3633_v13 = vmul.f32 %v6186_v43, %v3632_v11  ;;  %v3630_v6 = vsel %vm3629_vm13, %v6184_v59, %v3626_v39 }
 0xa63   : > { %3539 = vadd.xlane.f32.xlu0 %v3512_v9  ;;  %v3745_v54 = vmul.f32 %v3630_v6, %v7917_v1 }
 0xa64   : > { %v3634_v24 = vmul.f32 0.5, %v3633_v13 }
 0xa66   : > { %v3635_v47 = vsub.f32 1.5, %v3634_v24 }
 0xa68   : > { %v3636_v30 = vmul.f32 %v6186_v43, %v3635_v47 }
 0xa6a   : > { %v3640_v14 = vsel %vm3639_vm15, %v6186_v43, %v3636_v30 }
 0xa6b   : > { %v3746_v42 = vmul.f32 %v3640_v14, %v7925_v8 }
 0xa6d   : > { %v3759_v33 = vpack.c.bf16 %v3746_v42, %v3745_v54 }
 0xa6f   : > { %3851 = vmatmul.bf16.gmra.mxu0 %v3759_v33 }
 0xaae   : > { %v3530_v0 = vpop.xlane.xlu1 %3529 }
 0xaaf   : > { %v3555_v1 = vmul.f32 %v3530_v0, %v7883_v44 }
 0xab1   : > { %v3571_v8 = vadd.f32 1e-05, %v3555_v1 }
 0xab3   : > { %6187 = vrsqrt.f32 %v3571_v8  ;;  %vm3647_vm3 = vweird.f32 %v3571_v8 }
 0xab6   : > { %v3532_v17 = vpop.xlane.xlu0 %3531  ;;  %v3455_v3 = vpop.xlane.xlu1 %3454 }
 0xab7   : > { %v3556_v20 = vmul.f32 %v3532_v17, %v7883_v44  ;;  %v3481_v40 = vmul.f32 %v7883_v44, %v3455_v3 }
 0xab9   : > { %v6188_v18 = vpop.eup %6187  ;;  %v3572_v5 = vadd.f32 1e-05, %v3556_v20  ;;  %v8019_v56 = vsub.f32 %v7941_v7, %v3481_v40 }
 0xaba   : > { %v3642_v50 = vmul.f32 %v6188_v18, %v3571_v8  ;;  %vm3648_vm1 = vweird.f32 %v6188_v18 }
 0xabb   : > { %6189 = vrsqrt.f32 %v3572_v5  ;;  %v3513_v22 = vmul.f32 %v8019_v56, %v8019_v56  ;;  %vm3649_vm4 = vmor %vm3647_vm3, %vm3648_vm1  ;;  %vm3657_vm5 = vweird.f32 %v3572_v5 }
 0xabc   : > { %v3643_v61 = vmul.f32 %v6188_v18, %v3642_v50 }
 0xabd   : > { %3541 = vadd.xlane.f32.xlu1 %v3513_v22 }
 0xabe   : > { %v3534_v10 = vpop.xlane.xlu1 %3533  ;;  %v3457_v29 = vpop.xlane.xlu0 %3456  ;;  %v3644_v59 = vmul.f32 0.5, %v3643_v61 }
 0xabf   : > { %v3557_v45 = vmul.f32 %v3534_v10, %v7883_v44  ;;  %v3482_v58 = vmul.f32 %v7883_v44, %v3457_v29 }
 0xac0   : > { %v3645_v19 = vsub.f32 1.5, %v3644_v59 }
 0xac1   : > { %v6190_v15 = vpop.eup %6189  ;;  %v3573_v51 = vadd.f32 1e-05, %v3557_v45  ;;  %v8026_v35 = vsub.f32 %v7956_v25, %v3482_v58 }
 0xac2   : > { %v3652_v7 = vmul.f32 %v6190_v15, %v3572_v5  ;;  %v3646_v63 = vmul.f32 %v6188_v18, %v3645_v19  ;;  %vm3658_vm2 = vweird.f32 %v6190_v15 }
 0xac3   : > { %6191 = vrsqrt.f32 %v3573_v51  ;;  %v3514_v57 = vmul.f32 %v8026_v35, %v8026_v35  ;;  %vm3659_vm6 = vmor %vm3657_vm5, %vm3658_vm2  ;;  %vm3667_vm8 = vweird.f32 %v3573_v51 }
 0xac4   : > { %v3653_v34 = vmul.f32 %v6190_v15, %v3652_v7  ;;  %v3650_v47 = vsel %vm3649_vm4, %v6188_v18, %v3646_v63  ;;  %vm3247_vm4 = vcmask 7168  }
 0xac5   : > { %3543 = vadd.xlane.f32.xlu0 %v3514_v57 }
 0xac6   : > { %v3654_v12 = vmul.f32 0.5, %v3653_v34  ;;  %v3536_v4 = vpop.xlane.xlu0 %3535  ;;  %v3459_v48 = vpop.xlane.xlu1 %3458 }
 0xac7   : > { %v3558_v62 = vmul.f32 %v3536_v4, %v7883_v44  ;;  %v3483_v43 = vmul.f32 %v7883_v44, %v3459_v48 }
 0xac8   : > { %v3655_v16 = vsub.f32 1.5, %v3654_v12 }
 0xac9   : > { %v6192_v25 = vpop.eup %6191  ;;  %v3574_v11 = vadd.f32 1e-05, %v3558_v62  ;;  %v8033_v9 = vsub.f32 %v7972_v60, %v3483_v43  ;;  %v3747_v60 = vmul.f32 %v3650_v47, %v7937_v46 }
 0xaca   : > { %v3656_v13 = vmul.f32 %v6190_v15, %v3655_v16  ;;  %v3662_v39 = vmul.f32 %v6192_v25, %v3573_v51  ;;  %vm3668_vm7 = vweird.f32 %v6192_v25  ;;  %v6665_v16 = vmov 0  }
 0xacb   : > { %6193 = vrsqrt.f32 %v3574_v11  ;;  %v3515_v24 = vmul.f32 %v8033_v9, %v8033_v9  ;;  %vm3669_vm10 = vmor %vm3667_vm8, %vm3668_vm7  ;;  %vm3677_vm11 = vweird.f32 %v3574_v11  ;;  %6130 = vset.pattern.permute.xlu1 %v6665_v16  ;;  %6131 = vset.pattern.permute.xlu0 %v6665_v16 }
 0xacc   : > { %v3663_v30 = vmul.f32 %v6192_v25, %v3662_v39  ;;  %v3660_v6 = vsel %vm3659_vm6, %v6190_v15, %v3656_v13 }
 0xacd   : > { %3545 = vadd.xlane.f32.xlu1 %v3515_v24  ;;  %v3748_v14 = vmul.f32 %v3660_v6, %v7946_v28 }
 0xace   : > { %v3664_v54 = vmul.f32 0.5, %v3663_v30  ;;  %v3538_v42 = vpop.xlane.xlu1 %3537  ;;  %v3461_v33 = vpop.xlane.xlu0 %3460 }
 0xacf   : > { %v3559_v27 = vmul.f32 %v3538_v42, %v7883_v44  ;;  %v3484_v26 = vmul.f32 %v7883_v44, %v3461_v33  ;;  %v3760_v36 = vpack.c.bf16 %v3748_v14, %v3747_v60 }
 0xad0   : > { %v3665_v52 = vsub.f32 1.5, %v3664_v54 }
 0xad1   : > { %v6194_v0 = vpop.eup %6193  ;;  %v3575_v1 = vadd.f32 1e-05, %v3559_v27  ;;  %v8042_v8 = vsub.f32 %v7985_v55, %v3484_v26  ;;  %3856 = vmatmul.bf16.gmra.mxu0 %v3760_v36  ;;  %v8056_v36 = vld [vmem:[#allocation2] sm:$0xff] }
 0xad2   : > { %v3672_v31 = vmul.f32 %v6194_v0, %v3574_v11  ;;  %v3666_v46 = vmul.f32 %v6192_v25, %v3665_v52  ;;  %vm3678_vm9 = vweird.f32 %v6194_v0 }
 0xad3   : > { %6195 = vrsqrt.f32 %v3575_v1  ;;  %v3516_v28 = vmul.f32 %v8042_v8, %v8042_v8  ;;  %vm3679_vm12 = vmor %vm3677_vm11, %vm3678_vm9  ;;  %vm3687_vm14 = vweird.f32 %v3575_v1 }
 0xad4   : > { %v3673_v17 = vmul.f32 %v6194_v0, %v3672_v31  ;;  %v3670_v61 = vsel %vm3669_vm10, %v6192_v25, %v3666_v46 }
 0xad5   : > { %3547 = vadd.xlane.f32.xlu0 %v3516_v28  ;;  %3209 = vmax.xlane.f32.xlu1 %v8008_v53  ;;  %v3749_v59 = vmul.f32 %v3670_v61, %v7959_v41 }
 0xad6   : > { %v3674_v3 = vmul.f32 0.5, %v3673_v17  ;;  %v3540_v20 = vpop.xlane.xlu0 %3539 }
 0xad7   : > { %v3560_v40 = vmul.f32 %v3540_v20, %v7883_v44 }
 0xad8   : > { %v3675_v55 = vsub.f32 1.5, %v3674_v3 }
 0xad9   : > { %v6196_v18 = vpop.eup %6195  ;;  %v3576_v5 = vadd.f32 1e-05, %v3560_v40 }
 0xada   : > { %v3676_v50 = vmul.f32 %v6194_v0, %v3675_v55  ;;  %v3682_v22 = vmul.f32 %v6196_v18, %v3575_v1  ;;  %vm3688_vm13 = vweird.f32 %v6196_v18 }
 0xadb   : > { %6197 = vrsqrt.f32 %v3576_v5  ;;  %vm3689_vm0 = vmor %vm3687_vm14, %vm3688_vm13  ;;  %vm3697_vm1 = vweird.f32 %v3576_v5 }
 0xadc   : > { %v3683_v10 = vmul.f32 %v6196_v18, %v3682_v22  ;;  %v3680_v29 = vsel %vm3679_vm12, %v6194_v0, %v3676_v50  ;;  %v8067_v22 = vld [vmem:[#allocation2 + $0x8] sm:$0xff] }
 0xadd   : > { %3211 = vmax.xlane.f32.xlu0 %v8010_v38  ;;  %v3750_v45 = vmul.f32 %v3680_v29, %v7970_v49 }
 0xade   : > { %v3684_v58 = vmul.f32 0.5, %v3683_v10 }
 0xadf   : > { %v3761_v15 = vpack.c.bf16 %v3750_v45, %v3749_v59 }
 0xae0   : > { %v3685_v7 = vsub.f32 1.5, %v3684_v58 }
 0xae1   : > { %v6198_v51 = vpop.eup %6197  ;;  %3861 = vmatmul.bf16.gmra.mxu0 %v3761_v15 }
 0xae2   : > { %v3692_v19 = vmul.f32 %v6198_v51, %v3576_v5  ;;  %v3686_v34 = vmul.f32 %v6196_v18, %v3685_v7  ;;  %vm3698_vm15 = vweird.f32 %v6198_v51 }
 0xae3   : > { %vm3699_vm2 = vmor %vm3697_vm1, %vm3698_vm15 }
 0xae4   : > { %v3693_v57 = vmul.f32 %v6198_v51, %v3692_v19  ;;  %v3690_v63 = vsel %vm3689_vm0, %v6196_v18, %v3686_v34 }
 0xae5   : > { %v3751_v49 = vmul.f32 %v3690_v63, %v7981_v21 }
 0xae6   : > { %v3694_v12 = vmul.f32 0.5, %v3693_v57 }
 0xae8   : > { %v3695_v4 = vsub.f32 1.5, %v3694_v12 }
 0xaea   : > { %v3696_v48 = vmul.f32 %v6198_v51, %v3695_v4 }
 0xaec   : > { %v3700_v41 = vsel %vm3699_vm2, %v6198_v51, %v3696_v48 }
 0xaed   : > { %v3752_v62 = vmul.f32 %v3700_v41, %v7992_v2 }
 0xaef   : > { %v3762_v43 = vpack.c.bf16 %v3752_v62, %v3751_v49 }
 0xaf1   : > { %3866 = vmatmul.bf16.gmra.mxu0 %v3762_v43 }
 0xb30   : > { %v3542_v25 = vpop.xlane.xlu1 %3541 }
 0xb31   : > { %v3561_v11 = vmul.f32 %v3542_v25, %v7883_v44  ;;  %v3842_v25 = vpop.f32.mrf.mxu0 }
 0xb33   : > { %v3577_v13 = vadd.f32 1e-05, %v3561_v11 }
 0xb35   : > { %6199 = vrsqrt.f32 %v3577_v13  ;;  %vm3707_vm5 = vweird.f32 %v3577_v13 }
 0xb38   : > { %v3544_v39 = vpop.xlane.xlu0 %3543 }
 0xb39   : > { %v3562_v24 = vmul.f32 %v3544_v39, %v7883_v44  ;;  %v3844_v11 = vpop.f32.mrf.mxu0 }
 0xb3b   : > { %v6200_v47 = vpop.eup %6199  ;;  %v3578_v30 = vadd.f32 1e-05, %v3562_v24  ;;  %v5942_v24 = vld [vmem:[#allocation18 + $0x30] sm:$0xff] }
 0xb3c   : > { %v3702_v6 = vmul.f32 %v6200_v47, %v3577_v13  ;;  %vm3708_vm3 = vweird.f32 %v6200_v47  ;;  %v5943_v13 = vld [vmem:[#allocation18 + $0x38] sm:$0xff] }
 0xb3d   : > { %6201 = vrsqrt.f32 %v3578_v30  ;;  %vm3709_vm7 = vmor %vm3707_vm5, %vm3708_vm3  ;;  %vm3717_vm8 = vweird.f32 %v3578_v30  ;;  %4102 = vmatpush.bf16.msra.mxu1 %v5943_v13 }
 0xb3e   : > { %v3703_v21 = vmul.f32 %v6200_v47, %v3702_v6 }
 0xb40   : > { %v3704_v14 = vmul.f32 0.5, %v3703_v21  ;;  %v3546_v2 = vpop.xlane.xlu1 %3545  ;;  %v5939_v21 = vld [vmem:[#allocation18 + $0x18] sm:$0xff] }
 0xb41   : > { %v3563_v54 = vmul.f32 %v3546_v2, %v7883_v44  ;;  %v3847_v39 = vpop.f32.mrf.mxu0  ;;  %4103 = vmatpush.bf16.msra.mxu1 %v5942_v24 }
 0xb42   : > { %v3705_v60 = vsub.f32 1.5, %v3704_v14 }
 0xb43   : > { %v6202_v42 = vpop.eup %6201  ;;  %v3579_v33 = vadd.f32 1e-05, %v3563_v54 }
 0xb44   : > { %v3712_v27 = vmul.f32 %v6202_v42, %v3578_v30  ;;  %v3706_v0 = vmul.f32 %v6200_v47, %v3705_v60  ;;  %vm3718_vm6 = vweird.f32 %v6202_v42  ;;  %v5940_v30 = vld [vmem:[#allocation18 + $0x20] sm:$0xff] }
 0xb45   : > { %6203 = vrsqrt.f32 %v3579_v33  ;;  %vm3719_vm9 = vmor %vm3717_vm8, %vm3718_vm6  ;;  %vm3727_vm11 = vweird.f32 %v3579_v33 }
 0xb46   : > { %v3713_v26 = vmul.f32 %v6202_v42, %v3712_v27  ;;  %v3710_v5 = vsel %vm3709_vm7, %v6200_v47, %v3706_v0  ;;  %v5941_v47 = vld [vmem:[#allocation18 + $0x28] sm:$0xff] }
 0xb47   : > { %v3753_v10 = vmul.f32 %v3710_v5, %v8019_v56  ;;  %4104 = vmatpush.bf16.msra.mxu1 %v5941_v47 }
 0xb48   : > { %v3714_v1 = vmul.f32 0.5, %v3713_v26  ;;  %v3548_v52 = vpop.xlane.xlu0 %3547  ;;  %v3210_v31 = vpop.xlane.xlu1 %3209  ;;  %v5936_v26 = vld [vmem:[#allocation18] sm:$0xff] }
 0xb49   : > { %v3564_v28 = vmul.f32 %v3548_v52, %v7883_v44  ;;  %v8060_v17 = vmax.f32 %v8056_v36, %v3210_v31  ;;  %v3849_v6 = vpop.f32.mrf.mxu0 }
 0xb4a   : > { %v3715_v46 = vsub.f32 1.5, %v3714_v1 }
 0xb4b   : > { %v6204_v3 = vpop.eup %6203  ;;  %v3580_v20 = vadd.f32 1e-05, %v3564_v28  ;;  %v3215_v40 = vsub.f32 %v8056_v36, %v8060_v17  ;;  %3283 = vst.msk [vmem:[#allocation2] sm:$0xff] %vm3247_vm4, %v8060_v17  ;;  %3223 = vperm.xlu1 %6130, %v8060_v17   ;;  %4105 = vmatpush.bf16.msra.mxu1 %v5940_v30 }
 0xb4c   : > { %v3716_v55 = vmul.f32 %v6202_v42, %v3715_v46  ;;  %v3722_v18 = vmul.f32 %v6204_v3, %v3579_v33  ;;  %vm3728_vm10 = vweird.f32 %v6204_v3 }
 0xb4d   : > { %6205 = vrsqrt.f32 %v3580_v20  ;;  %vm3729_vm13 = vmor %vm3727_vm11, %vm3728_vm10  ;;  %vm3737_vm14 = vweird.f32 %v3580_v20 }
 0xb4e   : > { %v3723_v50 = vmul.f32 %v6204_v3, %v3722_v18  ;;  %v3720_v61 = vsel %vm3719_vm9, %v6202_v42, %v3716_v55  ;;  %v5937_v42 = vld [vmem:[#allocation18 + $0x8] sm:$0xff] }
 0xb4f   : > { %v3754_v29 = vmul.f32 %v3720_v61, %v8026_v35  ;;  %4106 = vmatpush.bf16.msra.mxu1 %v5939_v21 }
 0xb50   : > { %v3724_v59 = vmul.f32 0.5, %v3723_v50  ;;  %v3212_v45 = vpop.xlane.xlu0 %3211 }
 0xb51   : > { %v8072_v58 = vmax.f32 %v8067_v22, %v3212_v45  ;;  %v3763_v15 = vpack.c.bf16 %v3754_v29, %v3753_v10  ;;  %v3852_v54 = vpop.f32.mrf.mxu0 }
 0xb52   : > { %v4546_v51 = vld [vmem:[#allocation2] sm:$0xff]  ;;  %v3725_v56 = vsub.f32 1.5, %v3724_v59 }
 0xb53   : > { %v6206_v7 = vpop.eup %6205  ;;  %4548 = vst.msk [vmem:[%s6927_s10] sm:$0xff] %vm3247_vm4, %v4546_v51  ;;  %v3216_v19 = vsub.f32 %v8067_v22, %v8072_v58  ;;  %3871 = vmatmul.bf16.gmra.mxu0 %v3763_v15  ;;  %3228 = vperm.xlu0 %6131, %v8072_v58  }
 0xb54   : > { %v3732_v57 = vmul.f32 %v6206_v7, %v3580_v20  ;;  %3284 = vst.msk [vmem:[#allocation2 + $0x8] sm:$0xff] %vm3247_vm4, %v8072_v58  ;;  %v3726_v34 = vmul.f32 %v6204_v3, %v3725_v56  ;;  %vm3738_vm12 = vweird.f32 %v6206_v7 }
 0xb55   : > { %vm3739_vm15 = vmor %vm3737_vm14, %vm3738_vm12 }
 0xb56   : > { %v3733_v35 = vmul.f32 %v6206_v7, %v3732_v57  ;;  %v3730_v41 = vsel %vm3729_vm13, %v6204_v3, %v3726_v34 }
 0xb57   : > { %v3755_v62 = vmul.f32 %v3730_v41, %v8033_v9  ;;  %v8088_v9 = vld [vmem:[%s8905_s22] ss:$0 sm:$0xff] }
 0xb58   : > { %v3734_v12 = vmul.f32 0.5, %v3733_v35  ;;  %v3845_v14 = vadd.f32 %v8088_v9, %v3844_v11  ;;  %v3843_v2 = vadd.f32 %v8088_v9, %v3842_v25  ;;  %v3850_v5 = vadd.f32 %v8088_v9, %v3849_v6 }
 0xb59   : > { %v3854_v28 = vpop.f32.mrf.mxu0  ;;  %v3848_v10 = vadd.f32 %v8088_v9, %v3847_v39 }
 0xb5a   : > { %v3735_v4 = vsub.f32 1.5, %v3734_v12  ;;  %v3899_v33 = vmul.f32 0.044715, %v3845_v14  ;;  %v3898_v60 = vmul.f32 0.044715, %v3843_v2  ;;  %v3883_v25 = vmul.f32 0.5, %v3845_v14 }
 0xb5b   : > { %v4547_v48 = vld [vmem:[#allocation2 + $0x8] sm:$0xff]  ;;  %v3900_v15 = vmul.f32 0.044715, %v3848_v10  ;;  %v3882_v39 = vmul.f32 0.5, %v3843_v2 }
 0xb5c   : > { %v3736_v63 = vmul.f32 %v6206_v7, %v3735_v4  ;;  %4549 = vst.msk [vmem:[%s6927_s10 + $0x8] sm:$0xff] %vm3247_vm4, %v4547_v48  ;;  %v3915_v0 = vmul.f32 %v3899_v33, %v3845_v14  ;;  %v3914_v52 = vmul.f32 %v3898_v60, %v3843_v2  ;;  %s8907_s10 = sld [smem:[#allocation48_spill]] }
 0xb5d   : > { %v3916_v57 = vmul.f32 %v3900_v15, %v3848_v10 }
 0xb5e   : > { %v3740_v49 = vsel %vm3739_vm15, %v6206_v7, %v3736_v63  ;;  %v3931_v31 = vmul.f32 %v3915_v0, %v3845_v14  ;;  %v3930_v20 = vmul.f32 %v3914_v52, %v3843_v2  ;;  %v3855_v63 = vadd.f32 %v8088_v9, %v3854_v28 }
 0xb5f   : > { %v3756_v43 = vmul.f32 %v3740_v49, %v8042_v8  ;;  %v5938_v8 = vld [vmem:[#allocation18 + $0x10] sm:$0xff]  ;;  %v3932_v12 = vmul.f32 %v3916_v57, %v3848_v10  ;;  %v3885_v28 = vmul.f32 0.5, %v3850_v5 }
 0xb60   : > { %4107 = vmatpush.bf16.msra.mxu1 %v5938_v8  ;;  %v3947_v18 = vadd.f32 %v3931_v31, %v3845_v14  ;;  %v3946_v61 = vadd.f32 %v3930_v20, %v3843_v2  ;;  %v3903_v11 = vmul.f32 0.044715, %v3855_v63 }
 0xb61   : > { %v3764_v16 = vpack.c.bf16 %v3756_v43, %v3755_v62  ;;  %v3857_v59 = vpop.f32.mrf.mxu0  ;;  %v3853_v62 = vadd.f32 %v8088_v9, %v3852_v54  ;;  %v3948_v43 = vadd.f32 %v3932_v12, %v3848_v10 }
 0xb62   : > { %v3963_v29 = vmul.f32 0.7978846, %v3947_v18  ;;  %v3962_v45 = vmul.f32 0.7978846, %v3946_v61  ;;  %v3919_v21 = vmul.f32 %v3903_v11, %v3855_v63  ;;  %v3858_v2 = vadd.f32 %v8088_v9, %v3857_v59  ;;  %s4626_s22 = scalar_lea.hbm %s8907_s10, %s5753_s8  ;;  %s6479_s6 = scalar_lea.hbm %s8907_s10, 16 }
 0xb63   : > { %3876 = vmatmul.bf16.gmra.mxu0 %v3764_v16  ;;  %v3902_v47 = vmul.f32 0.044715, %v3853_v62  ;;  %v3964_v30 = vmul.f32 0.7978846, %v3948_v43  ;;  %s4629_s9 = sshll.u32 %s4626_s22, 4  ;;  %s4630_s9 = int_to_ptr.hbm [resolvable:$true] %s4629_s9 }
 0xb64   : > { %4108 = vmatpush.bf16.msra.mxu1 %v5937_v42  ;;  %v3935_v60 = vmul.f32 %v3919_v21, %v3855_v63  ;;  %s6473_s26 = sshra.s32 %s4630_s9, 4  ;;  %s6474_s26 = int_to_ptr.hbm [resolvable:$true] %s6473_s26 }
 0xb65   : > { %v3918_v33 = vmul.f32 %v3902_v47, %v3853_v62  ;;  %s6475_s23 = scalar_lea.hbm %s6474_s26, 8  ;;  %p6480_p13 = scmp.lt.s32.totalorder %s6474_s26, %s8907_s10 }
 0xb66   : > { %v3951_v0 = vadd.f32 %v3935_v60, %v3855_v63  ;;  %p6476_p10 = scmp.ne.s32.totalorder %s6474_s26, %s6475_s23  ;;  %p6481_p0 = scmp.lt.s32.totalorder %s6479_s6, %s6475_s23 }
 0xb67   : > { %v3934_v54 = vmul.f32 %v3918_v33, %v3853_v62 }
 0xb68   : > { %4109 = vmatpush.bf16.msra.mxu1 %v5936_v26  ;;  %v3967_v20 = vmul.f32 0.7978846, %v3951_v0  ;;  %p6477_p11 = pnand %p6476_p10, %p6865_p4  ;;  %p6482_p2 = por %p6481_p0, %p6480_p13 }
 0xb69   : > { %v3859_v4 = vpop.f32.mrf.mxu0  ;;  %v3950_v52 = vadd.f32 %v3934_v54, %v3853_v62 }
 0xb6a   : > { %v3860_v14 = vadd.f32 %v8088_v9, %v3859_v4  ;;  %p6478_p12 = pneg %p6477_p11 }
 0xb6b   : > { %v3966_v61 = vmul.f32 0.7978846, %v3950_v52 }
 0xb6c   : > { %v3889_v0 = vmul.f32 0.5, %v3860_v14  ;;  %p6483_p5 = pnand %p6482_p2, %p6478_p12 }
 0xb71   : > { %v3862_v8 = vpop.f32.mrf.mxu0 }
 0xb79   : > { %v3864_v31 = vpop.f32.mrf.mxu0 }
 0xbbd   : > { %v3224_v27 = vpop.permute.xlu1 %3223 }
 0xbbe   : > { %v3231_v1 = vsub.f32 %v8008_v53, %v3224_v27  ;;  %v3901_v53 = vmul.f32 0.044715, %v3850_v5 }
 0xbc0   : > { %v3233_v46 = vmul.f32 1.442695, %v3231_v1 }
 0xbc2   : > { %6207 = vpow2.f32 %v3233_v46 }
 0xbc5   : > { %v3229_v3 = vpop.permute.xlu0 %3228 }
 0xbc6   : > { %v3232_v55 = vsub.f32 %v8010_v38, %v3229_v3  ;;  %v3917_v38 = vmul.f32 %v3901_v53, %v3850_v5  ;;  %v3905_v3 = vmul.f32 0.044715, %v3860_v14 }
 0xbc8   : > { %v3235_v50 = vmul.f32 1.442695, %v3232_v55  ;;  %v8096_v51 = vpop.eup %6207  ;;  %v3933_v35 = vmul.f32 %v3917_v38, %v3850_v5  ;;  %v3884_v55 = vmul.f32 0.5, %v3848_v10  ;;  %v3921_v53 = vmul.f32 %v3905_v3, %v3860_v14 }
 0xbc9   : > { %v3863_v10 = vadd.f32 %v8088_v9, %v3862_v8 }
 0xbca   : > { %6209 = vpow2.f32 %v3235_v50  ;;  %v3949_v41 = vadd.f32 %v3933_v35, %v3850_v5  ;;  %v3904_v50 = vmul.f32 0.044715, %v3858_v2  ;;  %v3937_v38 = vmul.f32 %v3921_v53, %v3860_v14 }
 0xbcb   : > { %6211 = vtanh.f32 %v3963_v29  ;;  %v3865_v5 = vadd.f32 %v8088_v9, %v3864_v31  ;;  %v3906_v11 = vmul.f32 0.044715, %v3863_v10 }
 0xbcc   : > { %6213 = vtanh.f32 %v3962_v45  ;;  %v3965_v13 = vmul.f32 0.7978846, %v3949_v41  ;;  %v3920_v15 = vmul.f32 %v3904_v50, %v3858_v2 }
 0xbce   : > { %6215 = vtanh.f32 %v3965_v13  ;;  %v3936_v57 = vmul.f32 %v3920_v15, %v3858_v2 }
 0xbcf   : > { %6217 = vtanh.f32 %v3964_v30 }
 0xbd0   : > { %v8098_v7 = vpop.eup %6209  ;;  %6219 = vtanh.f32 %v3967_v20  ;;  %v3952_v4 = vadd.f32 %v3936_v57, %v3858_v2 }
 0xbd1   : > { %v3264_v56 = vpack.c.bf16 %v8098_v7, %v8096_v51  ;;  %v6212_v34 = vpop.eup %6211  ;;  %6221 = vtanh.f32 %v3966_v61 }
 0xbd2   : > { %v6214_v48 = vpop.eup %6213  ;;  %v3995_v49 = vadd.f32 1.0, %v6212_v34  ;;  %v3953_v34 = vadd.f32 %v3937_v38, %v3860_v14  ;;  %v3968_v13 = vmul.f32 0.7978846, %v3952_v4 }
 0xbd3   : > { %3273 = vmatmul.bf16.vlgmr.msrb.gmra.mxu1 %v3264_v56  ;;  %v3994_v16 = vadd.f32 1.0, %v6214_v48  ;;  %v3867_v56 = vpop.f32.mrf.mxu0  ;;  %v3887_v48 = vmul.f32 0.5, %v3855_v63 }
 0xbd4   : > { %v4011_v24 = vmul.f32 %v3995_v49, %v3883_v25  ;;  %v6216_v27 = vpop.eup %6215  ;;  %v3907_v49 = vmul.f32 0.044715, %v3865_v5  ;;  %v3969_v43 = vmul.f32 0.7978846, %v3953_v34  ;;  %v3868_v54 = vadd.f32 %v8088_v9, %v3867_v56 }
 0xbd5   : > { %v4010_v6 = vmul.f32 %v3994_v16, %v3882_v39  ;;  %v6218_v26 = vpop.eup %6217  ;;  %v3997_v1 = vadd.f32 1.0, %v6216_v27  ;;  %v3886_v16 = vmul.f32 0.5, %v3853_v62  ;;  %v3891_v34 = vmul.f32 0.5, %v3865_v5 }
 0xbd6   : > { %v3996_v46 = vadd.f32 1.0, %v6218_v26  ;;  %v6220_v59 = vpop.eup %6219  ;;  %v3923_v47 = vmul.f32 %v3907_v49, %v3865_v5  ;;  %6223 = vtanh.f32 %v3969_v43  ;;  %v3908_v3 = vmul.f32 0.044715, %v3868_v54 }
 0xbd7   : > { %v4026_v42 = vpack.c.bf16 %v4011_v24, %v4010_v6  ;;  %v4013_v18 = vmul.f32 %v3997_v1, %v3885_v28  ;;  %v6222_v35 = vpop.eup %6221  ;;  %v3999_v12 = vadd.f32 1.0, %v6220_v59  ;;  %v3922_v6 = vmul.f32 %v3906_v11, %v3863_v10 }
 0xbd8   : > { %v4012_v29 = vmul.f32 %v3996_v46, %v3884_v55  ;;  %v3998_v41 = vadd.f32 1.0, %v6222_v35  ;;  %6225 = vtanh.f32 %v3968_v13  ;;  %v3939_v21 = vmul.f32 %v3923_v47, %v3865_v5 }
 0xbd9   : > { %v4015_v25 = vmul.f32 %v3999_v12, %v3887_v48  ;;  %v3938_v8 = vmul.f32 %v3922_v6, %v3863_v10  ;;  %v3888_v28 = vmul.f32 0.5, %v3858_v2 }
 0xbda   : > { %v4027_v45 = vpack.c.bf16 %v4013_v18, %v4012_v29  ;;  %v4014_v24 = vmul.f32 %v3998_v41, %v3886_v16  ;;  %v3955_v27 = vadd.f32 %v3939_v21, %v3865_v5  ;;  %v3924_v29 = vmul.f32 %v3908_v3, %v3868_v54 }
 0xbdb   : > { %v3869_v39 = vpop.f32.mrf.mxu0  ;;  %v3954_v26 = vadd.f32 %v3938_v8, %v3863_v10  ;;  %v3890_v41 = vmul.f32 0.5, %v3863_v10 }
 0xbdc   : > { %v4028_v30 = vpack.c.bf16 %v4015_v25, %v4014_v24  ;;  %v3870_v60 = vadd.f32 %v8088_v9, %v3869_v39  ;;  %v3971_v31 = vmul.f32 0.7978846, %v3955_v27  ;;  %v3940_v15 = vmul.f32 %v3924_v29, %v3868_v54 }
 0xbdd   : > { %v3970_v20 = vmul.f32 0.7978846, %v3954_v26 }
 0xbde   : > { %v3909_v52 = vmul.f32 0.044715, %v3870_v60  ;;  %6227 = vtanh.f32 %v3971_v31  ;;  %v3956_v57 = vadd.f32 %v3940_v15, %v3868_v54 }
 0xbdf   : > { %6229 = vtanh.f32 %v3970_v20 }
 0xbe0   : > { %v3925_v18 = vmul.f32 %v3909_v52, %v3870_v60  ;;  %v3972_v16 = vmul.f32 0.7978846, %v3956_v57 }
 0xbe2   : > { %v3941_v53 = vmul.f32 %v3925_v18, %v3870_v60 }
 0xbe3   : > { %4110 = vmatmul.bf16.vlgmr.msra.gmra.mxu1 %v4026_v42  ;;  %v6224_v42 = vpop.eup %6223  ;;  %v3872_v33 = vpop.f32.mrf.mxu0 }
 0xbe4   : > { %v6226_v63 = vpop.eup %6225  ;;  %v4001_v62 = vadd.f32 1.0, %v6224_v42  ;;  %v3957_v56 = vadd.f32 %v3941_v53, %v3870_v60  ;;  %v3873_v2 = vadd.f32 %v8088_v9, %v3872_v33 }
 0xbe5   : > { %v4000_v1 = vadd.f32 1.0, %v6226_v63  ;;  %v3893_v63 = vmul.f32 0.5, %v3870_v60 }
 0xbe6   : > { %v4017_v46 = vmul.f32 %v4001_v62, %v3889_v0  ;;  %v3973_v48 = vmul.f32 0.7978846, %v3957_v56  ;;  %v3910_v43 = vmul.f32 0.044715, %v3873_v2  ;;  %v3892_v0 = vmul.f32 0.5, %v3868_v54 }
 0xbe7   : > { %v4016_v55 = vmul.f32 %v4000_v1, %v3888_v28  ;;  %v3894_v15 = vmul.f32 0.5, %v3873_v2 }
 0xbe8   : > { %6231 = vtanh.f32 %v3973_v48  ;;  %v3926_v39 = vmul.f32 %v3910_v43, %v3873_v2 }
 0xbe9   : > { %v4029_v61 = vpack.c.bf16 %v4017_v46, %v4016_v55  ;;  %6233 = vtanh.f32 %v3972_v16 }
 0xbea   : > { %v3942_v6 = vmul.f32 %v3926_v39, %v3873_v2 }
 0xbeb   : > { %v3874_v50 = vpop.f32.mrf.mxu0 }
 0xbec   : > { %v3875_v14 = vadd.f32 %v8088_v9, %v3874_v50  ;;  %v3958_v33 = vadd.f32 %v3942_v6, %v3873_v2 }
 0xbee   : > { %v3911_v4 = vmul.f32 0.044715, %v3875_v14  ;;  %v3974_v31 = vmul.f32 0.7978846, %v3958_v33  ;;  %v3895_v53 = vmul.f32 0.5, %v3875_v14 }
 0xbf0   : > { %v3927_v11 = vmul.f32 %v3911_v4, %v3875_v14 }
 0xbf2   : > { %v3943_v24 = vmul.f32 %v3927_v11, %v3875_v14 }
 0xbf3   : > { %4115 = vmatmul.bf16.gmra.mxu1 %v4027_v45  ;;  %v6228_v45 = vpop.eup %6227  ;;  %v3877_v35 = vpop.f32.mrf.mxu0 }
 0xbf4   : > { %v6230_v38 = vpop.eup %6229  ;;  %v4003_v59 = vadd.f32 1.0, %v6228_v45  ;;  %v3959_v42 = vadd.f32 %v3943_v24, %v3875_v14  ;;  %v3878_v10 = vadd.f32 %v8088_v9, %v3877_v35 }
 0xbf5   : > { %v4002_v12 = vadd.f32 1.0, %v6230_v38 }
 0xbf6   : > { %v4019_v49 = vmul.f32 %v4003_v59, %v3891_v34  ;;  %v3975_v26 = vmul.f32 0.7978846, %v3959_v42  ;;  %v3912_v52 = vmul.f32 0.044715, %v3878_v10 }
 0xbf7   : > { %v4018_v25 = vmul.f32 %v4002_v12, %v3890_v41  ;;  %v3896_v41 = vmul.f32 0.5, %v3878_v10 }
 0xbf8   : > { %6235 = vtanh.f32 %v3975_v26  ;;  %v3928_v20 = vmul.f32 %v3912_v52, %v3878_v10 }
 0xbf9   : > { %v4030_v13 = vpack.c.bf16 %v4019_v49, %v4018_v25  ;;  %6237 = vtanh.f32 %v3974_v31  ;;  %v6133_v25 = vld [vmem:[%s8906_s2] ss:$0 sm:$0xff]  ;;  %s8258_s2 = scalar_lea.sflag [#allocation22], %s4573_s13 }
 0xbfa   : > { %v3944_v50 = vmul.f32 %v3928_v20, %v3878_v10 }
 0xbfb   : > { %v3879_v47 = vpop.f32.mrf.mxu0 }
 0xbfc   : > { %v3880_v5 = vadd.f32 %v8088_v9, %v3879_v47  ;;  %v3960_v29 = vadd.f32 %v3944_v50, %v3878_v10 }
 0xbfe   : > { %v3913_v62 = vmul.f32 0.044715, %v3880_v5  ;;  %v3976_v56 = vmul.f32 0.7978846, %v3960_v29  ;;  %v3897_v4 = vmul.f32 0.5, %v3880_v5 }
 0xc00   : > { %v3929_v46 = vmul.f32 %v3913_v62, %v3880_v5 }
 0xc02   : > { %v3945_v55 = vmul.f32 %v3929_v46, %v3880_v5 }
 0xc03   : > { %4120 = vmatmul.bf16.gmra.mxu1 %v4028_v30  ;;  %v6232_v30 = vpop.eup %6231 }
 0xc04   : > { %v6234_v21 = vpop.eup %6233  ;;  %v4005_v8 = vadd.f32 1.0, %v6232_v30 }
 0xc05   : > { %v4004_v27 = vadd.f32 1.0, %v6234_v21  ;;  %v6236_v18 = vpop.eup %6235 }
 0xc06   : > { %v4021_v1 = vmul.f32 %v4005_v8, %v3893_v63  ;;  %v6238_v9 = vpop.eup %6237  ;;  %v4007_v60 = vadd.f32 1.0, %v6236_v18 }
 0xc07   : > { %v4020_v28 = vmul.f32 %v4004_v27, %v3892_v0  ;;  %v4006_v45 = vadd.f32 1.0, %v6238_v9 }
 0xc08   : > { %v4023_v38 = vmul.f32 %v4007_v60, %v3895_v53 }
 0xc09   : > { %v4031_v3 = vpack.c.bf16 %v4021_v1, %v4020_v28  ;;  %v4022_v59 = vmul.f32 %v4006_v45, %v3894_v15 }
 0xc0b   : > { %v4032_v57 = vpack.c.bf16 %v4023_v38, %v4022_v59 }
 0xc13   : > { %4125 = vmatmul.bf16.gmra.mxu1 %v4029_v61  ;;  %v3961_v61 = vadd.f32 %v3945_v55, %v3880_v5 }
 0xc15   : > { %v3977_v54 = vmul.f32 0.7978846, %v3961_v61 }
 0xc17   : > { %6239 = vtanh.f32 %v3977_v54 }
 0xc18   : > { %6241 = vtanh.f32 %v3976_v56 }
 0xc1d   : > { %v6240_v35 = vpop.eup %6239 }
 0xc1e   : > { %v6242_v34 = vpop.eup %6241  ;;  %v4009_v12 = vadd.f32 1.0, %v6240_v35 }
 0xc1f   : > { %v4008_v48 = vadd.f32 1.0, %v6242_v34 }
 0xc20   : > { %v4025_v49 = vmul.f32 %v4009_v12, %v3897_v4 }
 0xc21   : > { %v4024_v43 = vmul.f32 %v4008_v48, %v3896_v41 }
 0xc23   : > { %4130 = vmatmul.bf16.gmra.mxu1 %v4030_v13  ;;  %v4033_v14 = vpack.c.bf16 %v4025_v49, %v4024_v43 }
 0xc33   : > { %4135 = vmatmul.bf16.gmra.mxu1 %v4031_v3 }
 0xc43   : > { %4140 = vmatmul.bf16.gmra.mxu1 %v4032_v57 }
 0xc50   : > { %v8114_v16 = vpop.f32.mrf.mxu1 }
 0xc53   : > { %4145 = vmatmul.bf16.gmra.mxu1 %v4033_v14 }
 0xc58   : > { %v8116_v2 = vpop.f32.mrf.mxu1 }
 0xc60   : > { %v4111_v11 = vpop.f32.mrf.mxu1 }
 0xc61   : > { %v4112_v13 = vadd.f32 %v6133_v25, %v4111_v11 }
 0xc63   : > { %4151 = vadd.xlane.f32.xlu1 %v4112_v13 }
 0xc68   : > { %v4113_v39 = vpop.f32.mrf.mxu1 }
 0xc69   : > { %v4114_v24 = vadd.f32 %v6133_v25, %v4113_v39 }
 0xc6b   : > { %4153 = vadd.xlane.f32.xlu0 %v4114_v24 }
 0xc70   : > { %v4116_v47 = vpop.f32.mrf.mxu1 }
 0xc71   : > { %v4117_v30 = vadd.f32 %v6133_v25, %v4116_v47 }
 0xc73   : > { %4155 = vadd.xlane.f32.xlu1 %v4117_v30 }
 0xc78   : > { %v4118_v6 = vpop.f32.mrf.mxu1 }
 0xc79   : > { %v4119_v21 = vadd.f32 %v6133_v25, %v4118_v6 }
 0xc7b   : > { %4157 = vadd.xlane.f32.xlu1 %v4119_v21 }
 0xc80   : > { %v4121_v5 = vpop.f32.mrf.mxu1 }
 0xc81   : > { %v4122_v42 = vadd.f32 %v6133_v25, %v4121_v5 }
 0xc83   : > { %4159 = vadd.xlane.f32.xlu1 %v4122_v42 }
 0xc88   : > { %v4123_v8 = vpop.f32.mrf.mxu1 }
 0xc89   : > { %v4124_v10 = vadd.f32 %v6133_v25, %v4123_v8 }
 0xc8b   : > { %4161 = vadd.xlane.f32.xlu0 %v4124_v10 }
 0xc90   : > { %v4126_v33 = vpop.f32.mrf.mxu1 }
 0xc91   : > { %v4127_v63 = vadd.f32 %v6133_v25, %v4126_v33 }
 0xc93   : > { %4163 = vadd.xlane.f32.xlu1 %v4127_v63 }
 0xc98   : > { %v4128_v27 = vpop.f32.mrf.mxu1 }
 0xc99   : > { %v8121_v62 = vadd.f32 %v6133_v25, %v4128_v27 }
 0xc9b   : > { %4165 = vadd.xlane.f32.xlu0 %v8121_v62 }
 0xca0   : > { %v4131_v26 = vpop.f32.mrf.mxu1 }
 0xca1   : > { %v8124_v0 = vadd.f32 %v6133_v25, %v4131_v26 }
 0xca3   : > { %4167 = vadd.xlane.f32.xlu1 %v8124_v0 }
 0xca8   : > { %v4133_v1 = vpop.f32.mrf.mxu1 }
 0xca9   : > { %v8127_v52 = vadd.f32 %v6133_v25, %v4133_v1 }
 0xcab   : > { %4169 = vadd.xlane.f32.xlu0 %v8127_v52 }
 0xcb0   : > { %v4136_v31 = vpop.f32.mrf.mxu1 }
 0xcb1   : > { %v8130_v28 = vadd.f32 %v6133_v25, %v4136_v31 }
 0xcb3   : > { %4171 = vadd.xlane.f32.xlu1 %v8130_v28 }
 0xcb8   : > { %v4138_v46 = vpop.f32.mrf.mxu1 }
 0xcb9   : > { %v8133_v3 = vadd.f32 %v6133_v25, %v4138_v46 }
 0xcbb   : > { %4173 = vadd.xlane.f32.xlu0 %v8133_v3 }
 0xcc0   : > { %v4141_v20 = vpop.f32.mrf.mxu1 }
 0xcc1   : > { %v8136_v55 = vadd.f32 %v6133_v25, %v4141_v20 }
 0xcc3   : > { %4175 = vadd.xlane.f32.xlu1 %v8136_v55 }
 0xcc8   : > { %v4143_v18 = vpop.f32.mrf.mxu1 }
 0xcc9   : > { %v8139_v50 = vadd.f32 %v6133_v25, %v4143_v18 }
 0xccb   : > { %4177 = vadd.xlane.f32.xlu0 %v8139_v50 }
 0xcd0   : > { %v4146_v9 = vpop.f32.mrf.mxu1 }
 0xcd1   : > { %v8142_v61 = vadd.f32 %v6133_v25, %v4146_v9 }
 0xcd3   : > { %4179 = vadd.xlane.f32.xlu1 %v8142_v61 }
 0xcd6   : > { %v4152_v60 = vpop.xlane.xlu1 %4151 }
 0xcd7   : > { %v4183_v29 = vmul.f32 %v4152_v60, %v7883_v44 }
 0xcd8   : > { %v4148_v53 = vpop.f32.mrf.mxu1 }
 0xcd9   : > { %v8146_v45 = vsub.f32 %v4112_v13, %v4183_v29  ;;  %v8148_v54 = vadd.f32 %v6133_v25, %v4148_v53 }
 0xcdb   : > { %4181 = vadd.xlane.f32.xlu0 %v8148_v54  ;;  %v4215_v15 = vmul.f32 %v8146_v45, %v8146_v45 }
 0xcdd   : > { %4231 = vadd.xlane.f32.xlu2 %v4215_v15 }
 0xcde   : > { %v4154_v38 = vpop.xlane.xlu0 %4153 }
 0xcdf   : > { %v4184_v56 = vmul.f32 %v4154_v38, %v7883_v44 }
 0xce1   : > { %v8154_v59 = vsub.f32 %v4114_v24, %v4184_v56 }
 0xce3   : > { %v4216_v57 = vmul.f32 %v8154_v59, %v8154_v59 }
 0xce5   : > { %4233 = vadd.xlane.f32.xlu1 %v4216_v57 }
 0xce6   : > { %v4156_v35 = vpop.xlane.xlu1 %4155 }
 0xce7   : > { %v4185_v34 = vmul.f32 %v4156_v35, %v7883_v44 }
 0xce9   : > { %v8159_v12 = vsub.f32 %v4117_v30, %v4185_v34 }
 0xceb   : > { %v4217_v4 = vmul.f32 %v8159_v12, %v8159_v12 }
 0xced   : > { %4235 = vadd.xlane.f32.xlu0 %v4217_v4 }
 0xcee   : > { %v4158_v48 = vpop.xlane.xlu1 %4157 }
 0xcef   : > { %v4186_v41 = vmul.f32 %v4158_v48, %v7883_v44 }
 0xcf1   : > { %v8164_v49 = vsub.f32 %v4119_v21, %v4186_v41 }
 0xcf3   : > { %v4218_v43 = vmul.f32 %v8164_v49, %v8164_v49 }
 0xcf5   : > { %4237 = vadd.xlane.f32.xlu2 %v4218_v43 }
 0xcf6   : > { %v4160_v14 = vpop.xlane.xlu1 %4159 }
 0xcf7   : > { %v4187_v25 = vmul.f32 %v4160_v14, %v7883_v44 }
 0xcf9   : > { %v8169_v11 = vsub.f32 %v4122_v42, %v4187_v25 }
 0xcfb   : > { %v4219_v13 = vmul.f32 %v8169_v11, %v8169_v11 }
 0xcfd   : > { %4239 = vadd.xlane.f32.xlu1 %v4219_v13 }
 0xcfe   : > { %v4162_v39 = vpop.xlane.xlu0 %4161 }
 0xcff   : > { %v4188_v24 = vmul.f32 %v4162_v39, %v7883_v44  ;;  %v3217_v39 = vmul.f32 1.442695, %v3215_v40 }
 0xd01   : > { %v8174_v47 = vsub.f32 %v4124_v10, %v4188_v24  ;;  %v3219_v24 = vmul.f32 1.442695, %v3216_v19  ;;  %6243 = vpow2.f32 %v3217_v39 }
 0xd03   : > { %v4220_v30 = vmul.f32 %v8174_v47, %v8174_v47  ;;  %6245 = vpow2.f32 %v3219_v24 }
 0xd05   : > { %4241 = vadd.xlane.f32.xlu0 %v4220_v30 }
 0xd06   : > { %v4164_v6 = vpop.xlane.xlu1 %4163 }
 0xd07   : > { %v4189_v21 = vmul.f32 %v4164_v6, %v7883_v44  ;;  %v8243_v30 = vpop.eup %6243 }
 0xd09   : > { %v8179_v5 = vsub.f32 %v4127_v63, %v4189_v21  ;;  %v8247_v36 = vpop.eup %6245 }
 0xd0b   : > { %v4221_v42 = vmul.f32 %v8179_v5, %v8179_v5 }
 0xd0d   : > { %4243 = vadd.xlane.f32.xlu2 %v4221_v42 }
 0xd0e   : > { %v4166_v8 = vpop.xlane.xlu0 %4165 }
 0xd0f   : > { %v4190_v33 = vmul.f32 %v4166_v8, %v7883_v44 }
 0xd11   : > { %v8185_v27 = vsub.f32 %v8121_v62, %v4190_v33 }
 0xd13   : > { %v4222_v10 = vmul.f32 %v8185_v27, %v8185_v27 }
 0xd15   : > { %4245 = vadd.xlane.f32.xlu1 %v4222_v10 }
 0xd16   : > { %v4168_v26 = vpop.xlane.xlu1 %4167 }
 0xd17   : > { %v4191_v1 = vmul.f32 %v4168_v26, %v7883_v44 }
 0xd19   : > { %v8191_v63 = vsub.f32 %v8124_v0, %v4191_v1 }
 0xd1b   : > { %v4223_v31 = vmul.f32 %v8191_v63, %v8191_v63 }
 0xd1d   : > { %4247 = vadd.xlane.f32.xlu0 %v4223_v31 }
 0xd1e   : > { %v4170_v46 = vpop.xlane.xlu0 %4169 }
 0xd1f   : > { %v4192_v20 = vmul.f32 %v4170_v46, %v7883_v44 }
 0xd21   : > { %v8197_v62 = vsub.f32 %v8127_v52, %v4192_v20 }
 0xd23   : > { %v4224_v18 = vmul.f32 %v8197_v62, %v8197_v62 }
 0xd25   : > { %4249 = vadd.xlane.f32.xlu2 %v4224_v18 }
 0xd26   : > { %v4172_v9 = vpop.xlane.xlu1 %4171 }
 0xd27   : > { %v4193_v60 = vmul.f32 %v4172_v9, %v7883_v44 }
 0xd29   : > { %v8203_v0 = vsub.f32 %v8130_v28, %v4193_v60 }
 0xd2b   : > { %v4225_v29 = vmul.f32 %v8203_v0, %v8203_v0 }
 0xd2d   : > { %4251 = vadd.xlane.f32.xlu1 %v4225_v29 }
 0xd2e   : > { %v4174_v53 = vpop.xlane.xlu0 %4173 }
 0xd2f   : > { %v4194_v15 = vmul.f32 %v4174_v53, %v7883_v44 }
 0xd31   : > { %v8209_v52 = vsub.f32 %v8133_v3, %v4194_v15 }
 0xd33   : > { %v4226_v38 = vmul.f32 %v8209_v52, %v8209_v52 }
 0xd35   : > { %4253 = vadd.xlane.f32.xlu0 %v4226_v38 }
 0xd36   : > { %v4176_v56 = vpop.xlane.xlu1 %4175 }
 0xd37   : > { %v4195_v57 = vmul.f32 %v4176_v56, %v7883_v44 }
 0xd39   : > { %v8215_v28 = vsub.f32 %v8136_v55, %v4195_v57 }
 0xd3b   : > { %v4227_v35 = vmul.f32 %v8215_v28, %v8215_v28 }
 0xd3d   : > { %4255 = vadd.xlane.f32.xlu2 %v4227_v35 }
 0xd3e   : > { %v4178_v34 = vpop.xlane.xlu0 %4177 }
 0xd3f   : > { %v4196_v4 = vmul.f32 %v4178_v34, %v7883_v44 }
 0xd41   : > { %v8221_v3 = vsub.f32 %v8139_v50, %v4196_v4 }
 0xd43   : > { %v4228_v48 = vmul.f32 %v8221_v3, %v8221_v3 }
 0xd45   : > { %4257 = vadd.xlane.f32.xlu1 %v4228_v48 }
 0xd46   : > { %v4180_v41 = vpop.xlane.xlu1 %4179 }
 0xd47   : > { %v4197_v43 = vmul.f32 %v4180_v41, %v7883_v44 }
 0xd49   : > { %v8227_v55 = vsub.f32 %v8142_v61, %v4197_v43 }
 0xd4b   : > { %v4229_v14 = vmul.f32 %v8227_v55, %v8227_v55 }
 0xd4d   : > { %4259 = vadd.xlane.f32.xlu0 %v4229_v14 }
 0xd4e   : > { %v4182_v25 = vpop.xlane.xlu0 %4181 }
 0xd4f   : > { %v4198_v50 = vmul.f32 %v4182_v25, %v7883_v44 }
 0xd51   : > { %v8233_v13 = vsub.f32 %v8148_v54, %v4198_v50 }
 0xd53   : > { %v4230_v61 = vmul.f32 %v8233_v13, %v8233_v13 }
 0xd55   : > { %4261 = vadd.xlane.f32.xlu2 %v4230_v61 }
 0xd5d   : > { %3241 = vadd.xlane.f32.xlu2 %v8096_v51 }
 0xd5e   : > { %3254 = vperm.xlu1 %6130, %v8243_v30  }
 0xd61   : > { %3259 = vperm.xlu0 %6131, %v8247_v36  }
 0xd65   : > { %3243 = vadd.xlane.f32.xlu2 %v8098_v7 }
 0xd66   : > { %6486 = shalt.err (!%p6483_p5)
}
 0xd67   : > { %s6666_s25 = smov 64   ;;  %s6667_s13 = smov 128  }
 0xd68   : > { %s6668_s22 = smov 4   ;;  %s8908_s11 = sld [smem:[#allocation47_spill]] }
 0xd69   : > { %5997 = dma.vmem_to_hbm [thread:$0]  (%p6865_p4), %s4628_s24, 128, %s4630_s9, %s8258_s2, %s6666_s25, %s6667_s13, %s6668_s22  }
 0xd6a   : > { %s8909_s26 = scalar_lea.vmem [#allocation20], %s6915_s7  ;;  %s4569_s3 = scalar_lea.sflag [#allocation11], %s6890_s21 }
 0xd6b   : > { %s4610_s6 = sshll.u32 %s8909_s26, 4  ;;  %s4611_s6 = int_to_ptr.vmem [resolvable:$true] %s4610_s6 }
 0xd6e   : > { %s4609_s12 = scalar_lea.hbm %s8908_s11, %s5753_s8  ;;  %s6507_s24 = scalar_lea.hbm %s8908_s11, 16 }
 0xd6f   : > { %s4612_s23 = sshll.u32 %s4609_s12, 4  ;;  %s4613_s23 = int_to_ptr.hbm [resolvable:$true] %s4612_s23 }
 0xd70   : > { %s6501_s10 = sshra.s32 %s4613_s23, 4  ;;  %s6502_s10 = int_to_ptr.hbm [resolvable:$true] %s6501_s10 }
 0xd71   : > { %s6503_s14 = scalar_lea.hbm %s6502_s10, 8  ;;  %p6508_p8 = scmp.lt.s32.totalorder %s6502_s10, %s8908_s11 }
 0xd72   : > { %p6504_p9 = scmp.ne.s32.totalorder %s6502_s10, %s6503_s14  ;;  %p6509_p10 = scmp.lt.s32.totalorder %s6507_s24, %s6503_s14 }
 0xd74   : > { %p6505_p1 = pnand %p6504_p9, %p6865_p4  ;;  %p6510_p11 = por %p6509_p10, %p6508_p8 }
 0xd76   : > { %p6506_p3 = pneg %p6505_p1 }
 0xd78   : > { %p6511_p12 = pnand %p6510_p11, %p6506_p3 }
 0xd7a   : > { %6514 = shalt.err (!%p6511_p12)
}
 0xd7b   : > { %5996 = dma.vmem_to_hbm [thread:$0]  (%p6865_p4), %s4611_s6, 128, %s4613_s23, %s4569_s3, %s6666_s25, %s6667_s13, %s6668_s22   ;;  %v4232_v17 = vpop.xlane.xlu2 %4231  ;;  %v4234_v40 = vpop.xlane.xlu1 %4233  ;;  %v3138_v14 = vadd.s32 8, %v7858_v32 }
 0xd7c   : > { %v4264_v22 = vmul.f32 %v4234_v40, %v7883_v44  ;;  %v4263_v58 = vmul.f32 %v4232_v17, %v7883_v44  ;;  %v4236_v19 = vpop.xlane.xlu0 %4235  ;;  %s5944_s14 = sshll.u32 %s6637_s0, 4  ;;  %s8936_s8 = sld [smem:[#allocation51_spill]] }
 0xd7d   : > { %v4265_v54 = vmul.f32 %v4236_v19, %v7883_v44  ;;  %v8346_v19 = vadd.s32 %v3138_v14, %v8000_v37  ;;  %s4652_s25 = sshll.u32 %s6967_s5, 4  ;;  %s8741_s25 = int_to_ptr.vmem [resolvable:$true] %s4652_s25 }
 0xd7e   : > { %v8291_v7 = vadd.f32 1e-05, %v4264_v22  ;;  %v8294_v6 = vadd.f32 1e-05, %v4263_v58  ;;  %v3139_v22 = vadd.s32 16, %v7858_v32 }
 0xd7f   : > { %v8298_v42 = vadd.f32 1e-05, %v4265_v54  ;;  %vm3170_vm1 = vcmp.lt.s32.totalorder %v8346_v19, %v8003_v23  ;;  %v3143_v19 = vadd.s32 48, %v7858_v32 }
 0xd80   : > { %6247 = vrsqrt.f32 %v8291_v7  ;;  %vm4301_vm3 = vweird.f32 %v8294_v6  ;;  %vm4311_vm5 = vweird.f32 %v8291_v7 }
 0xd81   : > { %6249 = vrsqrt.f32 %v8294_v6  ;;  %vm4321_vm10 = vweird.f32 %v8298_v42 }
 0xd82   : > { %6251 = vrsqrt.f32 %v8298_v42  ;;  %s8693_s10 = scalar_lea.hbm %s8936_s8, %s5944_s14  ;;  %s6535_s23 = scalar_lea.hbm %s8936_s8, 32 }
 0xd83   : > { %v4238_v51 = vpop.xlane.xlu2 %4237  ;;  %v4240_v8 = vpop.xlane.xlu1 %4239  ;;  %s4654_s22 = sshll.u32 %s8693_s10, 4  ;;  %s8748_s22 = int_to_ptr.hbm [resolvable:$true] %s4654_s22 }
 0xd84   : > { %v4266_v21 = vmul.f32 %v4238_v51, %v7883_v44  ;;  %v4267_v10 = vmul.f32 %v4240_v8, %v7883_v44  ;;  %v4242_v26 = vpop.xlane.xlu0 %4241  ;;  %s6529_s19 = sshra.s32 %s8748_s22, 4  ;;  %s6530_s19 = int_to_ptr.hbm [resolvable:$true] %s6529_s19 }
 0xd85   : > { %v4268_v18 = vmul.f32 %v4242_v26, %v7883_v44  ;;  %s6531_s12 = scalar_lea.hbm %s6530_s19, 16  ;;  %p6536_p5 = scmp.lt.s32.totalorder %s6530_s19, %s8936_s8 }
 0xd86   : > { %v8301_v33 = vadd.f32 1e-05, %v4266_v21  ;;  %v8305_v1 = vpop.eup %6247  ;;  %v8310_v20 = vadd.f32 1e-05, %v4267_v10  ;;  %p6532_p13 = scmp.ne.s32.totalorder %s6530_s19, %s6531_s12  ;;  %p6537_p9 = scmp.lt.s32.totalorder %s6535_s23, %s6531_s12 }
 0xd87   : > { %v8308_v31 = vpop.eup %6249  ;;  %v4306_v9 = vmul.f32 %v8305_v1, %v8291_v7  ;;  %v8323_v38 = vadd.f32 1e-05, %v4268_v18  ;;  %v8357_v18 = vadd.s32 %v7858_v32, %v8000_v37  ;;  %vm4312_vm0 = vweird.f32 %v8305_v1 }
 0xd88   : > { %6253 = vrsqrt.f32 %v8301_v33  ;;  %v8315_v60 = vpop.eup %6251  ;;  %v4296_v29 = vmul.f32 %v8308_v31, %v8294_v6  ;;  %vm4302_vm2 = vweird.f32 %v8308_v31  ;;  %vm8384_vm6 = vmor %vm4311_vm5, %vm4312_vm0  ;;  %v3141_v6 = vadd.s32 32, %v7858_v32  ;;  %p6533_p0 = pnand %p6532_p13, %p6865_p4  ;;  %p6538_p1 = por %p6537_p9, %p6536_p5 }
 0xd89   : > { %6255 = vrsqrt.f32 %v8310_v20  ;;  %v4307_v56 = vmul.f32 %v8305_v1, %v4306_v9  ;;  %v4316_v57 = vmul.f32 %v8315_v60, %v8298_v42  ;;  %vm4322_vm7 = vweird.f32 %v8315_v60  ;;  %vm8396_vm9 = vmor %vm4301_vm3, %vm4302_vm2 }
 0xd8a   : > { %v4297_v34 = vmul.f32 %v8308_v31, %v4296_v29  ;;  %6257 = vrsqrt.f32 %v8323_v38  ;;  %vm3169_vm8 = vcmp.lt.s32.totalorder %v8357_v18, %v8003_v23  ;;  %vm8422_vm12 = vmor %vm4321_vm10, %vm4322_vm7  ;;  %vm4331_vm13 = vweird.f32 %v8301_v33  ;;  %p6534_p2 = pneg %p6533_p0 }
 0xd8b   : > { %v4244_v46 = vpop.xlane.xlu2 %4243  ;;  %v4246_v35 = vpop.xlane.xlu1 %4245  ;;  %v4308_v25 = vmul.f32 0.5, %v4307_v56  ;;  %v4317_v50 = vmul.f32 %v8315_v60, %v4316_v57  ;;  %v3140_v56 = vadd.s32 24, %v7858_v32  ;;  %v3146_v42 = vadd.s32 72, %v7858_v32 }
 0xd8c   : > { %v4269_v53 = vmul.f32 %v4244_v46, %v7883_v44  ;;  %v4270_v43 = vmul.f32 %v4246_v35, %v7883_v44  ;;  %v4298_v61 = vmul.f32 0.5, %v4297_v34  ;;  %p6539_p3 = pnand %p6538_p1, %p6534_p2 }
 0xd8d   : > { %v4309_v51 = vsub.f32 1.5, %v4308_v25  ;;  %v4318_v54 = vmul.f32 0.5, %v4317_v50 }
 0xd8e   : > { %v8320_v15 = vpop.eup %6253  ;;  %v8329_v4 = vadd.f32 1e-05, %v4269_v53  ;;  %v8343_v58 = vadd.f32 1e-05, %v4270_v43  ;;  %v4299_v10 = vsub.f32 1.5, %v4298_v61  ;;  %v8363_v53 = vadd.s32 %v3139_v22, %v8000_v37 }
 0xd8f   : > { %v4326_v48 = vmul.f32 %v8320_v15, %v8301_v33  ;;  %v8337_v39 = vpop.eup %6255  ;;  %v4310_v57 = vmul.f32 %v8305_v1, %v4309_v51  ;;  %v4319_v35 = vsub.f32 1.5, %v4318_v54  ;;  %vm4332_vm11 = vweird.f32 %v8320_v15 }
 0xd90   : > { %v4248_v41 = vpop.xlane.xlu0 %4247  ;;  %6259 = vrsqrt.f32 %v8329_v4  ;;  %v4336_v21 = vmul.f32 %v8337_v39, %v8310_v20  ;;  %v8350_v8 = vpop.eup %6257  ;;  %v4300_v43 = vmul.f32 %v8308_v31, %v4299_v10  ;;  %vm3171_vm14 = vcmp.lt.s32.totalorder %v8363_v53, %v8003_v23  ;;  %vm8444_vm0 = vmor %vm4331_vm13, %vm4332_vm11 }
 0xd91   : > { %v4271_v24 = vmul.f32 %v4248_v41, %v7883_v44  ;;  %v4327_v17 = vmul.f32 %v8320_v15, %v4326_v48  ;;  %6261 = vrsqrt.f32 %v8343_v58  ;;  %v4346_v48 = vmul.f32 %v8350_v8, %v8323_v38 }
 0xd92   : > { %v4337_v34 = vmul.f32 %v8337_v39, %v4336_v21  ;;  %v4314_v22 = vsel %vm8384_vm6, %v8305_v1, %v4310_v57  ;;  %v4320_v51 = vmul.f32 %v8315_v60, %v4319_v35  ;;  %v3142_v1 = vadd.s32 40, %v7858_v32 }
 0xd93   : > { %v8352_v26 = vadd.f32 1e-05, %v4271_v24  ;;  %v4328_v9 = vmul.f32 0.5, %v4327_v17  ;;  %v8390_v17 = vadd.s32 %v3140_v56, %v8000_v37  ;;  %v4347_v21 = vmul.f32 %v8350_v8, %v4346_v48 }
 0xd94   : > { %v4338_v54 = vmul.f32 0.5, %v4337_v34  ;;  %v4456_v34 = vmul.f32 %v4314_v22, %v8154_v59  ;;  %vm4342_vm3 = vweird.f32 %v8337_v39  ;;  %vm4352_vm7 = vweird.f32 %v8350_v8 }
 0xd95   : > { %6263 = vrsqrt.f32 %v8352_v26  ;;  %v4329_v25 = vsub.f32 1.5, %v4328_v9  ;;  %vm3172_vm15 = vcmp.lt.s32.totalorder %v8390_v17, %v8003_v23  ;;  %vm4361_vm11 = vweird.f32 %v8329_v4 }
 0xd96   : > { %v8359_v29 = vpop.eup %6259  ;;  %v4505_v22 = vsel %vm3170_vm1, %v4456_v34, 0.0  ;;  %vm4341_vm1 = vweird.f32 %v8310_v20  ;;  %v3144_v20 = vadd.s32 56, %v7858_v32 }
 0xd97   : > { %v4356_v50 = vmul.f32 %v8359_v29, %v8329_v4  ;;  %v8405_v10 = vpop.eup %6261  ;;  %v4330_v56 = vmul.f32 %v8320_v15, %v4329_v25  ;;  %v4348_v25 = vmul.f32 0.5, %v4347_v21  ;;  %vm8486_vm5 = vmor %vm4341_vm1, %vm4342_vm3  ;;  %vm4381_vm1 = vweird.f32 %v8352_v26 }
 0xd98   : > { %v4250_v40 = vpop.xlane.xlu2 %4249  ;;  %v4366_v59 = vmul.f32 %v8405_v10, %v8343_v58 }
 0xd99   : > { %v4272_v46 = vmul.f32 %v4250_v40, %v7883_v44  ;;  %v4357_v57 = vmul.f32 %v8359_v29, %v4356_v50  ;;  %v4349_v21 = vsub.f32 1.5, %v4348_v25 }
 0xd9b   : > { %v8376_v14 = vadd.f32 1e-05, %v4272_v46  ;;  %v4304_v46 = vsel %vm8396_vm9, %v8308_v31, %v4300_v43  ;;  %v8417_v35 = vpop.eup %6263  ;;  %v8428_v31 = vadd.s32 %v3141_v6, %v8000_v37  ;;  %v4339_v43 = vsub.f32 1.5, %v4338_v54 }
 0xd9c   : > { %v4455_v50 = vmul.f32 %v4304_v46, %v8146_v45  ;;  %v8454_v45 = vadd.s32 %v3142_v1, %v8000_v37  ;;  %v4358_v24 = vmul.f32 0.5, %v4357_v57  ;;  %v4376_v6 = vmul.f32 %v8417_v35, %v8352_v26 }
 0xd9d   : > { %6265 = vrsqrt.f32 %v8376_v14  ;;  %vm3173_vm2 = vcmp.lt.s32.totalorder %v8428_v31, %v8003_v23  ;;  %v4340_v54 = vmul.f32 %v8337_v39, %v4339_v43  ;;  %v4367_v46 = vmul.f32 %v8405_v10, %v4366_v59 }
 0xd9e   : > { %v4377_v1 = vmul.f32 %v8417_v35, %v4376_v6  ;;  %v4504_v34 = vsel %vm3169_vm8, %v4455_v50, 0.0  ;;  %vm3174_vm6 = vcmp.lt.s32.totalorder %v8454_v45, %v8003_v23  ;;  %v4350_v18 = vmul.f32 %v8350_v8, %v4349_v21 }
 0xd9f   : > { %v4368_v53 = vmul.f32 0.5, %v4367_v46  ;;  %v4520_v25 = vadd.f32 %v4505_v22, %v4504_v34  ;;  %vm4351_vm8 = vweird.f32 %v8323_v38  ;;  %v3159_v50 = vadd.s32 %v3143_v19, %v8000_v37 }
 0xda0   : > { %v4252_v41 = vpop.xlane.xlu1 %4251  ;;  %vm4362_vm9 = vweird.f32 %v8359_v29  ;;  %v4378_v33 = vmul.f32 0.5, %v4377_v1  ;;  %vm8514_vm10 = vmor %vm4351_vm8, %vm4352_vm7  ;;  %v8519_v38 = vadd.s32 %v3144_v20, %v8000_v37  ;;  %v3145_v19 = vadd.s32 64, %v7858_v32 }
 0xda1   : > { %v4273_v7 = vmul.f32 %v4252_v41, %v7883_v44  ;;  %v4324_v41 = vsel %vm8422_vm12, %v8315_v60, %v4320_v51  ;;  %vm3175_vm12 = vcmp.lt.s32.totalorder %v3159_v50, %v8003_v23  ;;  %vm8533_vm13 = vmor %vm4361_vm11, %vm4362_vm9  ;;  %vm4391_vm7 = vweird.f32 %v8376_v14 }
 0xda2   : > { %v4457_v51 = vmul.f32 %v4324_v41, %v8159_v12  ;;  %v4344_v41 = vsel %vm8486_vm5, %v8337_v39, %v4340_v54  ;;  %v4369_v54 = vsub.f32 1.5, %v4368_v53 }
 0xda3   : > { %v8430_v48 = vadd.f32 1e-05, %v4273_v7  ;;  %v8458_v40 = vpop.eup %6265  ;;  %v4459_v22 = vmul.f32 %v4344_v41, %v8169_v11 }
 0xda4   : > { %v4386_v57 = vmul.f32 %v8458_v40, %v8376_v14 }
 0xda5   : > { %6267 = vrsqrt.f32 %v8430_v48  ;;  %v4508_v34 = vsel %vm3173_vm2, %v4459_v22, 0.0  ;;  %vm4382_vm2 = vweird.f32 %v8417_v35 }
 0xda6   : > { %vm8587_vm5 = vmor %vm4381_vm1, %vm4382_vm2 }
 0xda8   : > { %v4254_v61 = vpop.xlane.xlu0 %4253 }
 0xda9   : > { %v4274_v9 = vmul.f32 %v4254_v61, %v7883_v44  ;;  %v4334_v61 = vsel %vm8444_vm0, %v8320_v15, %v4330_v56  ;;  %v4359_v56 = vsub.f32 1.5, %v4358_v24  ;;  %vm4371_vm0 = vweird.f32 %v8343_v58 }
 0xdaa   : > { %v8573_v58 = vadd.s32 %v3146_v42, %v8000_v37 }
 0xdab   : > { %v8448_v60 = vadd.f32 1e-05, %v4274_v9  ;;  %v4458_v9 = vmul.f32 %v4334_v61, %v8164_v49  ;;  %v4506_v49 = vsel %vm3171_vm14, %v4457_v51, 0.0  ;;  %v8499_v43 = vpop.eup %6267  ;;  %v4360_v39 = vmul.f32 %v8359_v29, %v4359_v56 }
 0xdac   : > { %v4387_v61 = vmul.f32 %v8458_v40, %v4386_v57  ;;  %v4396_v11 = vmul.f32 %v8499_v43, %v8430_v48  ;;  %v4379_v56 = vsub.f32 1.5, %v4378_v33  ;;  %vm3176_vm14 = vcmp.lt.s32.totalorder %v8519_v38, %v8003_v23 }
 0xdad   : > { %6269 = vrsqrt.f32 %v8448_v60  ;;  %v4507_v59 = vsel %vm3172_vm15, %v4458_v9, 0.0  ;;  %v4364_v4 = vsel %vm8533_vm13, %v8359_v29, %v4360_v39  ;;  %v4370_v29 = vmul.f32 %v8405_v10, %v4369_v54  ;;  %v3237_v9 = vld [vmem:[#allocation3] sm:$0xff] }
 0xdae   : > { %v4388_v1 = vmul.f32 0.5, %v4387_v61  ;;  %vm4372_vm15 = vweird.f32 %v8405_v10  ;;  %v4397_v20 = vmul.f32 %v8499_v43, %v4396_v11  ;;  %v4461_v31 = vmul.f32 %v4364_v4, %v8179_v5 }
 0xdaf   : > { %v4380_v53 = vmul.f32 %v8417_v35, %v4379_v56  ;;  %vm8568_vm3 = vmor %vm4371_vm0, %vm4372_vm15  ;;  %v3148_v4 = vadd.s32 88, %v7858_v32  ;;  %v3239_v14 = vmul.f32 %v8243_v30, %v3237_v9  ;;  %vm4401_vm13 = vweird.f32 %v8430_v48 }
 0xdb0   : > { %v4256_v7 = vpop.xlane.xlu2 %4255  ;;  %v4398_v22 = vmul.f32 0.5, %v4397_v20  ;;  %vm4411_vm2 = vweird.f32 %v8448_v60 }
 0xdb1   : > { %v4275_v15 = vmul.f32 %v4256_v7, %v7883_v44  ;;  %v4521_v7 = vadd.f32 %v4520_v25, %v4506_v49  ;;  %v4389_v25 = vsub.f32 1.5, %v4388_v1  ;;  %v4384_v54 = vsel %vm8587_vm5, %v8417_v35, %v4380_v53 }
 0xdb2   : > { %v4399_v56 = vsub.f32 1.5, %v4398_v22  ;;  %v3149_v1 = vadd.s32 96, %v7858_v32  ;;  %v3250_v22 = vld [vmem:[#allocation4] sm:$0xff] }
 0xdb3   : > { %v8474_v12 = vadd.f32 1e-05, %v4275_v15  ;;  %v8509_v6 = vpop.eup %6269  ;;  %v4354_v15 = vsel %vm8514_vm10, %v8350_v8, %v4350_v18  ;;  %v4522_v46 = vadd.f32 %v4521_v7, %v4507_v59  ;;  %v3147_v18 = vadd.s32 80, %v7858_v32 }
 0xdb4   : > { %v4406_v57 = vmul.f32 %v8509_v6, %v8448_v60  ;;  %v4460_v49 = vmul.f32 %v4354_v15, %v8174_v47  ;;  %v3161_v47 = vadd.s32 %v3145_v19, %v8000_v37  ;;  %v4374_v7 = vsel %vm8568_vm3, %v8405_v10, %v4370_v29 }
 0xdb5   : > { %6271 = vrsqrt.f32 %v8474_v12  ;;  %v4523_v33 = vadd.f32 %v4522_v46, %v4508_v34  ;;  %v8593_v10 = vadd.s32 %v3147_v18, %v8000_v37  ;;  %v4390_v50 = vmul.f32 %v8458_v40, %v4389_v25 }
 0xdb6   : > { %v4407_v59 = vmul.f32 %v8509_v6, %v4406_v57  ;;  %v4509_v61 = vsel %vm3174_vm6, %v4460_v49, 0.0  ;;  %vm4392_vm6 = vweird.f32 %v8458_v40  ;;  %v4462_v19 = vmul.f32 %v4374_v7, %v8185_v27 }
 0xdb7   : > { %v4524_v34 = vadd.f32 %v4523_v33, %v4509_v61  ;;  %vm3177_vm8 = vcmp.lt.s32.totalorder %v3161_v47, %v8003_v23  ;;  %v4463_v49 = vmul.f32 %v4384_v54, %v8191_v63  ;;  %vm8613_vm9 = vmor %vm4391_vm7, %vm4392_vm6  ;;  %vm3178_vm10 = vcmp.lt.s32.totalorder %v8573_v58, %v8003_v23 }
 0xdb8   : > { %v4258_v24 = vpop.xlane.xlu1 %4257  ;;  %v4408_v11 = vmul.f32 0.5, %v4407_v59  ;;  %v4394_v42 = vsel %vm8613_vm9, %v8458_v40, %v4390_v50  ;;  %v4511_v63 = vsel %vm3176_vm14, %v4462_v19, 0.0  ;;  %v8627_v18 = vadd.s32 %v3148_v4, %v8000_v37  ;;  %v3251_v4 = vld [vmem:[#allocation4 + $0x8] sm:$0xff] }
 0xdb9   : > { %v4276_v51 = vmul.f32 %v4258_v24, %v7883_v44  ;;  %vm3179_vm11 = vcmp.lt.s32.totalorder %v8593_v10, %v8003_v23  ;;  %v4400_v53 = vmul.f32 %v8499_v43, %v4399_v56  ;;  %v8635_v40 = vadd.s32 %v3149_v1, %v8000_v37 }
 0xdba   : > { %v4409_v29 = vsub.f32 1.5, %v4408_v11  ;;  %v4512_v38 = vsel %vm3177_vm8, %v4463_v49, 0.0  ;;  %vm4412_vm14 = vweird.f32 %v8509_v6  ;;  %vm3180_vm0 = vcmp.lt.s32.totalorder %v8627_v18, %v8003_v23 }
 0xdbb   : > { %v8528_v21 = vpop.eup %6271  ;;  %v8538_v8 = vadd.f32 1e-05, %v4276_v51  ;;  %v4510_v51 = vsel %vm3175_vm12, %v4461_v31, 0.0  ;;  %vm4402_vm12 = vweird.f32 %v8499_v43  ;;  %vm3181_vm3 = vcmp.lt.s32.totalorder %v8635_v40, %v8003_v23  ;;  %vm8671_vm5 = vmor %vm4411_vm2, %vm4412_vm14 }
 0xdbc   : > { %v4416_v41 = vmul.f32 %v8528_v21, %v8474_v12  ;;  %v4525_v31 = vadd.f32 %v4524_v34, %v4510_v51  ;;  %v4410_v33 = vmul.f32 %v8509_v6, %v4409_v29  ;;  %vm8649_vm15 = vmor %vm4401_vm13, %vm4402_vm12  ;;  %vm4422_vm1 = vweird.f32 %v8528_v21 }
 0xdbd   : > { %6273 = vrsqrt.f32 %v8538_v8  ;;  %vm4421_vm6 = vweird.f32 %v8474_v12  ;;  %v3150_v51 = vadd.s32 104, %v7858_v32  ;;  %v3151_v12 = vadd.s32 112, %v7858_v32 }
 0xdbe   : > { %v4417_v17 = vmul.f32 %v8528_v21, %v4416_v41  ;;  %v4414_v15 = vsel %vm8671_vm5, %v8509_v6, %v4410_v33  ;;  %vm8685_vm8 = vmor %vm4421_vm6, %vm4422_vm1  ;;  %vm4431_vm9 = vweird.f32 %v8538_v8  ;;  %v3152_v10 = vadd.s32 120, %v7858_v32 }
 0xdc0   : > { %v4260_v39 = vpop.xlane.xlu0 %4259  ;;  %v4418_v57 = vmul.f32 0.5, %v4417_v17 }
 0xdc1   : > { %v4277_v24 = vmul.f32 %v4260_v39, %v7883_v44  ;;  %v4464_v39 = vmul.f32 %v4394_v42, %v8197_v62  ;;  %v4404_v62 = vsel %vm8649_vm15, %v8499_v43, %v4400_v53  ;;  %v3238_v42 = vld [vmem:[#allocation3 + $0x8] sm:$0xff] }
 0xdc2   : > { %v4419_v25 = vsub.f32 1.5, %v4418_v57  ;;  %v4466_v57 = vmul.f32 %v4414_v15, %v8209_v52  ;;  %v3240_v53 = vmul.f32 %v8247_v36, %v3238_v42 }
 0xdc3   : > { %v8581_v45 = vpop.eup %6273  ;;  %v8595_v26 = vadd.f32 1e-05, %v4277_v24  ;;  %v4526_v24 = vadd.f32 %v4525_v31, %v4511_v63  ;;  %v4513_v60 = vsel %vm3178_vm10, %v4464_v39, 0.0 }
 0xdc4   : > { %v4426_v46 = vmul.f32 %v8581_v45, %v8538_v8  ;;  %v4420_v48 = vmul.f32 %v8528_v21, %v4419_v25  ;;  %vm4432_vm7 = vweird.f32 %v8581_v45 }
 0xdc5   : > { %6275 = vrsqrt.f32 %v8595_v26  ;;  %v4527_v17 = vadd.f32 %v4526_v24, %v4512_v38  ;;  %vm8706_vm12 = vmor %vm4431_vm9, %vm4432_vm7  ;;  %vm4441_vm13 = vweird.f32 %v8595_v26  ;;  %v3168_v38 = vadd.s32 %v3152_v10, %v8000_v37 }
 0xdc6   : > { %v4427_v35 = vmul.f32 %v8581_v45, %v4426_v46  ;;  %v4465_v46 = vmul.f32 %v4404_v62, %v8203_v0  ;;  %v4424_v0 = vsel %vm8685_vm8, %v8528_v21, %v4420_v48 }
 0xdc7   : > { %v4528_v29 = vadd.f32 %v4527_v17, %v4513_v60 }
 0xdc8   : > { %v4428_v20 = vmul.f32 0.5, %v4427_v35  ;;  %v4262_v41 = vpop.xlane.xlu2 %4261  ;;  %v3166_v35 = vadd.s32 %v3150_v51, %v8000_v37 }
 0xdc9   : > { %v4278_v30 = vmul.f32 %v4262_v41, %v7883_v44  ;;  %v3167_v41 = vadd.s32 %v3151_v12, %v8000_v37 }
 0xdca   : > { %v4429_v61 = vsub.f32 1.5, %v4428_v20  ;;  %v4467_v20 = vmul.f32 %v4424_v0, %v8215_v28 }
 0xdcb   : > { %v8637_v59 = vpop.eup %6275  ;;  %v8643_v44 = vadd.f32 1e-05, %v4278_v30  ;;  %vm3183_vm15 = vcmp.lt.s32.totalorder %v3167_v41, %v8003_v23 }
 0xdcc   : > { %v4436_v5 = vmul.f32 %v8637_v59, %v8595_v26  ;;  %v4430_v54 = vmul.f32 %v8581_v45, %v4429_v61  ;;  %vm4442_vm10 = vweird.f32 %v8637_v59  ;;  %v4515_v26 = vsel %vm3180_vm0, %v4466_v57, 0.0 }
 0xdcd   : > { %6277 = vrsqrt.f32 %v8643_v44  ;;  %vm8730_vm14 = vmor %vm4441_vm13, %vm4442_vm10 }
 0xdce   : > { %v4437_v47 = vmul.f32 %v8637_v59, %v4436_v5  ;;  %v4434_v52 = vsel %vm8706_vm12, %v8581_v45, %v4430_v54 }
 0xdcf   : > { %v4468_v30 = vmul.f32 %v4434_v52, %v8221_v3 }
 0xdd0   : > { %v4438_v58 = vmul.f32 0.5, %v4437_v47  ;;  %v3242_v50 = vpop.xlane.xlu2 %3241  ;;  %v3255_v11 = vpop.permute.xlu1 %3254 }
 0xdd1   : > { %v3245_v19 = vadd.f32 %v3242_v50, %v3239_v14  ;;  %v3262_v6 = vmul.f32 %v3255_v11, %v3250_v22 }
 0xdd2   : > { %v4439_v56 = vsub.f32 1.5, %v4438_v58 }
 0xdd3   : > { %v8700_v1 = vpop.eup %6277  ;;  %3248 = vst.msk [vmem:[#allocation3] sm:$0xff] %vm3247_vm4, %v3245_v19  ;;  %v3279_v21 = vadd.f32 %v8114_v16, %v3262_v6  ;;  %v3260_v8 = vpop.permute.xlu0 %3259  ;;  %v4514_v16 = vsel %vm3179_vm11, %v4465_v46, 0.0  ;;  %vm3182_vm11 = vcmp.lt.s32.totalorder %v3166_v35, %v8003_v23 }
 0xdd4   : > { %v4440_v49 = vmul.f32 %v8637_v59, %v4439_v56  ;;  %v4446_v27 = vmul.f32 %v8700_v1, %v8643_v44  ;;  %v3263_v14 = vmul.f32 %v3260_v8, %v3251_v4  ;;  %v4529_v32 = vadd.f32 %v4528_v29, %v4514_v16 }
 0xdd5   : > { %3281 = vst [vmem:[#allocation4] sm:$0xff] %v3279_v21  ;;  %vm4452_vm0 = vweird.f32 %v8700_v1 }
 0xdd6   : > { %v4444_v31 = vsel %vm8730_vm14, %v8637_v59, %v4440_v49  ;;  %v4447_v63 = vmul.f32 %v8700_v1, %v4446_v27  ;;  %v3280_v28 = vadd.f32 %v8116_v2, %v3263_v14  ;;  %4556 = vst [vmem:[%s6967_s5] sm:$0xff] %v3279_v21  ;;  %v4516_v59 = vsel %vm3181_vm3, %v4467_v20, 0.0 }
 0xdd7   : > { %v4469_v3 = vmul.f32 %v4444_v31, %v8227_v55  ;;  %v4530_v36 = vadd.f32 %v4529_v32, %v4515_v26 }
 0xdd8   : > { %v4448_v25 = vmul.f32 0.5, %v4447_v63  ;;  %3282 = vst [vmem:[#allocation4 + $0x8] sm:$0xff] %v3280_v28  ;;  %v3244_v2 = vpop.xlane.xlu2 %3243 }
 0xdd9   : > { %v3246_v18 = vadd.f32 %v3244_v2, %v3240_v53  ;;  %4557 = vst [vmem:[%s6967_s5 + $0x8] sm:$0xff] %v3280_v28 }
 0xdda   : > { %v4449_v39 = vsub.f32 1.5, %v4448_v25  ;;  %v4550_v33 = vld [vmem:[#allocation3] sm:$0xff] }
 0xddb   : > { %6542 = shalt.err (!%p6539_p3)
}
 0xddc   : > { %s6669_s24 = smov 8   ;;  %v4517_v37 = vsel %vm3182_vm11, %v4468_v30, 0.0  ;;  %4552 = vst.msk [vmem:[%s6932_s17] sm:$0xff] %vm3247_vm4, %v4550_v33  ;;  %v4531_v55 = vadd.f32 %v4530_v36, %v4516_v59  ;;  %v4450_v40 = vmul.f32 %v8700_v1, %v4449_v39  ;;  %vm4451_vm2 = vweird.f32 %v8643_v44  ;;  %s8941_s4 = sld [smem:[#allocation52_spill]] }
 0xddd   : > { %5998 = dma.vmem_to_hbm [thread:$0]  (%p6865_p4), %s8741_s25, 256, %s8748_s22, %s8258_s2, %s6667_s13, %s6667_s13, %s6669_s24   ;;  %3249 = vst.msk [vmem:[#allocation3 + $0x8] sm:$0xff] %vm3247_vm4, %v3246_v18  ;;  %v4518_v61 = vsel %vm3183_vm15, %v4469_v3, 0.0  ;;  %vm4453_vm3 = vmor %vm4451_vm2, %vm4452_vm0  ;;  %vm3184_vm1 = vcmp.lt.s32.totalorder %v3168_v38, %v8003_v23  ;;  %v4471_v23 = vld [vmem:[#allocation5] sm:$0x1] }
 0xdde   : > { %v4532_v5 = vadd.f32 %v4531_v55, %v4517_v37  ;;  %v4454_v24 = vsel %vm4453_vm3, %v8700_v1, %v4450_v40  ;;  %s5757_s2 = sshll.u32 %s6637_s0, 3  ;;  %s8942_s15 = scalar_lea.vmem [#allocation24], %s6915_s7 }
 0xddf   : > { %v4470_v7 = vmul.f32 %v4454_v24, %v8233_v13  ;;  %s4669_s30 = sshll.u32 %s8942_s15, 4  ;;  %s4594_s25 = scalar_lea.sflag [#allocation25], %s6890_s21  ;;  %s4670_s30 = int_to_ptr.vmem [resolvable:$true] %s4669_s30 }
 0xde0   : > { %v4533_v62 = vadd.f32 %v4532_v5, %v4518_v61 }
 0xde1   : > { %v4519_v48 = vsel %vm3184_vm1, %v4470_v7, 0.0 }
 0xde2   : > { %v4534_v44 = vadd.f32 %v4533_v62, %v4519_v48  ;;  %s4667_s14 = scalar_lea.hbm %s8941_s4, %s5757_s2  ;;  %s6563_s26 = scalar_lea.hbm %s8941_s4, 16 }
 0xde3   : > { %s4671_s10 = sshll.u32 %s4667_s14, 4  ;;  %s4672_s10 = int_to_ptr.hbm [resolvable:$true] %s4671_s10 }
 0xde4   : > { %v4551_v47 = vld [vmem:[#allocation3 + $0x8] sm:$0xff]  ;;  %v4535_v22 = vrot.slane %v4534_v44, 4  ;;  %s6557_s22 = sshra.s32 %s4672_s10, 4  ;;  %s6558_s22 = int_to_ptr.hbm [resolvable:$true] %s6557_s22 }
 0xde5   : > { %4553 = vst.msk [vmem:[%s6932_s17 + $0x8] sm:$0xff] %vm3247_vm4, %v4551_v47  ;;  %s8943_s17 = smov %s8942_s15  ;;  %s6559_s19 = scalar_lea.hbm %s6558_s22, 8 }
 0xde6   : > { %v4536_v17 = vadd.f32 %v4535_v22, %v4534_v44  ;;  %p6560_p8 = scmp.ne.s32.totalorder %s6558_s22, %s6559_s19  ;;  %p6564_p12 = scmp.lt.s32.totalorder %s6558_s22, %s8941_s4 }
 0xde7   : > { %p6565_p13 = scmp.lt.s32.totalorder %s6563_s26, %s6559_s19 }
 0xde8   : > { %v4537_v60 = vrot.slane %v4536_v17, 2  ;;  %p6561_p10 = pnand %p6560_p8, %p6865_p4 }
 0xde9   : > { %p6566_p0 = por %p6565_p13, %p6564_p12 }
 0xdea   : > { %v4538_v43 = vadd.f32 %v4537_v60, %v4536_v17  ;;  %p6562_p11 = pneg %p6561_p10 }
 0xdec   : > { %v4539_v51 = vrot.slane %v4538_v43, 1  ;;  %p6567_p2 = pnand %p6566_p0, %p6562_p11 }
 0xdee   : > { %v4540_v15 = vadd.f32 %v4539_v51, %v4538_v43 }
 0xdf0   : > { %v4541_v54 = vadd.f32 %v4540_v15, %v4471_v23 }
 0xdf2   : > { %4542 = vst [vmem:[#allocation5] sm:$0x1] %v4541_v54 }
 0xdf9   : > { %v6134_v13 = vld [vmem:[#allocation5] ss:$0 sm:$0xff] }
 0xdfa   : > { %4562 = vst [vmem:[%s8943_s17] sm:$0xff] %v6134_v13 }
 0xdfb   : > { %6570 = shalt.err (!%p6567_p2)
}
 0xdfc   : > { %5999 = dma.vmem_to_hbm [thread:$0]  (%p6865_p4), %s4670_s30, 128, %s4672_s10, %s4594_s25  }
 0xdfd PF: > { %s4691_s21 = sand.u32 1, %s6625_s27   ;;  %p6025_p5 = pnand %p4980_p6, %p6873_p7 }
 0xdfe   : > { %s4692_s7 = scalar_lea.sflag [#allocation11], %s4691_s21 }
 0xdff   : > { %p6026_p9 = pneg %p6025_p5 }
 0xe01   : > { %6612 = dma.done.wait (%p6026_p9), %s4692_s7, 128  }
 0xe02   : > { %6614 = vsyncadd (%p6026_p9), %s4692_s7, 4294967168  ;;  %s8944_s3 = sadd.s32 4294967294, %s6645_s18  }
 0xe03   : > { %s4701_s5 = sand.u32 1, %s8944_s3  }
 0xe04   : > { %s4702_s24 = scalar_lea.sflag [#allocation22], %s4701_s5 }
 0xe05   : > { %6616 = dma.done.wait (%p6026_p9), %s4702_s24, 384  }
 0xe06   : > { %6618 = vsyncadd (%p6026_p9), %s4702_s24, 4294966912  ;;  %s4738_s16 = scalar_lea.sflag [#allocation25], %s4691_s21 }
 0xe07   : > { %6620 = dma.done.wait (%p6026_p9), %s4738_s16, 128  }
 0xe08   : > { %6622 = vsyncadd (%p6026_p9), %s4738_s16, 4294967168  ;;  %s44_s18 = sadd.s32 1, %s6645_s18   ;;  %s8945_s0 = sld [smem:[#allocation33_spill]] }
 0xe09   : > { %p41_p4 = scmp.ge.s32.totalorder %s44_s18, 4   ;;  %s8946_s30 = sld [smem:[#allocation34_spill]] }
 0xe0a   : > { %s8947_s27 = smov %s6629_s28  ;;  %s8948_s28 = smov %s6633_s29 }
 0xe0b   : > { %s8949_s29 = smov %s6871_s20  ;;  %43 = sbr.rel (!%p41_p4) target bundleno = 39 (0x27), region = 226 }
 0xe10   :  { %4744 = vsyncpa [#allocation10], 1 }
 0xe11   :  { %4746 = vsyncpa [#allocation10 + $0x1], 1 }
 0xe12   :  { %4747 = vsyncpa [#allocation13], 1 }
 0xe13   :  { %4748 = vsyncpa [#allocation16], 1 }
 0xe14   :  { %4749 = vsyncpa [#allocation19], 1 }
 0xe15   :  { %4750 = vsyncpa [#allocation11], 1 }
 0xe16   :  { %4752 = vsyncpa [#allocation11 + $0x1], 1 }
 0xe17   :  { %4753 = vsyncpa [#allocation22], 1 }
 0xe18   :  { %4755 = vsyncpa [#allocation22 + $0x1], 1 }
 0xe19   :  { %4756 = vsyncpa [#allocation25], 1 }
 0xe1a   :  { %4758 = vsyncpa [#allocation25 + $0x1], 1 }

</bundles_post_ra>
